<compile_context>
chip_gen: v7x
topology: tpu7x:2x2x1
jax: 0.10.0
libtpu: 0.0.40
codegen_flags: <defaults>
</compile_context>

<pallas_src>
import functools

import jax
import jax.numpy as jnp
from jax.experimental import pallas as pl
from jax.experimental.pallas import tpu as pltpu


_VMEM_LIMIT = 32 * 1024 * 1024  # safe on v5e/v6e/v7x (v7x scoped VMEM = 32 MiB)


def _cdiv(a, b):
    return -(-a // b)


def _round_up(x, m):
    return _cdiv(x, m) * m


# ----------------------------------------------------------------------------
# Kernel 1: Linear + LeakyReLU (tiny: B x noise_size @ noise_size x ngf*8*16)
# ----------------------------------------------------------------------------
def _linear_kernel(x_ref, w_ref, b_ref, o_ref, *, slope):
    y = jnp.dot(x_ref[...], w_ref[...], preferred_element_type=jnp.float32)
    y = y + b_ref[...]
    o_ref[...] = jnp.where(y > 0, y, slope * y).astype(o_ref.dtype)


def linear_leaky(x, w, b, *, slope):
    B, K = x.shape
    N = w.shape[1]
    return pl.pallas_call(
        functools.partial(_linear_kernel, slope=slope),
        out_shape=jax.ShapeDtypeStruct((B, N), jnp.float32),
        grid=(1,),
        in_specs=[
            pl.BlockSpec((B, K), lambda i: (0, 0)),
            pl.BlockSpec((K, N), lambda i: (0, 0)),
            pl.BlockSpec((1, N), lambda i: (0, 0)),
        ],
        out_specs=pl.BlockSpec((B, N), lambda i: (0, 0)),
        compiler_params=pltpu.CompilerParams(
            dimension_semantics=("arbitrary",),
            vmem_limit_bytes=_VMEM_LIMIT),
    )(x.astype(jnp.float32), w.astype(jnp.float32),
      b.reshape(1, N).astype(jnp.float32))


# ----------------------------------------------------------------------------
# Kernel 2: sub-pixel ConvTranspose as an M-tiled matmul  (bias [+ tanh] fused)
#   patches : (M, 4*Cin)  bf16,  M = B*(H+1)*(W+1) windows
#   weight  : (4*Cin, 4*Cout) bf16 (columns = (sy, sx, cout) sub-pixel major)
# ----------------------------------------------------------------------------
def _conv_matmul_kernel(x_ref, w_ref, b_ref, o_ref, *, act, slope):
    y = jnp.dot(x_ref[...], w_ref[...], preferred_element_type=jnp.float32)
    y = y + b_ref[...]
    if act == "leaky":
        y = jnp.where(y > 0, y, slope * y)
    elif act == "tanh":
        y = jnp.tanh(y)
    o_ref[...] = y.astype(o_ref.dtype)


def conv_matmul(patches, wm, bias, *, act=None, slope=0.2, tm=512):
    M, K = patches.shape
    N = wm.shape[1]
    n_tiles = _cdiv(M, tm)
    TM = _round_up(_cdiv(M, n_tiles), 32)      # multiple of 32: bf16/f32 safe
    M_pad = TM * n_tiles
    if M_pad != M:
        patches = jnp.pad(patches, ((0, M_pad - M), (0, 0)))
    out = pl.pallas_call(
        functools.partial(_conv_matmul_kernel, act=act, slope=slope),
        out_shape=jax.ShapeDtypeStruct((M_pad, N), jnp.float32),
        grid=(n_tiles,),
        in_specs=[
            pl.BlockSpec((TM, K), lambda i: (i, 0)),
            pl.BlockSpec((K, N), lambda i: (0, 0)),
            pl.BlockSpec((1, N), lambda i: (0, 0)),
        ],
        out_specs=pl.BlockSpec((TM, N), lambda i: (i, 0)),
        compiler_params=pltpu.CompilerParams(
            dimension_semantics=("parallel",),
            vmem_limit_bytes=_VMEM_LIMIT),
    )(patches, wm, bias.reshape(1, N).astype(jnp.float32))
    return out[:M]


# ----------------------------------------------------------------------------
# Kernel 3: BatchNorm(batch stats, gamma=1, beta=0) + LeakyReLU, lane-dense.
#   Works on the (B*H, W*C) view.  2-pass grid:
#     pass 0: accumulate per-column sum / sumsq into VMEM scratch
#     pass 1: pool columns -> per-channel stats via a constant 0/1 matmul,
#             normalize, activate, store.
# ----------------------------------------------------------------------------
def _bn_act_kernel(x_ref, pool_ref, poolT_ref, o_ref, sum_ref, sq_ref, *,
                   inv_n, eps, slope, act):
    phase = pl.program_id(0)
    tile = pl.program_id(1)

    @pl.when(jnp.logical_and(phase == 0, tile == 0))
    def _init():
        sum_ref[...] = jnp.zeros_like(sum_ref)
        sq_ref[...] = jnp.zeros_like(sq_ref)

    @pl.when(phase == 0)
    def _accumulate():
        x = x_ref[...]
        sum_ref[...] += jnp.sum(x, axis=0, keepdims=True)
        sq_ref[...] += jnp.sum(x * x, axis=0, keepdims=True)

    @pl.when(phase == 1)
    def _normalize():
        x = x_ref[...]
        ch_sum = jnp.dot(sum_ref[...], pool_ref[...],
                         preferred_element_type=jnp.float32)      # (1, C)
        ch_sq = jnp.dot(sq_ref[...], pool_ref[...],
                        preferred_element_type=jnp.float32)       # (1, C)
        mean = ch_sum * inv_n
        var = ch_sq * inv_n - mean * mean                         # one-pass stats
        rstd = jax.lax.rsqrt(var + eps)
        scale = jnp.dot(rstd, poolT_ref[...],
                        preferred_element_type=jnp.float32)       # (1, W*C)
        shift = jnp.dot(mean * rstd, poolT_ref[...],
                        preferred_element_type=jnp.float32)
        y = x * scale - shift
        if act == "leaky":
            y = jnp.where(y > 0, y, slope * y)
        o_ref[...] = y.astype(o_ref.dtype)


def batchnorm_act(x_nhwc, *, act="leaky", slope=0.2, eps=1e-5, tr=256):
    B, H, W, C = x_nhwc.shape
    R, Ccols = B * H, W * C
    x2 = x_nhwc.reshape(R, Ccols)                       # contiguous -> free view
    pool = jnp.tile(jnp.eye(C, dtype=jnp.float32), (W, 1))   # (W*C, C)
    poolT = pool.T                                            # (C, W*C)

    # row-tile must divide R exactly so the stats are exact
    TR = R
    start = (min(tr, R) // 8) * 8
    for cand in range(start, 7, -8):
        if R % cand == 0:
            TR = cand
            break
    n_tiles = R // TR
    inv_n = 1.0 / float(R * W)

    out = pl.pallas_call(
        functools.partial(_bn_act_kernel, inv_n=inv_n, eps=eps,
                          slope=slope, act=act),
        out_shape=jax.ShapeDtypeStruct((R, Ccols), jnp.float32),
        grid=(2, n_tiles),
        in_specs=[
            pl.BlockSpec((TR, Ccols), lambda p, i: (i, 0)),
            pl.BlockSpec((Ccols, C), lambda p, i: (0, 0)),
            pl.BlockSpec((C, Ccols), lambda p, i: (0, 0)),
        ],
        out_specs=pl.BlockSpec((TR, Ccols), lambda p, i: (i, 0)),
        scratch_shapes=[pltpu.VMEM((1, Ccols), jnp.float32),
                        pltpu.VMEM((1, Ccols), jnp.float32)],
        compiler_params=pltpu.CompilerParams(
            dimension_semantics=("arbitrary", "arbitrary"),
            vmem_limit_bytes=_VMEM_LIMIT),
    )(x2, pool, poolT)
    return out.reshape(B, H, W, C)


# ----------------------------------------------------------------------------
# XLA glue: sub-pixel patches / pixel-shuffle (cheap, inside the same jit)
# ----------------------------------------------------------------------------
def _convT_subpixel_patches(x):
    """x: NHWC (B,H,W,C) -> bf16 patches (B*(H+1)*(W+1), 4*C), K order (dy,dx,c)."""
    B, H, W, C = x.shape
    xp = jnp.pad(x.astype(jnp.bfloat16), ((0, 0), (1, 1), (1, 1), (0, 0)))
    p00 = xp[:, :H + 1, :W + 1, :]
    p01 = xp[:, :H + 1, 1:, :]
    p10 = xp[:, 1:, :W + 1, :]
    p11 = xp[:, 1:, 1:, :]
    patches = jnp.concatenate([p00, p01, p10, p11], axis=-1)   # (B,H+1,W+1,4C)
    return patches.reshape(B * (H + 1) * (W + 1), 4 * C)


def _subpixel_to_nhwc(y, B, H, W, Cout):
    """y: (B*(H+1)*(W+1), 4*Cout) with column order (sy,sx,co) -> (B,2H,2W,Cout)."""
    y = y.reshape(B, H + 1, W + 1, 2, 2, Cout)
    y = y.transpose(0, 1, 3, 2, 4, 5).reshape(B, 2 * H + 2, 2 * W + 2, Cout)
    return y[:, 1:2 * H + 1, 1:2 * W + 1, :]


# ----------------------------------------------------------------------------
# Parameter construction (spectral-norm emulation + layout preprocessing)
# ----------------------------------------------------------------------------
def spectral_normalize(w, key, n_iter=1, eps=1e-12):
    # TODO(synk): PyTorch persists the power-iteration vector `u`; here it is a
    # deterministic fresh draw, so sigma only matches statistically.
    w_mat = w.reshape(w.shape[0], -1)
    u = jax.random.normal(key, (w.shape[0],), dtype=jnp.float32)
    u = u / (jnp.linalg.norm(u) + eps)
    v = None
    for _ in range(n_iter):
        v = w_mat.T @ u
        v = v / (jnp.linalg.norm(v) + eps)
        u = w_mat @ v
        u = u / (jnp.linalg.norm(u) + eps)
    sigma = u @ (w_mat @ v)
    return w / sigma


def _convT_weight_matrix(w_t):
    """PyTorch ConvTranspose2d weight (Cin,Cout,4,4) -> (4*Cin, 4*Cout) matmul
    weight for the exact sub-pixel decomposition:
        Wm[(dy,dx,ci),(sy,sx,co)] = w_t[ci, co, 2+sy-2*dy, 2+sx-2*dx]."""
    Cin, Cout = w_t.shape[:2]
    wm = jnp.zeros((2, 2, Cin, 2, 2, Cout), w_t.dtype)
    for dy in range(2):
        for dx in range(2):
            for sy in range(2):
                for sx in range(2):
                    wm = wm.at[dy, dx, :, sy, sx, :].set(
                        w_t[:, :, 2 + sy - 2 * dy, 2 + sx - 2 * dx])
    return wm.reshape(4 * Cin, 4 * Cout)


def _nhwc_linear_col_perm(C, hw=16):
    """Column permutation so the Linear output is directly in NHWC flat order
    (folds the view(B,C,4,4) + NCHW->NHWC transpose into the weight)."""
    p = jnp.arange(hw)
    c = jnp.arange(C)
    return (c[None, :] * hw + p[:, None]).reshape(-1)   # new col j=p*C+c <- old c*hw+p


def init_params(noise_size, ngf, seed=42):
    keys = jax.random.split(jax.random.PRNGKey(seed), 16)
    std = 0.02
    C0 = ngf * 8
    F = C0 * 16
    p = {}
    lin_w = std * jax.random.normal(keys[0], (noise_size, F), jnp.float32)
    lin_b = std * jax.random.normal(keys[1], (F,), jnp.float32)
    perm = _nhwc_linear_col_perm(C0)
    p["lin_w"] = lin_w[:, perm]
    p["lin_b"] = lin_b[perm]

    chans = [C0, ngf * 4, ngf * 2, ngf, 3]
    for li in range(4):
        cin, cout = chans[li], chans[li + 1]
        w = std * jax.random.normal(keys[2 + 3 * li], (cin, cout, 4, 4), jnp.float32)
        w = spectral_normalize(w, keys[3 + 3 * li])
        b = std * jax.random.normal(keys[4 + 3 * li], (cout,), jnp.float32)
        p[f"conv{li}_wm"] = _convT_weight_matrix(w).astype(jnp.bfloat16)
        p[f"conv{li}_b"] = jnp.tile(b, 4)        # columns are (sy, sx, cout)
    return p


# ----------------------------------------------------------------------------
# Full forward
# ----------------------------------------------------------------------------
def generator_forward(noise, params, *, ngf, slope=0.2):
    B = noise.shape[0]
    C0 = ngf * 8

    # Linear + first activation (activation is elementwise, so applying it
    # before the view is equivalent to the PyTorch order).
    x = linear_leaky(noise, params["lin_w"], params["lin_b"], slope=slope)
    x = x.reshape(B, 4, 4, C0)                   # already NHWC (weight permuted)

    chans = [C0, ngf * 4, ngf * 2, ngf, 3]
    H = W = 4
    # Three ConvT -> BN -> activation blocks
    for li in range(3):
        cout = chans[li + 1]
        patches = _convT_subpixel_patches(x)
        y = conv_matmul(patches, params[f"conv{li}_wm"], params[f"conv{li}_b"],
                        act=None, slope=slope)
        y = _subpixel_to_nhwc(y, B, H, W, cout)
        x = batchnorm_act(y, act="leaky", slope=slope)
        H, W = 2 * H, 2 * W

    # Final ConvT + Tanh (fused in the matmul kernel)
    patches = _convT_subpixel_patches(x)
    y = conv_matmul(patches, params["conv3_wm"], params["conv3_b"],
                    act="tanh", slope=slope)
    y = _subpixel_to_nhwc(y, B, H, W, 3)
    return jnp.transpose(y, (0, 3, 1, 2))        # back to NCHW like PyTorch


if __name__ == "__main__":
    batch = 2
    noise_size = 32
    ngf = 8
    g_leaky = True
    sol = 0.2

    key = jax.random.PRNGKey(0)
    noise = jax.random.normal(key, (batch, noise_size), dtype=jnp.float32)

    params = init_params(noise_size, ngf)
    slope = sol if g_leaky else 0.0              # ReLU == LeakyReLU(0)
    fwd = jax.jit(functools.partial(generator_forward, ngf=ngf, slope=slope))

    out = jax.block_until_ready(fwd(noise, params))

    assert out.shape == (batch, 3, 64, 64), out.shape
    assert bool(jnp.all(jnp.isfinite(out)))
    assert bool(jnp.all(jnp.abs(out) <= 1.0 + 1e-6))   # tanh range
    print("KERNEL_OK")
</pallas_src>

<mosaic_0001>
module attributes {stable_mosaic.version = 11 : i64} {
  func.func @_linear_kernel(%arg0: i32, %arg1: memref<2x32xf32, #tpu.memory_space<vmem>>, %arg2: memref<32x1024xf32, #tpu.memory_space<vmem>>, %arg3: memref<1x1024xf32, #tpu.memory_space<vmem>>, %arg4: memref<2x1024xf32, #tpu.memory_space<vmem>>) attributes {dimension_semantics = [#tpu.dimension_semantics<arbitrary>], iteration_bounds = array<i64: 1>, scalar_prefetch = 0 : i64, scratch_operands = 0 : i64, tpu.core_type = #tpu.core_type<tc>, window_params = [{pipeline_mode = #tpu.pipeline_mode<synchronous>, transform_indices = @transform_0, window_bounds = array<i64: 2, 32>}, {pipeline_mode = #tpu.pipeline_mode<synchronous>, transform_indices = @transform_1, window_bounds = array<i64: 32, 1024>}, {pipeline_mode = #tpu.pipeline_mode<synchronous>, transform_indices = @transform_2, window_bounds = array<i64: 1, 1024>}, {pipeline_mode = #tpu.pipeline_mode<synchronous>, transform_indices = @transform_3, window_bounds = array<i64: 2, 1024>}]} {
    %c0 = arith.constant 0 : index
    %c0_0 = arith.constant 0 : index
    %0 = vector.load %arg1[%c0, %c0_0] : memref<2x32xf32, #tpu.memory_space<vmem>>, vector<2x32xf32>
    %c0_1 = arith.constant 0 : index
    %c0_2 = arith.constant 0 : index
    %1 = vector.load %arg2[%c0_1, %c0_2] : memref<32x1024xf32, #tpu.memory_space<vmem>>, vector<32x1024xf32>
    %cst = arith.constant dense<0.000000e+00> : vector<2x1024xf32>
    %2 = tpu.matmul %0, %1, %cst {dimension_numbers = #tpu.dot_dimension_numbers<[1], [0], [0], [1], [0, 0, 1, 1], [], []>} : vector<2x32xf32>, vector<32x1024xf32>, vector<2x1024xf32> -> vector<2x1024xf32>
    %c0_3 = arith.constant 0 : index
    %c0_4 = arith.constant 0 : index
    %3 = vector.load %arg3[%c0_3, %c0_4] : memref<1x1024xf32, #tpu.memory_space<vmem>>, vector<1x1024xf32>
    %4 = vector.broadcast %3 : vector<1x1024xf32> to vector<2x1024xf32>
    %5 = arith.addf %2, %4 : vector<2x1024xf32>
    %cst_5 = arith.constant 0.000000e+00 : f32
    %6 = vector.broadcast %cst_5 : f32 to vector<2x1024xf32>
    %7 = arith.cmpf ogt, %5, %6 : vector<2x1024xf32>
    %cst_6 = arith.constant 2.000000e-01 : f32
    %8 = vector.broadcast %cst_6 : f32 to vector<2x1024xf32>
    %9 = arith.mulf %8, %5 : vector<2x1024xf32>
    %10 = arith.select %7, %5, %9 : vector<2x1024xi1>, vector<2x1024xf32>
    %c0_7 = arith.constant 0 : index
    %c0_8 = arith.constant 0 : index
    %11 = vector.load %arg4[%c0_7, %c0_8] : memref<2x1024xf32, #tpu.memory_space<vmem>>, vector<2x1024xf32>
    tpu.vector_store %arg4[%c0_7, %c0_8], %10 {strides = array<i32>} : memref<2x1024xf32, #tpu.memory_space<vmem>>, vector<2x1024xf32>,
    return
  }
  func.func @transform_0(%arg0: i32) -> (i32, i32) {
    %c0_i32 = arith.constant 0 : i32
    %c0_i32_0 = arith.constant 0 : i32
    %c0_i32_1 = arith.constant 0 : i32
    return %c0_i32, %c0_i32_0 : i32, i32
  }
  func.func @transform_1(%arg0: i32) -> (i32, i32) {
    %c0_i32 = arith.constant 0 : i32
    %c0_i32_0 = arith.constant 0 : i32
    %c0_i32_1 = arith.constant 0 : i32
    return %c0_i32, %c0_i32_0 : i32, i32
  }
  func.func @transform_2(%arg0: i32) -> (i32, i32) {
    %c0_i32 = arith.constant 0 : i32
    %c0_i32_0 = arith.constant 0 : i32
    %c0_i32_1 = arith.constant 0 : i32
    return %c0_i32, %c0_i32_0 : i32, i32
  }
  func.func @transform_3(%arg0: i32) -> (i32, i32) {
    %c0_i32 = arith.constant 0 : i32
    %c0_i32_0 = arith.constant 0 : i32
    %c0_i32_1 = arith.constant 0 : i32
    return %c0_i32, %c0_i32_0 : i32, i32
  }
}

module attributes {stable_mosaic.version = 11 : i64} {
  func.func @_conv_matmul_kernel(%arg0: i32, %arg1: memref<64x256xbf16, #tpu.memory_space<vmem>>, %arg2: memref<256x128xbf16, #tpu.memory_space<vmem>>, %arg3: memref<1x128xf32, #tpu.memory_space<vmem>>, %arg4: memref<64x128xf32, #tpu.memory_space<vmem>>) attributes {dimension_semantics = [#tpu.dimension_semantics<parallel>], iteration_bounds = array<i64: 1>, scalar_prefetch = 0 : i64, scratch_operands = 0 : i64, tpu.core_type = #tpu.core_type<tc>, window_params = [{transform_indices = @transform_0, window_bounds = array<i64: 64, 256>}, {pipeline_mode = #tpu.pipeline_mode<synchronous>, transform_indices = @transform_1, window_bounds = array<i64: 256, 128>}, {pipeline_mode = #tpu.pipeline_mode<synchronous>, transform_indices = @transform_2, window_bounds = array<i64: 1, 128>}, {transform_indices = @transform_3, window_bounds = array<i64: 64, 128>}]} {
    %c0 = arith.constant 0 : index
    %c0_0 = arith.constant 0 : index
    %0 = vector.load %arg1[%c0, %c0_0] : memref<64x256xbf16, #tpu.memory_space<vmem>>, vector<64x256xbf16>
    %c0_1 = arith.constant 0 : index
    %c0_2 = arith.constant 0 : index
    %1 = vector.load %arg2[%c0_1, %c0_2] : memref<256x128xbf16, #tpu.memory_space<vmem>>, vector<256x128xbf16>
    %cst = arith.constant dense<0.000000e+00> : vector<64x128xf32>
    %2 = tpu.matmul %0, %1, %cst {dimension_numbers = #tpu.dot_dimension_numbers<[1], [0], [0], [1], [0, 0, 1, 1], [], []>} : vector<64x256xbf16>, vector<256x128xbf16>, vector<64x128xf32> -> vector<64x128xf32>
    %c0_3 = arith.constant 0 : index
    %c0_4 = arith.constant 0 : index
    %3 = vector.load %arg3[%c0_3, %c0_4] : memref<1x128xf32, #tpu.memory_space<vmem>>, vector<1x128xf32>
    %4 = vector.broadcast %3 : vector<1x128xf32> to vector<64x128xf32>
    %5 = arith.addf %2, %4 : vector<64x128xf32>
    %c0_5 = arith.constant 0 : index
    %c0_6 = arith.constant 0 : index
    %6 = vector.load %arg4[%c0_5, %c0_6] : memref<64x128xf32, #tpu.memory_space<vmem>>, vector<64x128xf32>
    tpu.vector_store %arg4[%c0_5, %c0_6], %5 {strides = array<i32>} : memref<64x128xf32, #tpu.memory_space<vmem>>, vector<64x128xf32>,
    return
  }
  func.func @transform_0(%arg0: i32) -> (i32, i32) {
    %c0_i32 = arith.constant 0 : i32
    %c0_i32_0 = arith.constant 0 : i32
    return %arg0, %c0_i32 : i32, i32
  }
  func.func @transform_1(%arg0: i32) -> (i32, i32) {
    %c0_i32 = arith.constant 0 : i32
    %c0_i32_0 = arith.constant 0 : i32
    %c0_i32_1 = arith.constant 0 : i32
    return %c0_i32, %c0_i32_0 : i32, i32
  }
  func.func @transform_2(%arg0: i32) -> (i32, i32) {
    %c0_i32 = arith.constant 0 : i32
    %c0_i32_0 = arith.constant 0 : i32
    %c0_i32_1 = arith.constant 0 : i32
    return %c0_i32, %c0_i32_0 : i32, i32
  }
  func.func @transform_3(%arg0: i32) -> (i32, i32) {
    %c0_i32 = arith.constant 0 : i32
    %c0_i32_0 = arith.constant 0 : i32
    return %arg0, %c0_i32 : i32, i32
  }
}

module attributes {stable_mosaic.version = 11 : i64} {
  func.func @_bn_act_kernel(%arg0: i32, %arg1: i32, %arg2: memref<16x256xf32, #tpu.memory_space<vmem>>, %arg3: memref<256x32xf32, #tpu.memory_space<vmem>>, %arg4: memref<32x256xf32, #tpu.memory_space<vmem>>, %arg5: memref<16x256xf32, #tpu.memory_space<vmem>>, %arg6: memref<1x256xf32, #tpu.memory_space<vmem>>, %arg7: memref<1x256xf32, #tpu.memory_space<vmem>>) attributes {dimension_semantics = [#tpu.dimension_semantics<arbitrary>, #tpu.dimension_semantics<arbitrary>], iteration_bounds = array<i64: 2, 1>, scalar_prefetch = 0 : i64, scratch_operands = 2 : i64, tpu.core_type = #tpu.core_type<tc>, window_params = [{transform_indices = @transform_0, window_bounds = array<i64: 16, 256>}, {pipeline_mode = #tpu.pipeline_mode<synchronous>, transform_indices = @transform_1, window_bounds = array<i64: 256, 32>}, {pipeline_mode = #tpu.pipeline_mode<synchronous>, transform_indices = @transform_2, window_bounds = array<i64: 32, 256>}, {transform_indices = @transform_3, window_bounds = array<i64: 16, 256>}]} {
    %c0_i32 = arith.constant 0 : i32
    %0 = arith.cmpi eq, %arg0, %c0_i32 : i32
    %c0_i32_0 = arith.constant 0 : i32
    %1 = arith.cmpi eq, %arg1, %c0_i32_0 : i32
    %2 = arith.andi %0, %1 : i1
    %3 = arith.extui %2 : i1 to i32
    %c0_i32_1 = arith.constant 0 : i32
    %4 = arith.cmpi ne, %3, %c0_i32_1 : i32
    scf.if %4 {
      %cst = arith.constant 0.000000e+00 : f32
      %11 = vector.broadcast %cst : f32 to vector<1x256xf32>
      %c0 = arith.constant 0 : index
      %c0_5 = arith.constant 0 : index
      %12 = vector.load %arg6[%c0, %c0_5] : memref<1x256xf32, #tpu.memory_space<vmem>>, vector<1x256xf32>
      tpu.vector_store %arg6[%c0, %c0_5], %11 {strides = array<i32>} : memref<1x256xf32, #tpu.memory_space<vmem>>, vector<1x256xf32>,
      %cst_6 = arith.constant 0.000000e+00 : f32
      %13 = vector.broadcast %cst_6 : f32 to vector<1x256xf32>
      %c0_7 = arith.constant 0 : index
      %c0_8 = arith.constant 0 : index
      %14 = vector.load %arg7[%c0_7, %c0_8] : memref<1x256xf32, #tpu.memory_space<vmem>>, vector<1x256xf32>
      tpu.vector_store %arg7[%c0_7, %c0_8], %13 {strides = array<i32>} : memref<1x256xf32, #tpu.memory_space<vmem>>, vector<1x256xf32>,
    } else {
    }
    %c0_i32_2 = arith.constant 0 : i32
    %5 = arith.cmpi eq, %arg0, %c0_i32_2 : i32
    %6 = arith.extui %5 : i1 to i32
    %c0_i32_3 = arith.constant 0 : i32
    %7 = arith.cmpi ne, %6, %c0_i32_3 : i32
    scf.if %7 {
      %c0 = arith.constant 0 : index
      %c0_5 = arith.constant 0 : index
      %11 = vector.load %arg2[%c0, %c0_5] : memref<16x256xf32, #tpu.memory_space<vmem>>, vector<16x256xf32>
      %c0_6 = arith.constant 0 : index
      %c0_7 = arith.constant 0 : index
      %12 = vector.load %arg6[%c0_6, %c0_7] : memref<1x256xf32, #tpu.memory_space<vmem>>, vector<1x256xf32>
      %cst = arith.constant dense<0.000000e+00> : vector<256xf32>
      %13 = vector.multi_reduction <add>, %11, %cst [0] : vector<16x256xf32> to vector<256xf32>
      %14 = vector.shape_cast %13 : vector<256xf32> to vector<1x256xf32>
      %15 = arith.addf %12, %14 : vector<1x256xf32>
      %c0_8 = arith.constant 0 : index
      %c0_9 = arith.constant 0 : index
      %16 = vector.load %arg6[%c0_8, %c0_9] : memref<1x256xf32, #tpu.memory_space<vmem>>, vector<1x256xf32>
      tpu.vector_store %arg6[%c0_8, %c0_9], %15 {strides = array<i32>} : memref<1x256xf32, #tpu.memory_space<vmem>>, vector<1x256xf32>,
      %c0_10 = arith.constant 0 : index
      %c0_11 = arith.constant 0 : index
      %17 = vector.load %arg7[%c0_10, %c0_11] : memref<1x256xf32, #tpu.memory_space<vmem>>, vector<1x256xf32>
      %18 = arith.mulf %11, %11 : vector<16x256xf32>
      %cst_12 = arith.constant dense<0.000000e+00> : vector<256xf32>
      %19 = vector.multi_reduction <add>, %18, %cst_12 [0] : vector<16x256xf32> to vector<256xf32>
      %20 = vector.shape_cast %19 : vector<256xf32> to vector<1x256xf32>
      %21 = arith.addf %17, %20 : vector<1x256xf32>
      %c0_13 = arith.constant 0 : index
      %c0_14 = arith.constant 0 : index
      %22 = vector.load %arg7[%c0_13, %c0_14] : memref<1x256xf32, #tpu.memory_space<vmem>>, vector<1x256xf32>
      tpu.vector_store %arg7[%c0_13, %c0_14], %21 {strides = array<i32>} : memref<1x256xf32, #tpu.memory_space<vmem>>, vector<1x256xf32>,
    } else {
    }
    %c1_i32 = arith.constant 1 : i32
    %8 = arith.cmpi eq, %arg0, %c1_i32 : i32
    %9 = arith.extui %8 : i1 to i32
    %c0_i32_4 = arith.constant 0 : i32
    %10 = arith.cmpi ne, %9, %c0_i32_4 : i32
    scf.if %10 {
      %c0 = arith.constant 0 : index
      %c0_5 = arith.constant 0 : index
      %11 = vector.load %arg2[%c0, %c0_5] : memref<16x256xf32, #tpu.memory_space<vmem>>, vector<16x256xf32>
      %c0_6 = arith.constant 0 : index
      %c0_7 = arith.constant 0 : index
      %12 = vector.load %arg6[%c0_6, %c0_7] : memref<1x256xf32, #tpu.memory_space<vmem>>, vector<1x256xf32>
      %c0_8 = arith.constant 0 : index
      %c0_9 = arith.constant 0 : index
      %13 = vector.load %arg3[%c0_8, %c0_9] : memref<256x32xf32, #tpu.memory_space<vmem>>, vector<256x32xf32>
      %cst = arith.constant dense<0.000000e+00> : vector<1x32xf32>
      %14 = tpu.matmul %12, %13, %cst {dimension_numbers = #tpu.dot_dimension_numbers<[1], [0], [0], [1], [0, 0, 1, 1], [], []>} : vector<1x256xf32>, vector<256x32xf32>, vector<1x32xf32> -> vector<1x32xf32>
      %c0_10 = arith.constant 0 : index
      %c0_11 = arith.constant 0 : index
      %15 = vector.load %arg7[%c0_10, %c0_11] : memref<1x256xf32, #tpu.memory_space<vmem>>, vector<1x256xf32>
      %c0_12 = arith.constant 0 : index
      %c0_13 = arith.constant 0 : index
      %16 = vector.load %arg3[%c0_12, %c0_13] : memref<256x32xf32, #tpu.memory_space<vmem>>, vector<256x32xf32>
      %cst_14 = arith.constant dense<0.000000e+00> : vector<1x32xf32>
      %17 = tpu.matmul %15, %16, %cst_14 {dimension_numbers = #tpu.dot_dimension_numbers<[1], [0], [0], [1], [0, 0, 1, 1], [], []>} : vector<1x256xf32>, vector<256x32xf32>, vector<1x32xf32> -> vector<1x32xf32>
      %cst_15 = arith.constant 7.812500e-03 : f32
      %18 = vector.broadcast %cst_15 : f32 to vector<1x32xf32>
      %19 = arith.mulf %14, %18 : vector<1x32xf32>
      %cst_16 = arith.constant 7.812500e-03 : f32
      %20 = vector.broadcast %cst_16 : f32 to vector<1x32xf32>
      %21 = arith.mulf %17, %20 : vector<1x32xf32>
      %22 = arith.mulf %19, %19 : vector<1x32xf32>
      %23 = arith.subf %21, %22 : vector<1x32xf32>
      %cst_17 = arith.constant 9.99999974E-6 : f32
      %24 = vector.broadcast %cst_17 : f32 to vector<1x32xf32>
      %25 = arith.addf %23, %24 : vector<1x32xf32>
      %26 = math.rsqrt %25 : vector<1x32xf32>
      %c0_18 = arith.constant 0 : index
      %c0_19 = arith.constant 0 : index
      %27 = vector.load %arg4[%c0_18, %c0_19] : memref<32x256xf32, #tpu.memory_space<vmem>>, vector<32x256xf32>
      %cst_20 = arith.constant dense<0.000000e+00> : vector<1x256xf32>
      %28 = tpu.matmul %26, %27, %cst_20 {dimension_numbers = #tpu.dot_dimension_numbers<[1], [0], [0], [1], [0, 0, 1, 1], [], []>} : vector<1x32xf32>, vector<32x256xf32>, vector<1x256xf32> -> vector<1x256xf32>
      %29 = arith.mulf %19, %26 : vector<1x32xf32>
      %c0_21 = arith.constant 0 : index
      %c0_22 = arith.constant 0 : index
      %30 = vector.load %arg4[%c0_21, %c0_22] : memref<32x256xf32, #tpu.memory_space<vmem>>, vector<32x256xf32>
      %cst_23 = arith.constant dense<0.000000e+00> : vector<1x256xf32>
      %31 = tpu.matmul %29, %30, %cst_23 {dimension_numbers = #tpu.dot_dimension_numbers<[1], [0], [0], [1], [0, 0, 1, 1], [], []>} : vector<1x32xf32>, vector<32x256xf32>, vector<1x256xf32> -> vector<1x256xf32>
      %32 = vector.broadcast %28 : vector<1x256xf32> to vector<16x256xf32>
      %33 = arith.mulf %11, %32 : vector<16x256xf32>
      %34 = vector.broadcast %31 : vector<1x256xf32> to vector<16x256xf32>
      %35 = arith.subf %33, %34 : vector<16x256xf32>
      %cst_24 = arith.constant 0.000000e+00 : f32
      %36 = vector.broadcast %cst_24 : f32 to vector<16x256xf32>
      %37 = arith.cmpf ogt, %35, %36 : vector<16x256xf32>
      %cst_25 = arith.constant 2.000000e-01 : f32
      %38 = vector.broadcast %cst_25 : f32 to vector<16x256xf32>
      %39 = arith.mulf %38, %35 : vector<16x256xf32>
      %40 = arith.select %37, %35, %39 : vector<16x256xi1>, vector<16x256xf32>
      %c0_26 = arith.constant 0 : index
      %c0_27 = arith.constant 0 : index
      %41 = vector.load %arg5[%c0_26, %c0_27] : memref<16x256xf32, #tpu.memory_space<vmem>>, vector<16x256xf32>
      tpu.vector_store %arg5[%c0_26, %c0_27], %40 {strides = array<i32>} : memref<16x256xf32, #tpu.memory_space<vmem>>, vector<16x256xf32>,
    } else {
    }
    return
  }
  func.func @transform_0(%arg0: i32, %arg1: i32) -> (i32, i32) {
    %c0_i32 = arith.constant 0 : i32
    %c0_i32_0 = arith.constant 0 : i32
    return %arg1, %c0_i32 : i32, i32
  }
  func.func @transform_1(%arg0: i32, %arg1: i32) -> (i32, i32) {
    %c0_i32 = arith.constant 0 : i32
    %c0_i32_0 = arith.constant 0 : i32
    %c0_i32_1 = arith.constant 0 : i32
    return %c0_i32, %c0_i32_0 : i32, i32
  }
  func.func @transform_2(%arg0: i32, %arg1: i32) -> (i32, i32) {
    %c0_i32 = arith.constant 0 : i32
    %c0_i32_0 = arith.constant 0 : i32
    %c0_i32_1 = arith.constant 0 : i32
    return %c0_i32, %c0_i32_0 : i32, i32
  }
  func.func @transform_3(%arg0: i32, %arg1: i32) -> (i32, i32) {
    %c0_i32 = arith.constant 0 : i32
    %c0_i32_0 = arith.constant 0 : i32
    return %arg1, %c0_i32 : i32, i32
  }
}

module attributes {stable_mosaic.version = 11 : i64} {
  func.func @_conv_matmul_kernel(%arg0: i32, %arg1: memref<192x128xbf16, #tpu.memory_space<vmem>>, %arg2: memref<128x64xbf16, #tpu.memory_space<vmem>>, %arg3: memref<1x64xf32, #tpu.memory_space<vmem>>, %arg4: memref<192x64xf32, #tpu.memory_space<vmem>>) attributes {dimension_semantics = [#tpu.dimension_semantics<parallel>], iteration_bounds = array<i64: 1>, scalar_prefetch = 0 : i64, scratch_operands = 0 : i64, tpu.core_type = #tpu.core_type<tc>, window_params = [{transform_indices = @transform_0, window_bounds = array<i64: 192, 128>}, {pipeline_mode = #tpu.pipeline_mode<synchronous>, transform_indices = @transform_1, window_bounds = array<i64: 128, 64>}, {pipeline_mode = #tpu.pipeline_mode<synchronous>, transform_indices = @transform_2, window_bounds = array<i64: 1, 64>}, {transform_indices = @transform_3, window_bounds = array<i64: 192, 64>}]} {
    %c0 = arith.constant 0 : index
    %c0_0 = arith.constant 0 : index
    %0 = vector.load %arg1[%c0, %c0_0] : memref<192x128xbf16, #tpu.memory_space<vmem>>, vector<192x128xbf16>
    %c0_1 = arith.constant 0 : index
    %c0_2 = arith.constant 0 : index
    %1 = vector.load %arg2[%c0_1, %c0_2] : memref<128x64xbf16, #tpu.memory_space<vmem>>, vector<128x64xbf16>
    %cst = arith.constant dense<0.000000e+00> : vector<192x64xf32>
    %2 = tpu.matmul %0, %1, %cst {dimension_numbers = #tpu.dot_dimension_numbers<[1], [0], [0], [1], [0, 0, 1, 1], [], []>} : vector<192x128xbf16>, vector<128x64xbf16>, vector<192x64xf32> -> vector<192x64xf32>
    %c0_3 = arith.constant 0 : index
    %c0_4 = arith.constant 0 : index
    %3 = vector.load %arg3[%c0_3, %c0_4] : memref<1x64xf32, #tpu.memory_space<vmem>>, vector<1x64xf32>
    %4 = vector.broadcast %3 : vector<1x64xf32> to vector<192x64xf32>
    %5 = arith.addf %2, %4 : vector<192x64xf32>
    %c0_5 = arith.constant 0 : index
    %c0_6 = arith.constant 0 : index
    %6 = vector.load %arg4[%c0_5, %c0_6] : memref<192x64xf32, #tpu.memory_space<vmem>>, vector<192x64xf32>
    tpu.vector_store %arg4[%c0_5, %c0_6], %5 {strides = array<i32>} : memref<192x64xf32, #tpu.memory_space<vmem>>, vector<192x64xf32>,
    return
  }
  func.func @transform_0(%arg0: i32) -> (i32, i32) {
    %c0_i32 = arith.constant 0 : i32
    %c0_i32_0 = arith.constant 0 : i32
    return %arg0, %c0_i32 : i32, i32
  }
  func.func @transform_1(%arg0: i32) -> (i32, i32) {
    %c0_i32 = arith.constant 0 : i32
    %c0_i32_0 = arith.constant 0 : i32
    %c0_i32_1 = arith.constant 0 : i32
    return %c0_i32, %c0_i32_0 : i32, i32
  }
  func.func @transform_2(%arg0: i32) -> (i32, i32) {
    %c0_i32 = arith.constant 0 : i32
    %c0_i32_0 = arith.constant 0 : i32
    %c0_i32_1 = arith.constant 0 : i32
    return %c0_i32, %c0_i32_0 : i32, i32
  }
  func.func @transform_3(%arg0: i32) -> (i32, i32) {
    %c0_i32 = arith.constant 0 : i32
    %c0_i32_0 = arith.constant 0 : i32
    return %arg0, %c0_i32 : i32, i32
  }
}

module attributes {stable_mosaic.version = 11 : i64} {
  func.func @_bn_act_kernel(%arg0: i32, %arg1: i32, %arg2: memref<32x256xf32, #tpu.memory_space<vmem>>, %arg3: memref<256x16xf32, #tpu.memory_space<vmem>>, %arg4: memref<16x256xf32, #tpu.memory_space<vmem>>, %arg5: memref<32x256xf32, #tpu.memory_space<vmem>>, %arg6: memref<1x256xf32, #tpu.memory_space<vmem>>, %arg7: memref<1x256xf32, #tpu.memory_space<vmem>>) attributes {dimension_semantics = [#tpu.dimension_semantics<arbitrary>, #tpu.dimension_semantics<arbitrary>], iteration_bounds = array<i64: 2, 1>, scalar_prefetch = 0 : i64, scratch_operands = 2 : i64, tpu.core_type = #tpu.core_type<tc>, window_params = [{transform_indices = @transform_0, window_bounds = array<i64: 32, 256>}, {pipeline_mode = #tpu.pipeline_mode<synchronous>, transform_indices = @transform_1, window_bounds = array<i64: 256, 16>}, {pipeline_mode = #tpu.pipeline_mode<synchronous>, transform_indices = @transform_2, window_bounds = array<i64: 16, 256>}, {transform_indices = @transform_3, window_bounds = array<i64: 32, 256>}]} {
    %c0_i32 = arith.constant 0 : i32
    %0 = arith.cmpi eq, %arg0, %c0_i32 : i32
    %c0_i32_0 = arith.constant 0 : i32
    %1 = arith.cmpi eq, %arg1, %c0_i32_0 : i32
    %2 = arith.andi %0, %1 : i1
    %3 = arith.extui %2 : i1 to i32
    %c0_i32_1 = arith.constant 0 : i32
    %4 = arith.cmpi ne, %3, %c0_i32_1 : i32
    scf.if %4 {
      %cst = arith.constant 0.000000e+00 : f32
      %11 = vector.broadcast %cst : f32 to vector<1x256xf32>
      %c0 = arith.constant 0 : index
      %c0_5 = arith.constant 0 : index
      %12 = vector.load %arg6[%c0, %c0_5] : memref<1x256xf32, #tpu.memory_space<vmem>>, vector<1x256xf32>
      tpu.vector_store %arg6[%c0, %c0_5], %11 {strides = array<i32>} : memref<1x256xf32, #tpu.memory_space<vmem>>, vector<1x256xf32>,
      %cst_6 = arith.constant 0.000000e+00 : f32
      %13 = vector.broadcast %cst_6 : f32 to vector<1x256xf32>
      %c0_7 = arith.constant 0 : index
      %c0_8 = arith.constant 0 : index
      %14 = vector.load %arg7[%c0_7, %c0_8] : memref<1x256xf32, #tpu.memory_space<vmem>>, vector<1x256xf32>
      tpu.vector_store %arg7[%c0_7, %c0_8], %13 {strides = array<i32>} : memref<1x256xf32, #tpu.memory_space<vmem>>, vector<1x256xf32>,
    } else {
    }
    %c0_i32_2 = arith.constant 0 : i32
    %5 = arith.cmpi eq, %arg0, %c0_i32_2 : i32
    %6 = arith.extui %5 : i1 to i32
    %c0_i32_3 = arith.constant 0 : i32
    %7 = arith.cmpi ne, %6, %c0_i32_3 : i32
    scf.if %7 {
      %c0 = arith.constant 0 : index
      %c0_5 = arith.constant 0 : index
      %11 = vector.load %arg2[%c0, %c0_5] : memref<32x256xf32, #tpu.memory_space<vmem>>, vector<32x256xf32>
      %c0_6 = arith.constant 0 : index
      %c0_7 = arith.constant 0 : index
      %12 = vector.load %arg6[%c0_6, %c0_7] : memref<1x256xf32, #tpu.memory_space<vmem>>, vector<1x256xf32>
      %cst = arith.constant dense<0.000000e+00> : vector<256xf32>
      %13 = vector.multi_reduction <add>, %11, %cst [0] : vector<32x256xf32> to vector<256xf32>
      %14 = vector.shape_cast %13 : vector<256xf32> to vector<1x256xf32>
      %15 = arith.addf %12, %14 : vector<1x256xf32>
      %c0_8 = arith.constant 0 : index
      %c0_9 = arith.constant 0 : index
      %16 = vector.load %arg6[%c0_8, %c0_9] : memref<1x256xf32, #tpu.memory_space<vmem>>, vector<1x256xf32>
      tpu.vector_store %arg6[%c0_8, %c0_9], %15 {strides = array<i32>} : memref<1x256xf32, #tpu.memory_space<vmem>>, vector<1x256xf32>,
      %c0_10 = arith.constant 0 : index
      %c0_11 = arith.constant 0 : index
      %17 = vector.load %arg7[%c0_10, %c0_11] : memref<1x256xf32, #tpu.memory_space<vmem>>, vector<1x256xf32>
      %18 = arith.mulf %11, %11 : vector<32x256xf32>
      %cst_12 = arith.constant dense<0.000000e+00> : vector<256xf32>
      %19 = vector.multi_reduction <add>, %18, %cst_12 [0] : vector<32x256xf32> to vector<256xf32>
      %20 = vector.shape_cast %19 : vector<256xf32> to vector<1x256xf32>
      %21 = arith.addf %17, %20 : vector<1x256xf32>
      %c0_13 = arith.constant 0 : index
      %c0_14 = arith.constant 0 : index
      %22 = vector.load %arg7[%c0_13, %c0_14] : memref<1x256xf32, #tpu.memory_space<vmem>>, vector<1x256xf32>
      tpu.vector_store %arg7[%c0_13, %c0_14], %21 {strides = array<i32>} : memref<1x256xf32, #tpu.memory_space<vmem>>, vector<1x256xf32>,
    } else {
    }
    %c1_i32 = arith.constant 1 : i32
    %8 = arith.cmpi eq, %arg0, %c1_i32 : i32
    %9 = arith.extui %8 : i1 to i32
    %c0_i32_4 = arith.constant 0 : i32
    %10 = arith.cmpi ne, %9, %c0_i32_4 : i32
    scf.if %10 {
      %c0 = arith.constant 0 : index
      %c0_5 = arith.constant 0 : index
      %11 = vector.load %arg2[%c0, %c0_5] : memref<32x256xf32, #tpu.memory_space<vmem>>, vector<32x256xf32>
      %c0_6 = arith.constant 0 : index
      %c0_7 = arith.constant 0 : index
      %12 = vector.load %arg6[%c0_6, %c0_7] : memref<1x256xf32, #tpu.memory_space<vmem>>, vector<1x256xf32>
      %c0_8 = arith.constant 0 : index
      %c0_9 = arith.constant 0 : index
      %13 = vector.load %arg3[%c0_8, %c0_9] : memref<256x16xf32, #tpu.memory_space<vmem>>, vector<256x16xf32>
      %cst = arith.constant dense<0.000000e+00> : vector<1x16xf32>
      %14 = tpu.matmul %12, %13, %cst {dimension_numbers = #tpu.dot_dimension_numbers<[1], [0], [0], [1], [0, 0, 1, 1], [], []>} : vector<1x256xf32>, vector<256x16xf32>, vector<1x16xf32> -> vector<1x16xf32>
      %c0_10 = arith.constant 0 : index
      %c0_11 = arith.constant 0 : index
      %15 = vector.load %arg7[%c0_10, %c0_11] : memref<1x256xf32, #tpu.memory_space<vmem>>, vector<1x256xf32>
      %c0_12 = arith.constant 0 : index
      %c0_13 = arith.constant 0 : index
      %16 = vector.load %arg3[%c0_12, %c0_13] : memref<256x16xf32, #tpu.memory_space<vmem>>, vector<256x16xf32>
      %cst_14 = arith.constant dense<0.000000e+00> : vector<1x16xf32>
      %17 = tpu.matmul %15, %16, %cst_14 {dimension_numbers = #tpu.dot_dimension_numbers<[1], [0], [0], [1], [0, 0, 1, 1], [], []>} : vector<1x256xf32>, vector<256x16xf32>, vector<1x16xf32> -> vector<1x16xf32>
      %cst_15 = arith.constant 0.001953125 : f32
      %18 = vector.broadcast %cst_15 : f32 to vector<1x16xf32>
      %19 = arith.mulf %14, %18 : vector<1x16xf32>
      %cst_16 = arith.constant 0.001953125 : f32
      %20 = vector.broadcast %cst_16 : f32 to vector<1x16xf32>
      %21 = arith.mulf %17, %20 : vector<1x16xf32>
      %22 = arith.mulf %19, %19 : vector<1x16xf32>
      %23 = arith.subf %21, %22 : vector<1x16xf32>
      %cst_17 = arith.constant 9.99999974E-6 : f32
      %24 = vector.broadcast %cst_17 : f32 to vector<1x16xf32>
      %25 = arith.addf %23, %24 : vector<1x16xf32>
      %26 = math.rsqrt %25 : vector<1x16xf32>
      %c0_18 = arith.constant 0 : index
      %c0_19 = arith.constant 0 : index
      %27 = vector.load %arg4[%c0_18, %c0_19] : memref<16x256xf32, #tpu.memory_space<vmem>>, vector<16x256xf32>
      %cst_20 = arith.constant dense<0.000000e+00> : vector<1x256xf32>
      %28 = tpu.matmul %26, %27, %cst_20 {dimension_numbers = #tpu.dot_dimension_numbers<[1], [0], [0], [1], [0, 0, 1, 1], [], []>} : vector<1x16xf32>, vector<16x256xf32>, vector<1x256xf32> -> vector<1x256xf32>
      %29 = arith.mulf %19, %26 : vector<1x16xf32>
      %c0_21 = arith.constant 0 : index
      %c0_22 = arith.constant 0 : index
      %30 = vector.load %arg4[%c0_21, %c0_22] : memref<16x256xf32, #tpu.memory_space<vmem>>, vector<16x256xf32>
      %cst_23 = arith.constant dense<0.000000e+00> : vector<1x256xf32>
      %31 = tpu.matmul %29, %30, %cst_23 {dimension_numbers = #tpu.dot_dimension_numbers<[1], [0], [0], [1], [0, 0, 1, 1], [], []>} : vector<1x16xf32>, vector<16x256xf32>, vector<1x256xf32> -> vector<1x256xf32>
      %32 = vector.broadcast %28 : vector<1x256xf32> to vector<32x256xf32>
      %33 = arith.mulf %11, %32 : vector<32x256xf32>
      %34 = vector.broadcast %31 : vector<1x256xf32> to vector<32x256xf32>
      %35 = arith.subf %33, %34 : vector<32x256xf32>
      %cst_24 = arith.constant 0.000000e+00 : f32
      %36 = vector.broadcast %cst_24 : f32 to vector<32x256xf32>
      %37 = arith.cmpf ogt, %35, %36 : vector<32x256xf32>
      %cst_25 = arith.constant 2.000000e-01 : f32
      %38 = vector.broadcast %cst_25 : f32 to vector<32x256xf32>
      %39 = arith.mulf %38, %35 : vector<32x256xf32>
      %40 = arith.select %37, %35, %39 : vector<32x256xi1>, vector<32x256xf32>
      %c0_26 = arith.constant 0 : index
      %c0_27 = arith.constant 0 : index
      %41 = vector.load %arg5[%c0_26, %c0_27] : memref<32x256xf32, #tpu.memory_space<vmem>>, vector<32x256xf32>
      tpu.vector_store %arg5[%c0_26, %c0_27], %40 {strides = array<i32>} : memref<32x256xf32, #tpu.memory_space<vmem>>, vector<32x256xf32>,
    } else {
    }
    return
  }
  func.func @transform_0(%arg0: i32, %arg1: i32) -> (i32, i32) {
    %c0_i32 = arith.constant 0 : i32
    %c0_i32_0 = arith.constant 0 : i32
    return %arg1, %c0_i32 : i32, i32
  }
  func.func @transform_1(%arg0: i32, %arg1: i32) -> (i32, i32) {
    %c0_i32 = arith.constant 0 : i32
    %c0_i32_0 = arith.constant 0 : i32
    %c0_i32_1 = arith.constant 0 : i32
    return %c0_i32, %c0_i32_0 : i32, i32
  }
  func.func @transform_2(%arg0: i32, %arg1: i32) -> (i32, i32) {
    %c0_i32 = arith.constant 0 : i32
    %c0_i32_0 = arith.constant 0 : i32
    %c0_i32_1 = arith.constant 0 : i32
    return %c0_i32, %c0_i32_0 : i32, i32
  }
  func.func @transform_3(%arg0: i32, %arg1: i32) -> (i32, i32) {
    %c0_i32 = arith.constant 0 : i32
    %c0_i32_0 = arith.constant 0 : i32
    return %arg1, %c0_i32 : i32, i32
  }
}

module attributes {stable_mosaic.version = 11 : i64} {
  func.func @_conv_matmul_kernel(%arg0: i32, %arg1: memref<320x64xbf16, #tpu.memory_space<vmem>>, %arg2: memref<64x32xbf16, #tpu.memory_space<vmem>>, %arg3: memref<1x32xf32, #tpu.memory_space<vmem>>, %arg4: memref<320x32xf32, #tpu.memory_space<vmem>>) attributes {dimension_semantics = [#tpu.dimension_semantics<parallel>], iteration_bounds = array<i64: 2>, scalar_prefetch = 0 : i64, scratch_operands = 0 : i64, tpu.core_type = #tpu.core_type<tc>, window_params = [{transform_indices = @transform_0, window_bounds = array<i64: 320, 64>}, {pipeline_mode = #tpu.pipeline_mode<synchronous>, transform_indices = @transform_1, window_bounds = array<i64: 64, 32>}, {pipeline_mode = #tpu.pipeline_mode<synchronous>, transform_indices = @transform_2, window_bounds = array<i64: 1, 32>}, {transform_indices = @transform_3, window_bounds = array<i64: 320, 32>}]} {
    %c0 = arith.constant 0 : index
    %c0_0 = arith.constant 0 : index
    %0 = vector.load %arg1[%c0, %c0_0] : memref<320x64xbf16, #tpu.memory_space<vmem>>, vector<320x64xbf16>
    %c0_1 = arith.constant 0 : index
    %c0_2 = arith.constant 0 : index
    %1 = vector.load %arg2[%c0_1, %c0_2] : memref<64x32xbf16, #tpu.memory_space<vmem>>, vector<64x32xbf16>
    %cst = arith.constant dense<0.000000e+00> : vector<320x32xf32>
    %2 = tpu.matmul %0, %1, %cst {dimension_numbers = #tpu.dot_dimension_numbers<[1], [0], [0], [1], [0, 0, 1, 1], [], []>} : vector<320x64xbf16>, vector<64x32xbf16>, vector<320x32xf32> -> vector<320x32xf32>
    %c0_3 = arith.constant 0 : index
    %c0_4 = arith.constant 0 : index
    %3 = vector.load %arg3[%c0_3, %c0_4] : memref<1x32xf32, #tpu.memory_space<vmem>>, vector<1x32xf32>
    %4 = vector.broadcast %3 : vector<1x32xf32> to vector<320x32xf32>
    %5 = arith.addf %2, %4 : vector<320x32xf32>
    %c0_5 = arith.constant 0 : index
    %c0_6 = arith.constant 0 : index
    %6 = vector.load %arg4[%c0_5, %c0_6] : memref<320x32xf32, #tpu.memory_space<vmem>>, vector<320x32xf32>
    tpu.vector_store %arg4[%c0_5, %c0_6], %5 {strides = array<i32>} : memref<320x32xf32, #tpu.memory_space<vmem>>, vector<320x32xf32>,
    return
  }
  func.func @transform_0(%arg0: i32) -> (i32, i32) {
    %c0_i32 = arith.constant 0 : i32
    %c0_i32_0 = arith.constant 0 : i32
    return %arg0, %c0_i32 : i32, i32
  }
  func.func @transform_1(%arg0: i32) -> (i32, i32) {
    %c0_i32 = arith.constant 0 : i32
    %c0_i32_0 = arith.constant 0 : i32
    %c0_i32_1 = arith.constant 0 : i32
    return %c0_i32, %c0_i32_0 : i32, i32
  }
  func.func @transform_2(%arg0: i32) -> (i32, i32) {
    %c0_i32 = arith.constant 0 : i32
    %c0_i32_0 = arith.constant 0 : i32
    %c0_i32_1 = arith.constant 0 : i32
    return %c0_i32, %c0_i32_0 : i32, i32
  }
  func.func @transform_3(%arg0: i32) -> (i32, i32) {
    %c0_i32 = arith.constant 0 : i32
    %c0_i32_0 = arith.constant 0 : i32
    return %arg0, %c0_i32 : i32, i32
  }
}

module attributes {stable_mosaic.version = 11 : i64} {
  func.func @_bn_act_kernel(%arg0: i32, %arg1: i32, %arg2: memref<64x256xf32, #tpu.memory_space<vmem>>, %arg3: memref<256x8xf32, #tpu.memory_space<vmem>>, %arg4: memref<8x256xf32, #tpu.memory_space<vmem>>, %arg5: memref<64x256xf32, #tpu.memory_space<vmem>>, %arg6: memref<1x256xf32, #tpu.memory_space<vmem>>, %arg7: memref<1x256xf32, #tpu.memory_space<vmem>>) attributes {dimension_semantics = [#tpu.dimension_semantics<arbitrary>, #tpu.dimension_semantics<arbitrary>], iteration_bounds = array<i64: 2, 1>, scalar_prefetch = 0 : i64, scratch_operands = 2 : i64, tpu.core_type = #tpu.core_type<tc>, window_params = [{transform_indices = @transform_0, window_bounds = array<i64: 64, 256>}, {pipeline_mode = #tpu.pipeline_mode<synchronous>, transform_indices = @transform_1, window_bounds = array<i64: 256, 8>}, {pipeline_mode = #tpu.pipeline_mode<synchronous>, transform_indices = @transform_2, window_bounds = array<i64: 8, 256>}, {transform_indices = @transform_3, window_bounds = array<i64: 64, 256>}]} {
    %c0_i32 = arith.constant 0 : i32
    %0 = arith.cmpi eq, %arg0, %c0_i32 : i32
    %c0_i32_0 = arith.constant 0 : i32
    %1 = arith.cmpi eq, %arg1, %c0_i32_0 : i32
    %2 = arith.andi %0, %1 : i1
    %3 = arith.extui %2 : i1 to i32
    %c0_i32_1 = arith.constant 0 : i32
    %4 = arith.cmpi ne, %3, %c0_i32_1 : i32
    scf.if %4 {
      %cst = arith.constant 0.000000e+00 : f32
      %11 = vector.broadcast %cst : f32 to vector<1x256xf32>
      %c0 = arith.constant 0 : index
      %c0_5 = arith.constant 0 : index
      %12 = vector.load %arg6[%c0, %c0_5] : memref<1x256xf32, #tpu.memory_space<vmem>>, vector<1x256xf32>
      tpu.vector_store %arg6[%c0, %c0_5], %11 {strides = array<i32>} : memref<1x256xf32, #tpu.memory_space<vmem>>, vector<1x256xf32>,
      %cst_6 = arith.constant 0.000000e+00 : f32
      %13 = vector.broadcast %cst_6 : f32 to vector<1x256xf32>
      %c0_7 = arith.constant 0 : index
      %c0_8 = arith.constant 0 : index
      %14 = vector.load %arg7[%c0_7, %c0_8] : memref<1x256xf32, #tpu.memory_space<vmem>>, vector<1x256xf32>
      tpu.vector_store %arg7[%c0_7, %c0_8], %13 {strides = array<i32>} : memref<1x256xf32, #tpu.memory_space<vmem>>, vector<1x256xf32>,
    } else {
    }
    %c0_i32_2 = arith.constant 0 : i32
    %5 = arith.cmpi eq, %arg0, %c0_i32_2 : i32
    %6 = arith.extui %5 : i1 to i32
    %c0_i32_3 = arith.constant 0 : i32
    %7 = arith.cmpi ne, %6, %c0_i32_3 : i32
    scf.if %7 {
      %c0 = arith.constant 0 : index
      %c0_5 = arith.constant 0 : index
      %11 = vector.load %arg2[%c0, %c0_5] : memref<64x256xf32, #tpu.memory_space<vmem>>, vector<64x256xf32>
      %c0_6 = arith.constant 0 : index
      %c0_7 = arith.constant 0 : index
      %12 = vector.load %arg6[%c0_6, %c0_7] : memref<1x256xf32, #tpu.memory_space<vmem>>, vector<1x256xf32>
      %cst = arith.constant dense<0.000000e+00> : vector<256xf32>
      %13 = vector.multi_reduction <add>, %11, %cst [0] : vector<64x256xf32> to vector<256xf32>
      %14 = vector.shape_cast %13 : vector<256xf32> to vector<1x256xf32>
      %15 = arith.addf %12, %14 : vector<1x256xf32>
      %c0_8 = arith.constant 0 : index
      %c0_9 = arith.constant 0 : index
      %16 = vector.load %arg6[%c0_8, %c0_9] : memref<1x256xf32, #tpu.memory_space<vmem>>, vector<1x256xf32>
      tpu.vector_store %arg6[%c0_8, %c0_9], %15 {strides = array<i32>} : memref<1x256xf32, #tpu.memory_space<vmem>>, vector<1x256xf32>,
      %c0_10 = arith.constant 0 : index
      %c0_11 = arith.constant 0 : index
      %17 = vector.load %arg7[%c0_10, %c0_11] : memref<1x256xf32, #tpu.memory_space<vmem>>, vector<1x256xf32>
      %18 = arith.mulf %11, %11 : vector<64x256xf32>
      %cst_12 = arith.constant dense<0.000000e+00> : vector<256xf32>
      %19 = vector.multi_reduction <add>, %18, %cst_12 [0] : vector<64x256xf32> to vector<256xf32>
      %20 = vector.shape_cast %19 : vector<256xf32> to vector<1x256xf32>
      %21 = arith.addf %17, %20 : vector<1x256xf32>
      %c0_13 = arith.constant 0 : index
      %c0_14 = arith.constant 0 : index
      %22 = vector.load %arg7[%c0_13, %c0_14] : memref<1x256xf32, #tpu.memory_space<vmem>>, vector<1x256xf32>
      tpu.vector_store %arg7[%c0_13, %c0_14], %21 {strides = array<i32>} : memref<1x256xf32, #tpu.memory_space<vmem>>, vector<1x256xf32>,
    } else {
    }
    %c1_i32 = arith.constant 1 : i32
    %8 = arith.cmpi eq, %arg0, %c1_i32 : i32
    %9 = arith.extui %8 : i1 to i32
    %c0_i32_4 = arith.constant 0 : i32
    %10 = arith.cmpi ne, %9, %c0_i32_4 : i32
    scf.if %10 {
      %c0 = arith.constant 0 : index
      %c0_5 = arith.constant 0 : index
      %11 = vector.load %arg2[%c0, %c0_5] : memref<64x256xf32, #tpu.memory_space<vmem>>, vector<64x256xf32>
      %c0_6 = arith.constant 0 : index
      %c0_7 = arith.constant 0 : index
      %12 = vector.load %arg6[%c0_6, %c0_7] : memref<1x256xf32, #tpu.memory_space<vmem>>, vector<1x256xf32>
      %c0_8 = arith.constant 0 : index
      %c0_9 = arith.constant 0 : index
      %13 = vector.load %arg3[%c0_8, %c0_9] : memref<256x8xf32, #tpu.memory_space<vmem>>, vector<256x8xf32>
      %cst = arith.constant dense<0.000000e+00> : vector<1x8xf32>
      %14 = tpu.matmul %12, %13, %cst {dimension_numbers = #tpu.dot_dimension_numbers<[1], [0], [0], [1], [0, 0, 1, 1], [], []>} : vector<1x256xf32>, vector<256x8xf32>, vector<1x8xf32> -> vector<1x8xf32>
      %c0_10 = arith.constant 0 : index
      %c0_11 = arith.constant 0 : index
      %15 = vector.load %arg7[%c0_10, %c0_11] : memref<1x256xf32, #tpu.memory_space<vmem>>, vector<1x256xf32>
      %c0_12 = arith.constant 0 : index
      %c0_13 = arith.constant 0 : index
      %16 = vector.load %arg3[%c0_12, %c0_13] : memref<256x8xf32, #tpu.memory_space<vmem>>, vector<256x8xf32>
      %cst_14 = arith.constant dense<0.000000e+00> : vector<1x8xf32>
      %17 = tpu.matmul %15, %16, %cst_14 {dimension_numbers = #tpu.dot_dimension_numbers<[1], [0], [0], [1], [0, 0, 1, 1], [], []>} : vector<1x256xf32>, vector<256x8xf32>, vector<1x8xf32> -> vector<1x8xf32>
      %cst_15 = arith.constant 4.8828125E-4 : f32
      %18 = vector.broadcast %cst_15 : f32 to vector<1x8xf32>
      %19 = arith.mulf %14, %18 : vector<1x8xf32>
      %cst_16 = arith.constant 4.8828125E-4 : f32
      %20 = vector.broadcast %cst_16 : f32 to vector<1x8xf32>
      %21 = arith.mulf %17, %20 : vector<1x8xf32>
      %22 = arith.mulf %19, %19 : vector<1x8xf32>
      %23 = arith.subf %21, %22 : vector<1x8xf32>
      %cst_17 = arith.constant 9.99999974E-6 : f32
      %24 = vector.broadcast %cst_17 : f32 to vector<1x8xf32>
      %25 = arith.addf %23, %24 : vector<1x8xf32>
      %26 = math.rsqrt %25 : vector<1x8xf32>
      %c0_18 = arith.constant 0 : index
      %c0_19 = arith.constant 0 : index
      %27 = vector.load %arg4[%c0_18, %c0_19] : memref<8x256xf32, #tpu.memory_space<vmem>>, vector<8x256xf32>
      %cst_20 = arith.constant dense<0.000000e+00> : vector<1x256xf32>
      %28 = tpu.matmul %26, %27, %cst_20 {dimension_numbers = #tpu.dot_dimension_numbers<[1], [0], [0], [1], [0, 0, 1, 1], [], []>} : vector<1x8xf32>, vector<8x256xf32>, vector<1x256xf32> -> vector<1x256xf32>
      %29 = arith.mulf %19, %26 : vector<1x8xf32>
      %c0_21 = arith.constant 0 : index
      %c0_22 = arith.constant 0 : index
      %30 = vector.load %arg4[%c0_21, %c0_22] : memref<8x256xf32, #tpu.memory_space<vmem>>, vector<8x256xf32>
      %cst_23 = arith.constant dense<0.000000e+00> : vector<1x256xf32>
      %31 = tpu.matmul %29, %30, %cst_23 {dimension_numbers = #tpu.dot_dimension_numbers<[1], [0], [0], [1], [0, 0, 1, 1], [], []>} : vector<1x8xf32>, vector<8x256xf32>, vector<1x256xf32> -> vector<1x256xf32>
      %32 = vector.broadcast %28 : vector<1x256xf32> to vector<64x256xf32>
      %33 = arith.mulf %11, %32 : vector<64x256xf32>
      %34 = vector.broadcast %31 : vector<1x256xf32> to vector<64x256xf32>
      %35 = arith.subf %33, %34 : vector<64x256xf32>
      %cst_24 = arith.constant 0.000000e+00 : f32
      %36 = vector.broadcast %cst_24 : f32 to vector<64x256xf32>
      %37 = arith.cmpf ogt, %35, %36 : vector<64x256xf32>
      %cst_25 = arith.constant 2.000000e-01 : f32
      %38 = vector.broadcast %cst_25 : f32 to vector<64x256xf32>
      %39 = arith.mulf %38, %35 : vector<64x256xf32>
      %40 = arith.select %37, %35, %39 : vector<64x256xi1>, vector<64x256xf32>
      %c0_26 = arith.constant 0 : index
      %c0_27 = arith.constant 0 : index
      %41 = vector.load %arg5[%c0_26, %c0_27] : memref<64x256xf32, #tpu.memory_space<vmem>>, vector<64x256xf32>
      tpu.vector_store %arg5[%c0_26, %c0_27], %40 {strides = array<i32>} : memref<64x256xf32, #tpu.memory_space<vmem>>, vector<64x256xf32>,
    } else {
    }
    return
  }
  func.func @transform_0(%arg0: i32, %arg1: i32) -> (i32, i32) {
    %c0_i32 = arith.constant 0 : i32
    %c0_i32_0 = arith.constant 0 : i32
    return %arg1, %c0_i32 : i32, i32
  }
  func.func @transform_1(%arg0: i32, %arg1: i32) -> (i32, i32) {
    %c0_i32 = arith.constant 0 : i32
    %c0_i32_0 = arith.constant 0 : i32
    %c0_i32_1 = arith.constant 0 : i32
    return %c0_i32, %c0_i32_0 : i32, i32
  }
  func.func @transform_2(%arg0: i32, %arg1: i32) -> (i32, i32) {
    %c0_i32 = arith.constant 0 : i32
    %c0_i32_0 = arith.constant 0 : i32
    %c0_i32_1 = arith.constant 0 : i32
    return %c0_i32, %c0_i32_0 : i32, i32
  }
  func.func @transform_3(%arg0: i32, %arg1: i32) -> (i32, i32) {
    %c0_i32 = arith.constant 0 : i32
    %c0_i32_0 = arith.constant 0 : i32
    return %arg1, %c0_i32 : i32, i32
  }
}

module attributes {stable_mosaic.version = 11 : i64} {
  func.func @_conv_matmul_kernel(%arg0: i32, %arg1: memref<448x32xbf16, #tpu.memory_space<vmem>>, %arg2: memref<32x12xbf16, #tpu.memory_space<vmem>>, %arg3: memref<1x12xf32, #tpu.memory_space<vmem>>, %arg4: memref<448x12xf32, #tpu.memory_space<vmem>>) attributes {dimension_semantics = [#tpu.dimension_semantics<parallel>], iteration_bounds = array<i64: 5>, scalar_prefetch = 0 : i64, scratch_operands = 0 : i64, tpu.core_type = #tpu.core_type<tc>, window_params = [{transform_indices = @transform_0, window_bounds = array<i64: 448, 32>}, {pipeline_mode = #tpu.pipeline_mode<synchronous>, transform_indices = @transform_1, window_bounds = array<i64: 32, 12>}, {pipeline_mode = #tpu.pipeline_mode<synchronous>, transform_indices = @transform_2, window_bounds = array<i64: 1, 12>}, {transform_indices = @transform_3, window_bounds = array<i64: 448, 12>}]} {
    %c0 = arith.constant 0 : index
    %c0_0 = arith.constant 0 : index
    %0 = vector.load %arg1[%c0, %c0_0] : memref<448x32xbf16, #tpu.memory_space<vmem>>, vector<448x32xbf16>
    %c0_1 = arith.constant 0 : index
    %c0_2 = arith.constant 0 : index
    %1 = vector.load %arg2[%c0_1, %c0_2] : memref<32x12xbf16, #tpu.memory_space<vmem>>, vector<32x12xbf16>
    %cst = arith.constant dense<0.000000e+00> : vector<448x12xf32>
    %2 = tpu.matmul %0, %1, %cst {dimension_numbers = #tpu.dot_dimension_numbers<[1], [0], [0], [1], [0, 0, 1, 1], [], []>} : vector<448x32xbf16>, vector<32x12xbf16>, vector<448x12xf32> -> vector<448x12xf32>
    %c0_3 = arith.constant 0 : index
    %c0_4 = arith.constant 0 : index
    %3 = vector.load %arg3[%c0_3, %c0_4] : memref<1x12xf32, #tpu.memory_space<vmem>>, vector<1x12xf32>
    %4 = vector.broadcast %3 : vector<1x12xf32> to vector<448x12xf32>
    %5 = arith.addf %2, %4 : vector<448x12xf32>
    %6 = math.tanh %5 : vector<448x12xf32>
    %c0_5 = arith.constant 0 : index
    %c0_6 = arith.constant 0 : index
    %7 = vector.load %arg4[%c0_5, %c0_6] : memref<448x12xf32, #tpu.memory_space<vmem>>, vector<448x12xf32>
    tpu.vector_store %arg4[%c0_5, %c0_6], %6 {strides = array<i32>} : memref<448x12xf32, #tpu.memory_space<vmem>>, vector<448x12xf32>,
    return
  }
  func.func @transform_0(%arg0: i32) -> (i32, i32) {
    %c0_i32 = arith.constant 0 : i32
    %c0_i32_0 = arith.constant 0 : i32
    return %arg0, %c0_i32 : i32, i32
  }
  func.func @transform_1(%arg0: i32) -> (i32, i32) {
    %c0_i32 = arith.constant 0 : i32
    %c0_i32_0 = arith.constant 0 : i32
    %c0_i32_1 = arith.constant 0 : i32
    return %c0_i32, %c0_i32_0 : i32, i32
  }
  func.func @transform_2(%arg0: i32) -> (i32, i32) {
    %c0_i32 = arith.constant 0 : i32
    %c0_i32_0 = arith.constant 0 : i32
    %c0_i32_1 = arith.constant 0 : i32
    return %c0_i32, %c0_i32_0 : i32, i32
  }
  func.func @transform_3(%arg0: i32) -> (i32, i32) {
    %c0_i32 = arith.constant 0 : i32
    %c0_i32_0 = arith.constant 0 : i32
    return %arg0, %c0_i32 : i32, i32
  }
}

</mosaic_0001>

<bundles_post_ra>
// kernel: generator_forward.8
= control target key start
LH: loop header
LB: loop body
LE: loop exit
PB: predicated region body
PF: predicated region fallthrough
CT: control target
= control target key end

     0   :  { %8 = vsyncpa [#allocation3], 0  ;;  %s680_s0 = inlined_call_operand.hbm [shape: f32[2,32], index: 0, kind: input, shape index: {}]   ;;  %s681_s1 = inlined_call_operand.hbm [shape: f32[32,1024], index: 1, kind: input, shape index: {}]   ;;  %s682_s2 = inlined_call_operand.hbm [shape: f32[1,1024], index: 2, kind: input, shape index: {}]   ;;  %s683_s3 = inlined_call_operand.vmem [shape: f32[2,1024], index: 3, kind: output, shape index: {}]  }
   0x1   :  { %9 = vsyncpa [#allocation5], 0  ;;  %s603_s12 = smov [#allocation4]   ;;  %s533_s16 = scalar_lea.hbm %s681_s1, 4096 }
   0x2   :  { %s25_s13 = sshll.u32 %s603_s12, 4  ;;  %p534_p0 = scmp.ne.s32.totalorder %s681_s1, %s533_s16  ;;  %s26_s13 = int_to_ptr.vmem [resolvable:$true] %s25_s13 }
   0x3   :  { %p537_p1 = scmp.lt.u32.totalorder %s533_s16, %s681_s1 }
   0x5   :  { %p539_p2 = pnand %p537_p1, %p534_p0 }
   0x7   :  { %542 = shalt.err (!%p539_p2)
}
   0x8   :  { %s543_s21 = scalar_lea.vmem %s26_s13, 4096  ;;  %p548_p4 = scmp.lt.s32.totalorder %s26_s13, %s26_s13 }
   0x9   :  { %p544_p3 = scmp.ne.s32.totalorder %s26_s13, %s543_s21  ;;  %p549_p5 = scmp.lt.s32.totalorder %s543_s21, %s543_s21 }
   0xb   :  { %p550_p6 = por %p549_p5, %p548_p4 }
   0xd   :  { %p551_p7 = pnand %p550_p6, %p544_p3 }
   0xf   :  { %554 = shalt.err (!%p551_p7)
}
  0x10   :  { %s604_s22 = smov 1024   ;;  %s605_s23 = smov 64  }
  0x11   :  { %31 = dma.hbm_to_vmem [thread:$0]  %s681_s1, 4096, %s26_s13, [#allocation5], %s604_s22, %s604_s22, %s605_s23  }
  0x12   :  { %s606_s26 = smov [#allocation2]   ;;  %s607_s28 = smov [#allocation6]  }
  0x13   :  { %s16_s27 = sshll.u32 %s606_s26, 4  ;;  %s38_s29 = sshll.u32 %s607_s28, 4  ;;  %s17_s27 = int_to_ptr.vmem [resolvable:$true] %s16_s27  ;;  %s39_s29 = int_to_ptr.vmem [resolvable:$true] %s38_s29 }
  0x14   :  { %s555_s5 = scalar_lea.hbm %s680_s0, 32 }
  0x15   :  { %p556_p8 = scmp.ne.s32.totalorder %s680_s0, %s555_s5  ;;  %p559_p9 = scmp.lt.u32.totalorder %s555_s5, %s680_s0 }
  0x17   :  { %p561_p10 = pnand %p559_p9, %p556_p8 }
  0x19   :  { %564 = shalt.err (!%p561_p10)
}
  0x1a   :  { %s565_s1 = scalar_lea.vmem %s17_s27, 32  ;;  %p570_p12 = scmp.lt.s32.totalorder %s17_s27, %s17_s27 }
  0x1b   :  { %p566_p11 = scmp.ne.s32.totalorder %s17_s27, %s565_s1  ;;  %p571_p13 = scmp.lt.s32.totalorder %s565_s1, %s565_s1 }
  0x1d   :  { %p572_p0 = por %p571_p13, %p570_p12 }
  0x1f   :  { %p573_p1 = pnand %p572_p0, %p566_p11 }
  0x21   :  { %576 = shalt.err (!%p573_p1)
}
  0x22   :  { %19 = dma.hbm_to_vmem [thread:$0]  %s680_s0, 32, %s17_s27, [#allocation3]  }
  0x23   :  { %s577_s14 = scalar_lea.hbm %s682_s2, 128 }
  0x24   :  { %p578_p2 = scmp.ne.s32.totalorder %s682_s2, %s577_s14  ;;  %p581_p3 = scmp.lt.u32.totalorder %s577_s14, %s682_s2 }
  0x26   :  { %p583_p4 = pnand %p581_p3, %p578_p2 }
  0x28   :  { %586 = shalt.err (!%p583_p4)
}
  0x29   :  { %s587_s19 = scalar_lea.vmem %s39_s29, 128  ;;  %p592_p6 = scmp.lt.s32.totalorder %s39_s29, %s39_s29 }
  0x2a   :  { %p588_p5 = scmp.ne.s32.totalorder %s39_s29, %s587_s19  ;;  %p593_p7 = scmp.lt.s32.totalorder %s587_s19, %s587_s19 }
  0x2c   :  { %p594_p8 = por %p593_p7, %p592_p6 }
  0x2e   :  { %p595_p9 = pnand %p594_p8, %p588_p5 }
  0x30   :  { %598 = shalt.err (!%p595_p9)
}
  0x31   :  { %41 = dma.hbm_to_vmem [thread:$0]  %s682_s2, 128, %s39_s29, [#allocation5]  }
  0x32   :  { %599 = dma.done.wait [#allocation3], 32  }
  0x33   :  { %600 = vsyncadd [#allocation3], 4294967264 }
  0x34   :  { %601 = dma.done.wait [#allocation5], 4224  }
  0x35   :  { %602 = vsyncadd [#allocation5], 4294963072  ;;  %v608_v0 = vmov 0.0   ;;  %v53_v1 = vld [vmem:[#allocation4 + $0x8] sm:$0xff]  ;;  %v55_v3 = vld [vmem:[#allocation4 + $0x18] sm:$0xff]  ;;  %vm126_vm0 = vcmask 261120   ;;  %v86_v50 = vlaneseq }
  0x36   :  { %194 = vmatprep.mubr.f32.mxu0 %v608_v0  ;;  %265 = vmatprep.mubr.f32.mxu1 %v608_v0  ;;  %v61_v2 = vld [vmem:[#allocation4 + $0x48] sm:$0xff]  ;;  %v63_v5 = vld [vmem:[#allocation4 + $0x58] sm:$0xff]  ;;  %v52_v6 = vld [vmem:[#allocation4] sm:$0xff]  ;;  %v609_v56 = vmov 1983009808  }
  0x37   :  { %v494_v4 = vpack.c.bf16 %v61_v2, %v53_v1  ;;  %v60_v7 = vld [vmem:[#allocation4 + $0x40] sm:$0xff]  ;;  %v502_v8 = vpack.c.bf16 %v63_v5, %v55_v3  ;;  %v54_v10 = vld [vmem:[#allocation4 + $0x10] sm:$0xff]  ;;  %v69_v12 = vld [vmem:[#allocation4 + $0x88] sm:$0xff]  ;;  %v87_v51 = vshrl.u32 %v86_v50, 7  ;;  %v449_v57 = vunpack.c.l.s4 %v609_v56 }
  0x38   :  { %v496_v9 = vpack.c.bf16 %v60_v7, %v52_v6  ;;  %v62_v11 = vld [vmem:[#allocation4 + $0x50] sm:$0xff]  ;;  %v77_v14 = vld [vmem:[#allocation4 + $0xc8] sm:$0xff]  ;;  %v71_v15 = vld [vmem:[#allocation4 + $0x98] sm:$0xff] }
  0x39   :  { %495 = vmatprep.subr.bf16.mxu0 %v494_v4  ;;  %v504_v13 = vpack.c.bf16 %v62_v11, %v54_v10  ;;  %v79_v16 = vld [vmem:[#allocation4 + $0xd8] sm:$0xff]  ;;  %503 = vmatprep.subr.bf16.mxu1 %v502_v8  ;;  %v498_v17 = vpack.c.bf16 %v77_v14, %v69_v12  ;;  %v68_v19 = vld [vmem:[#allocation4 + $0x80] sm:$0xff]  ;;  %v70_v21 = vld [vmem:[#allocation4 + $0x90] sm:$0xff]  ;;  %v88_v52 = vsub.s32 0, %v87_v51  ;;  %v96_v54 = vsub.s32 2, %v87_v51 }
  0x3a   :  { %497 = vmatpush1.bf16.msra.mxu0 %v496_v9  ;;  %v506_v18 = vpack.c.bf16 %v79_v16, %v71_v15  ;;  %v76_v20 = vld [vmem:[#allocation4 + $0xc0] sm:$0xff]  ;;  %v78_v23 = vld [vmem:[#allocation4 + $0xd0] sm:$0xff]  ;;  %v57_v24 = vld [vmem:[#allocation4 + $0x28] sm:$0xff]  ;;  %v92_v55 = vsub.s32 1, %v87_v51  ;;  %v100_v58 = vsub.s32 3, %v87_v51  ;;  %v450_v62 = vunpack.c.0.s8 %v449_v57 }
  0x3b   :  { %505 = vmatpush1.bf16.msra.mxu1 %v504_v13  ;;  %v500_v22 = vpack.c.bf16 %v76_v20, %v68_v19  ;;  %499 = vmatprep.subr.bf16.mxu0 %v498_v17  ;;  %v508_v25 = vpack.c.bf16 %v78_v23, %v70_v21  ;;  %v51_v26 = vld [vmem:[#allocation2] sm:$0x3]  ;;  %v65_v27 = vld [vmem:[#allocation4 + $0x68] sm:$0xff]  ;;  %v56_v32 = vld [vmem:[#allocation4 + $0x20] sm:$0xff]  ;;  %v104_v4 = vsub.s32 4, %v87_v51  ;;  %v112_v5 = vsub.s32 6, %v87_v51 }
  0x3c   :  { %507 = vmatprep.subr.bf16.mxu1 %v506_v18  ;;  %v59_v28 = vld [vmem:[#allocation4 + $0x38] sm:$0xff]  ;;  %v510_v30 = vpack.c.bf16 %v65_v27, %v57_v24  ;;  %v64_v33 = vld [vmem:[#allocation4 + $0x60] sm:$0xff]  ;;  %v58_v34 = vld [vmem:[#allocation4 + $0x30] sm:$0xff]  ;;  %v108_v9 = vsub.s32 5, %v87_v51  ;;  %v116_v10 = vsub.s32 7, %v87_v51  ;;  %v453_v12 = vsub.s32 %v450_v62, %v87_v51 }
  0x3d   :  { %v67_v29 = vld [vmem:[#allocation4 + $0x78] sm:$0xff]  ;;  %v512_v35 = vpack.c.bf16 %v64_v33, %v56_v32  ;;  %v66_v36 = vld [vmem:[#allocation4 + $0x70] sm:$0xff]  ;;  %v73_v37 = vld [vmem:[#allocation4 + $0xa8] sm:$0xff] }
  0x3e   :  { %v518_v31 = vpack.c.bf16 %v67_v29, %v59_v28  ;;  %501 = vmatpush1.bf16.msra.mxu0 %v500_v22  ;;  %v81_v38 = vld [vmem:[#allocation4 + $0xe8] sm:$0xff]  ;;  %v520_v39 = vpack.c.bf16 %v66_v36, %v58_v34  ;;  %v75_v41 = vld [vmem:[#allocation4 + $0xb8] sm:$0xff]  ;;  %v72_v43 = vld [vmem:[#allocation4 + $0xa0] sm:$0xff] }
  0x3f   :  { %509 = vmatpush1.bf16.msra.mxu1 %v508_v25  ;;  %511 = vmatprep.subr.bf16.mxu0 %v510_v30  ;;  %v514_v40 = vpack.c.bf16 %v81_v38, %v73_v37  ;;  %v83_v42 = vld [vmem:[#allocation4 + $0xf8] sm:$0xff]  ;;  %v80_v45 = vld [vmem:[#allocation4 + $0xe0] sm:$0xff]  ;;  %v74_v46 = vld [vmem:[#allocation4 + $0xb0] sm:$0xff] }
  0x40   :  { %519 = vmatprep.subr.bf16.mxu1 %v518_v31  ;;  %v522_v44 = vpack.c.bf16 %v83_v42, %v75_v41  ;;  %v82_v47 = vld [vmem:[#allocation4 + $0xf0] sm:$0xff]  ;;  %v516_v48 = vpack.c.bf16 %v80_v45, %v72_v43  ;;  %v84_v53 = vld [vmem:[#allocation6] sm:$0xff] }
  0x41   :  { %490 = vmatmul.mubr.msk.f32.vlgmr.msra.gmra.mrb[0].mxu0 %vm126_vm0, %v51_v26  ;;  %v524_v49 = vpack.c.bf16 %v82_v47, %v74_v46  ;;  %v89_v59 = vrot.slane %v84_v53, %v88_v52  ;;  %v97_v60 = vrot.slane %v84_v53, %v96_v54  ;;  %v93_v61 = vrot.slane %v84_v53, %v92_v55 }
  0x42   :  { %491 = vmatmul.mubr.msk.f32.vlgmr.msra.gmra.mrb[0].mxu1 %vm126_vm0, %v51_v26  ;;  %513 = vmatpush1.bf16.msra.mxu0 %v512_v35  ;;  %v101_v63 = vrot.slane %v84_v53, %v100_v58  ;;  %v105_v18 = vrot.slane %v84_v53, %v104_v4  ;;  %v113_v21 = vrot.slane %v84_v53, %v112_v5 }
  0x43   :  { %521 = vmatpush1.bf16.msra.mxu1 %v520_v39  ;;  %515 = vmatprep.subr.bf16.mxu0 %v514_v40  ;;  %v109_v22 = vrot.slane %v84_v53, %v108_v9  ;;  %v117_v25 = vrot.slane %v84_v53, %v116_v10 }
  0x44   :  { %523 = vmatprep.subr.bf16.mxu1 %v522_v44  ;;  %336 = vmatprep.mubr.f32.mxu0 %v608_v0 }
  0x45   :  { %407 = vmatprep.mubr.f32.mxu1 %v608_v0 }
  0x46   :  { %517 = vmatpush1.bf16.msra.mxu0 %v516_v48 }
  0x47   :  { %525 = vmatpush1.bf16.msra.mxu1 %v524_v49 }
  0x49   :  { %492 = vmatmul.mubr.msk.f32.vlgmr.msra.gmra.mrb[2].mxu0 %vm126_vm0, %v51_v26 }
  0x4a   :  { %493 = vmatmul.mubr.msk.f32.vlgmr.msra.gmra.mrb[2].mxu1 %vm126_vm0, %v51_v26 }
 0x114   :  { %v196_v0 = vpop.f32.mrb[0].mxu0 }
 0x115   :  { %v197_v1 = vadd.f32 %v196_v0, %v89_v59  ;;  %v267_v2 = vpop.f32.mrb[0].mxu1  ;;  %v198_v3 = vpop.f32.mrb[1].mxu0 }
 0x116   :  { %v268_v6 = vadd.f32 %v267_v2, %v97_v60  ;;  %v199_v7 = vadd.f32 %v198_v3, %v93_v61  ;;  %v269_v8 = vpop.f32.mrb[1].mxu1 }
 0x117   :  { %vm414_vm1 = vcmp.gt.f32.partialorder %v197_v1, 0.0  ;;  %v422_v11 = vmul.f32 0.2, %v197_v1  ;;  %v270_v13 = vadd.f32 %v269_v8, %v101_v63 }
 0x118   :  { %vm416_vm2 = vcmp.gt.f32.partialorder %v268_v6, 0.0  ;;  %v424_v14 = vmul.f32 0.2, %v268_v6  ;;  %vm415_vm3 = vcmp.gt.f32.partialorder %v199_v7, 0.0  ;;  %v423_v15 = vmul.f32 0.2, %v199_v7 }
 0x119   :  { %v430_v16 = vsel %vm414_vm1, %v197_v1, %v422_v11  ;;  %vm417_vm4 = vcmp.gt.f32.partialorder %v270_v13, 0.0  ;;  %v425_v17 = vmul.f32 0.2, %v270_v13 }
 0x11a   :  { %v432_v19 = vsel %vm416_vm2, %v268_v6, %v424_v14  ;;  %v431_v20 = vsel %vm415_vm3, %v199_v7, %v423_v15 }
 0x11b   :  { %v446_v23 = vcombine.low %v430_v16, %v431_v20  ;;  %v433_v24 = vsel %vm417_vm4, %v270_v13, %v425_v17 }
 0x11c   :  { %v447_v26 = vcombine.low %v432_v19, %v433_v24  ;;  %v338_v27 = vpop.f32.mrb[2].mxu0 }
 0x11d   :  { %v454_v28 = vrot.slane %v446_v23, %v453_v12  ;;  %v339_v29 = vadd.f32 %v338_v27, %v105_v18  ;;  %v409_v30 = vpop.f32.mrb[2].mxu1  ;;  %v340_v31 = vpop.f32.mrb[3].mxu0 }
 0x11e   :  { %v461_v32 = vrot.slane %v447_v26, %v453_v12  ;;  %v410_v33 = vadd.f32 %v409_v30, %v113_v21  ;;  %v341_v34 = vadd.f32 %v340_v31, %v109_v22  ;;  %v411_v35 = vpop.f32.mrb[3].mxu1 }
 0x11f   :  { %vm418_vm5 = vcmp.gt.f32.partialorder %v339_v29, 0.0  ;;  %v426_v36 = vmul.f32 0.2, %v339_v29  ;;  %v412_v37 = vadd.f32 %v411_v35, %v117_v25 }
 0x120   :  { %v462_v38 = vcombine.low %v454_v28, %v461_v32  ;;  %vm420_vm6 = vcmp.gt.f32.partialorder %v410_v33, 0.0  ;;  %v428_v39 = vmul.f32 0.2, %v410_v33  ;;  %vm419_vm7 = vcmp.gt.f32.partialorder %v341_v34, 0.0 }
 0x121   :  { %v434_v40 = vsel %vm418_vm5, %v339_v29, %v426_v36  ;;  %v427_v41 = vmul.f32 0.2, %v341_v34  ;;  %vm421_vm8 = vcmp.gt.f32.partialorder %v412_v37, 0.0  ;;  %v429_v42 = vmul.f32 0.2, %v412_v37 }
 0x122   :  { %482 = vst [vmem:[%s683_s3] sm:$0xff] %v462_v38  ;;  %v436_v43 = vsel %vm420_vm6, %v410_v33, %v428_v39 }
 0x123   :  { %v435_v44 = vsel %vm419_vm7, %v341_v34, %v427_v41  ;;  %v437_v45 = vsel %vm421_vm8, %v412_v37, %v429_v42 }
 0x124   :  { %v463_v46 = vcombine.low %v434_v40, %v435_v44  ;;  %v464_v47 = vcombine.low %v436_v43, %v437_v45 }
 0x126   :  { %v471_v48 = vrot.slane %v463_v46, %v453_v12  ;;  %v478_v49 = vrot.slane %v464_v47, %v453_v12 }
 0x128   :  { %v479_v50 = vcombine.low %v471_v48, %v478_v49 }
 0x12a   :  { %483 = vst [vmem:[%s683_s3 + $0x8] sm:$0xff] %v479_v50 }
 0x12b   :  { %488 = vsyncpa [#allocation3], 1 }
 0x12c   :  { %489 = vsyncpa [#allocation5], 1 }

// kernel: tile.19
= control target key start
LH: loop header
LB: loop body
LE: loop exit
PB: predicated region body
PF: predicated region fallthrough
CT: control target
= control target key end

     0   :  { %vm92_vm0 = vcmask 1047556   ;;  %s459_s14 = smov 96   ;;  %s460_s26 = smov 64   ;;  %vm3_vm1 = vcmask 261120   ;;  %vm96_vm2 = vcmask 1048320   ;;  %vm183_vm3 = vcmask 785920   ;;  %s904_s0 = inlined_call_operand.vmem [shape: f32[8,32,32], index: 0, kind: input, shape index: {}]   ;;  %s905_s1 = inlined_call_operand.vmem [shape: f32[256,32], index: 1, kind: output, shape index: {}]  }
   0x1   :  { %v392_v0 = vld [vmem:[%s904_s0 + $0x7] ss:$8 sm:$0xf]   ;;  %v387_v3 = vld [vmem:[%s904_s0 + $0x3] ss:$8 sm:$0xf]  }
   0x2   :  { %v393_v1 = vld [vmem:[%s904_s0 + $0x7] ss:$8 sm:$0xf0]   ;;  %v388_v4 = vld [vmem:[%s904_s0 + $0x3] ss:$8 sm:$0xf0]  }
   0x3   :  { %v114_v2 = vsel %vm92_vm0, %v393_v1, %v392_v0  ;;  %v93_v5 = vsel %vm92_vm0, %v388_v4, %v387_v3  ;;  %v395_v6 = vld [vmem:[%s904_s0 + $0x87] ss:$8 sm:$0xf]   ;;  %v389_v9 = vld [vmem:[%s904_s0 + $0x83] ss:$8 sm:$0xf]  }
   0x4   :  { %115 = vrot.lane.b32.xlu1 %v114_v2, %s459_s14  ;;  %v396_v7 = vld [vmem:[%s904_s0 + $0x87] ss:$8 sm:$0xf0]   ;;  %94 = vrot.lane.b32.xlu0 %v93_v5, %s459_s14  ;;  %v390_v10 = vld [vmem:[%s904_s0 + $0x83] ss:$8 sm:$0xf0]  }
   0x5   :  { %v125_v8 = vsel %vm92_vm0, %v396_v7, %v395_v6  ;;  %v103_v11 = vsel %vm92_vm0, %v390_v10, %v389_v9  ;;  %v401_v12 = vld [vmem:[%s904_s0 + $0xc3] ss:$8 sm:$0xf]   ;;  %v407_v18 = vld [vmem:[%s904_s0 + $0xc7] ss:$8 sm:$0xf]  }
   0x6   :  { %v402_v13 = vld [vmem:[%s904_s0 + $0xc3] ss:$8 sm:$0xf0]   ;;  %v408_v19 = vld [vmem:[%s904_s0 + $0xc7] ss:$8 sm:$0xf0]  }
   0x7   :  { %v398_v14 = vld [vmem:[%s904_s0 + $0x43] ss:$8 sm:$0xf]   ;;  %v147_v16 = vsel %vm92_vm0, %v402_v13, %v401_v12  ;;  %v404_v20 = vld [vmem:[%s904_s0 + $0x47] ss:$8 sm:$0xf]   ;;  %v169_v22 = vsel %vm92_vm0, %v408_v19, %v407_v18 }
   0x8   :  { %v399_v15 = vld [vmem:[%s904_s0 + $0x43] ss:$8 sm:$0xf0]   ;;  %126 = vrot.lane.b32.xlu1 %v125_v8, %s459_s14  ;;  %104 = vrot.lane.b32.xlu0 %v103_v11, %s459_s14  ;;  %v405_v21 = vld [vmem:[%s904_s0 + $0x47] ss:$8 sm:$0xf0]  }
   0x9   :  { %v136_v17 = vsel %vm92_vm0, %v399_v15, %v398_v14  ;;  %v158_v23 = vsel %vm92_vm0, %v405_v21, %v404_v20  ;;  %v412_v24 = vld [vmem:[%s904_s0 + $0x82] ss:$8 sm:$0xf]   ;;  %v418_v30 = vld [vmem:[%s904_s0 + $0x86] ss:$8 sm:$0xf]  }
   0xa   :  { %v413_v25 = vld [vmem:[%s904_s0 + $0x82] ss:$8 sm:$0xf0]   ;;  %v419_v31 = vld [vmem:[%s904_s0 + $0x86] ss:$8 sm:$0xf0]  }
   0xb   :  { %v410_v26 = vld [vmem:[%s904_s0 + $0x2] ss:$8 sm:$0xf]   ;;  %v190_v28 = vsel %vm92_vm0, %v413_v25, %v412_v24  ;;  %v415_v32 = vld [vmem:[%s904_s0 + $0x6] ss:$8 sm:$0xf]   ;;  %v212_v34 = vsel %vm92_vm0, %v419_v31, %v418_v30 }
   0xc   :  { %148 = vrot.lane.b32.xlu1 %v147_v16, %s459_s14  ;;  %137 = vrot.lane.b32.xlu0 %v136_v17, %s459_s14  ;;  %v411_v27 = vld [vmem:[%s904_s0 + $0x2] ss:$8 sm:$0xf0]   ;;  %v416_v33 = vld [vmem:[%s904_s0 + $0x6] ss:$8 sm:$0xf0]  }
   0xd   :  { %v180_v29 = vsel %vm92_vm0, %v411_v27, %v410_v26  ;;  %v201_v35 = vsel %vm92_vm0, %v416_v33, %v415_v32  ;;  %v424_v36 = vld [vmem:[%s904_s0 + $0xc2] ss:$8 sm:$0xf]   ;;  %v430_v40 = vld [vmem:[%s904_s0 + $0xc6] ss:$8 sm:$0xf]  }
   0xe   :  { %v425_v37 = vld [vmem:[%s904_s0 + $0xc2] ss:$8 sm:$0xf0]   ;;  %v431_v42 = vld [vmem:[%s904_s0 + $0xc6] ss:$8 sm:$0xf0]  }
   0xf   :  { %v421_v38 = vld [vmem:[%s904_s0 + $0x42] ss:$8 sm:$0xf]   ;;  %v234_v41 = vsel %vm92_vm0, %v425_v37, %v424_v36  ;;  %v427_v43 = vld [vmem:[%s904_s0 + $0x46] ss:$8 sm:$0xf]   ;;  %v256_v53 = vsel %vm92_vm0, %v431_v42, %v430_v40 }
  0x10   :  { %170 = vrot.lane.b32.xlu1 %v169_v22, %s459_s14  ;;  %159 = vrot.lane.b32.xlu0 %v158_v23, %s459_s14  ;;  %v422_v39 = vld [vmem:[%s904_s0 + $0x42] ss:$8 sm:$0xf0]   ;;  %v428_v45 = vld [vmem:[%s904_s0 + $0x46] ss:$8 sm:$0xf0]  }
  0x11   :  { %v223_v44 = vsel %vm92_vm0, %v422_v39, %v421_v38  ;;  %v367_v46 = vld [vmem:[%s904_s0 + $0x80] ss:$4 sm:$0xff]   ;;  %v245_v55 = vsel %vm92_vm0, %v428_v45, %v427_v43  ;;  %v435_v56 = vld [vmem:[%s904_s0 + $0x81] ss:$8 sm:$0xf]   ;;  %s461_s25 = smov 32  }
  0x12   :  { %368 = vst.msk [vmem:[%s905_s1 + $0x20] ss:$8 sm:$0x3] %vm3_vm1, %v367_v46   ;;  %369 = vst.msk [vmem:[%s905_s1 + $0x11] ss:$8 sm:$0xc] %vm3_vm1, %v367_v46  }
  0x13   :  { %370 = vst.msk [vmem:[%s905_s1 + $0x2] ss:$8 sm:$0x30] %vm3_vm1, %v367_v46   ;;  %371 = vst.msk [vmem:[%s905_s1 - $0xd] ss:$8 sm:$0xc0] %vm3_vm1, %v367_v46  }
  0x14   :  { %191 = vrot.lane.b32.xlu1 %v190_v28, %s460_s26  ;;  %181 = vrot.lane.b32.xlu0 %v180_v29, %s460_s26  ;;  %v372_v47 = vld [vmem:[%s904_s0 + $0xa0] ss:$4 sm:$0xff]   ;;  %v436_v57 = vld [vmem:[%s904_s0 + $0x81] ss:$8 sm:$0xf0]   ;;  %vm270_vm4 = vcmask 523520  }
  0x15   :  { %v2_v48 = vld [vmem:[%s904_s0] ss:$4 sm:$0xff]   ;;  %373 = vst.msk [vmem:[%s905_s1 + $0x24] ss:$8 sm:$0x3] %vm3_vm1, %v372_v47   ;;  %v277_v60 = vsel %vm92_vm0, %v436_v57, %v435_v56 }
  0x16   :  { %v352_v49 = vld [vmem:[%s904_s0 + $0x20] ss:$4 sm:$0xff]   ;;  %374 = vst.msk [vmem:[%s905_s1 + $0x15] ss:$8 sm:$0xc] %vm3_vm1, %v372_v47  }
  0x17   :  { %375 = vst.msk [vmem:[%s905_s1 + $0x6] ss:$8 sm:$0x30] %vm3_vm1, %v372_v47   ;;  %376 = vst.msk [vmem:[%s905_s1 - $0x9] ss:$8 sm:$0xc0] %vm3_vm1, %v372_v47  }
  0x18   :  { %213 = vrot.lane.b32.xlu1 %v212_v34, %s460_s26  ;;  %202 = vrot.lane.b32.xlu0 %v201_v35, %s460_s26  ;;  %4 = vst.msk [vmem:[%s905_s1] ss:$8 sm:$0x3] %vm3_vm1, %v2_v48   ;;  %349 = vst.msk [vmem:[%s905_s1 - $0xf] ss:$8 sm:$0xc] %vm3_vm1, %v2_v48  }
  0x19   :  { %350 = vst.msk [vmem:[%s905_s1 - $0x1e] ss:$8 sm:$0x30] %vm3_vm1, %v2_v48   ;;  %351 = vst.msk [vmem:[%s905_s1 - $0x2d] ss:$8 sm:$0xc0] %vm3_vm1, %v2_v48  }
  0x1a   :  { %353 = vst.msk [vmem:[%s905_s1 + $0x4] ss:$8 sm:$0x3] %vm3_vm1, %v352_v49   ;;  %354 = vst.msk [vmem:[%s905_s1 - $0xb] ss:$8 sm:$0xc] %vm3_vm1, %v352_v49  }
  0x1b   :  { %355 = vst.msk [vmem:[%s905_s1 - $0x1a] ss:$8 sm:$0x30] %vm3_vm1, %v352_v49   ;;  %356 = vst.msk [vmem:[%s905_s1 - $0x29] ss:$8 sm:$0xc0] %vm3_vm1, %v352_v49  }
  0x1c   :  { %235 = vrot.lane.b32.xlu1 %v234_v41, %s460_s26  ;;  %v377_v50 = vld [vmem:[%s904_s0 + $0xc0] ss:$4 sm:$0xff]   ;;  %224 = vrot.lane.b32.xlu0 %v223_v44, %s460_s26  ;;  %v433_v58 = vld [vmem:[%s904_s0 + $0x1] ss:$8 sm:$0xf]  }
  0x1d   :  { %v382_v51 = vld [vmem:[%s904_s0 + $0xe0] ss:$4 sm:$0xff]   ;;  %378 = vst.msk [vmem:[%s905_s1 + $0x30] ss:$8 sm:$0x3] %vm3_vm1, %v377_v50  }
  0x1e   :  { %v357_v52 = vld [vmem:[%s904_s0 + $0x40] ss:$4 sm:$0xff]   ;;  %379 = vst.msk [vmem:[%s905_s1 + $0x21] ss:$8 sm:$0xc] %vm3_vm1, %v377_v50  }
  0x1f   :  { %380 = vst.msk [vmem:[%s905_s1 + $0x12] ss:$8 sm:$0x30] %vm3_vm1, %v377_v50   ;;  %381 = vst.msk [vmem:[%s905_s1 + $0x3] ss:$8 sm:$0xc0] %vm3_vm1, %v377_v50  }
  0x20   :  { %383 = vst.msk [vmem:[%s905_s1 + $0x34] ss:$8 sm:$0x3] %vm3_vm1, %v382_v51   ;;  %384 = vst.msk [vmem:[%s905_s1 + $0x25] ss:$8 sm:$0xc] %vm3_vm1, %v382_v51   ;;  %257 = vrot.lane.b32.xlu1 %v256_v53, %s460_s26  ;;  %246 = vrot.lane.b32.xlu0 %v245_v55, %s460_s26 }
  0x21   :  { %385 = vst.msk [vmem:[%s905_s1 + $0x16] ss:$8 sm:$0x30] %vm3_vm1, %v382_v51   ;;  %386 = vst.msk [vmem:[%s905_s1 + $0x7] ss:$8 sm:$0xc0] %vm3_vm1, %v382_v51  }
  0x22   :  { %358 = vst.msk [vmem:[%s905_s1 + $0x10] ss:$8 sm:$0x3] %vm3_vm1, %v357_v52   ;;  %359 = vst.msk [vmem:[%s905_s1 + $0x1] ss:$8 sm:$0xc] %vm3_vm1, %v357_v52  }
  0x23   :  { %360 = vst.msk [vmem:[%s905_s1 - $0xe] ss:$8 sm:$0x30] %vm3_vm1, %v357_v52   ;;  %361 = vst.msk [vmem:[%s905_s1 - $0x1d] ss:$8 sm:$0xc0] %vm3_vm1, %v357_v52  }
  0x24   :  { %v362_v54 = vld [vmem:[%s904_s0 + $0x60] ss:$4 sm:$0xff]   ;;  %v434_v59 = vld [vmem:[%s904_s0 + $0x1] ss:$8 sm:$0xf0]   ;;  %278 = vrot.lane.b32.xlu1 %v277_v60, %s461_s25 }
  0x25   :  { %363 = vst.msk [vmem:[%s905_s1 + $0x14] ss:$8 sm:$0x3] %vm3_vm1, %v362_v54   ;;  %364 = vst.msk [vmem:[%s905_s1 + $0x5] ss:$8 sm:$0xc] %vm3_vm1, %v362_v54   ;;  %v267_v61 = vsel %vm92_vm0, %v434_v59, %v433_v58 }
  0x26   :  { %365 = vst.msk [vmem:[%s905_s1 - $0xa] ss:$8 sm:$0x30] %vm3_vm1, %v362_v54   ;;  %366 = vst.msk [vmem:[%s905_s1 - $0x19] ss:$8 sm:$0xc0] %vm3_vm1, %v362_v54   ;;  %268 = vrot.lane.b32.xlu0 %v267_v61, %s461_s25 }
  0x27   :  { %v441_v62 = vld [vmem:[%s904_s0 + $0x85] ss:$8 sm:$0xf]   ;;  %v447_v4 = vld [vmem:[%s904_s0 + $0xc1] ss:$8 sm:$0xf]  }
  0x28   :  { %v442_v63 = vld [vmem:[%s904_s0 + $0x85] ss:$8 sm:$0xf0]   ;;  %v448_v5 = vld [vmem:[%s904_s0 + $0xc1] ss:$8 sm:$0xf0]  }
  0x29   :  { %v438_v0 = vld [vmem:[%s904_s0 + $0x5] ss:$8 sm:$0xf]   ;;  %v299_v2 = vsel %vm92_vm0, %v442_v63, %v441_v62  ;;  %v444_v6 = vld [vmem:[%s904_s0 + $0x41] ss:$8 sm:$0xf]   ;;  %v321_v8 = vsel %vm92_vm0, %v448_v5, %v447_v4 }
  0x2a   :  { %v439_v1 = vld [vmem:[%s904_s0 + $0x5] ss:$8 sm:$0xf0]   ;;  %v445_v7 = vld [vmem:[%s904_s0 + $0x41] ss:$8 sm:$0xf0]   ;;  %300 = vrot.lane.b32.xlu1 %v299_v2, %s461_s25 }
  0x2b   :  { %v288_v3 = vsel %vm92_vm0, %v439_v1, %v438_v0  ;;  %v310_v9 = vsel %vm92_vm0, %v445_v7, %v444_v6  ;;  %v453_v10 = vld [vmem:[%s904_s0 + $0xc5] ss:$8 sm:$0xf]  }
  0x2c   :  { %289 = vrot.lane.b32.xlu0 %v288_v3, %s461_s25  ;;  %v454_v11 = vld [vmem:[%s904_s0 + $0xc5] ss:$8 sm:$0xf0]  }
  0x2d   :  { %v450_v12 = vld [vmem:[%s904_s0 + $0x45] ss:$8 sm:$0xf]   ;;  %v343_v14 = vsel %vm92_vm0, %v454_v11, %v453_v10 }
  0x2e   :  { %v451_v13 = vld [vmem:[%s904_s0 + $0x45] ss:$8 sm:$0xf0]   ;;  %322 = vrot.lane.b32.xlu1 %v321_v8, %s461_s25 }
  0x2f   :  { %v332_v15 = vsel %vm92_vm0, %v451_v13, %v450_v12 }
  0x30   :  { %311 = vrot.lane.b32.xlu0 %v310_v9, %s461_s25 }
  0x32   :  { %344 = vrot.lane.b32.xlu1 %v343_v14, %s461_s25 }
  0x34   :  { %333 = vrot.lane.b32.xlu0 %v332_v15, %s461_s25 }
  0x76   :  { %v116_v16 = vpop.permute.xlu1 %115   ;;  %v95_v17 = vpop.permute.xlu0 %94  }
  0x77   :  { %394 = vst.msk [vmem:[%s905_s1 + $0x8] sm:$0xff] %vm96_vm2, %v116_v16   ;;  %97 = vst.msk [vmem:[%s905_s1] sm:$0xff] %vm96_vm2, %v95_v17  }
  0x7a   :  { %v127_v18 = vpop.permute.xlu1 %126   ;;  %v105_v19 = vpop.permute.xlu0 %104  }
  0x7b   :  { %397 = vst.msk [vmem:[%s905_s1 + $0x28] sm:$0xff] %vm96_vm2, %v127_v18   ;;  %391 = vst.msk [vmem:[%s905_s1 + $0x20] sm:$0xff] %vm96_vm2, %v105_v19  }
  0x7e   :  { %v149_v20 = vpop.permute.xlu1 %148   ;;  %v138_v21 = vpop.permute.xlu0 %137  }
  0x7f   :  { %403 = vst.msk [vmem:[%s905_s1 + $0x30] sm:$0xff] %vm96_vm2, %v149_v20   ;;  %400 = vst.msk [vmem:[%s905_s1 + $0x10] sm:$0xff] %vm96_vm2, %v138_v21  }
  0x82   :  { %v171_v22 = vpop.permute.xlu1 %170   ;;  %v160_v23 = vpop.permute.xlu0 %159  }
  0x83   :  { %409 = vst.msk [vmem:[%s905_s1 + $0x38] sm:$0xff] %vm96_vm2, %v171_v22   ;;  %406 = vst.msk [vmem:[%s905_s1 + $0x18] sm:$0xff] %vm96_vm2, %v160_v23  }
  0x86   :  { %v192_v24 = vpop.permute.xlu1 %191   ;;  %v182_v25 = vpop.permute.xlu0 %181  }
  0x87   :  { %414 = vst.msk [vmem:[%s905_s1 + $0x20] sm:$0xff] %vm183_vm3, %v192_v24   ;;  %184 = vst.msk [vmem:[%s905_s1] sm:$0xff] %vm183_vm3, %v182_v25  }
  0x8a   :  { %v214_v26 = vpop.permute.xlu1 %213   ;;  %v203_v27 = vpop.permute.xlu0 %202  }
  0x8b   :  { %420 = vst.msk [vmem:[%s905_s1 + $0x28] sm:$0xff] %vm183_vm3, %v214_v26   ;;  %417 = vst.msk [vmem:[%s905_s1 + $0x8] sm:$0xff] %vm183_vm3, %v203_v27  }
  0x8e   :  { %v236_v28 = vpop.permute.xlu1 %235   ;;  %v225_v29 = vpop.permute.xlu0 %224  }
  0x8f   :  { %426 = vst.msk [vmem:[%s905_s1 + $0x30] sm:$0xff] %vm183_vm3, %v236_v28   ;;  %423 = vst.msk [vmem:[%s905_s1 + $0x10] sm:$0xff] %vm183_vm3, %v225_v29  }
  0x92   :  { %v258_v30 = vpop.permute.xlu1 %257   ;;  %v247_v31 = vpop.permute.xlu0 %246  }
  0x93   :  { %432 = vst.msk [vmem:[%s905_s1 + $0x38] sm:$0xff] %vm183_vm3, %v258_v30   ;;  %429 = vst.msk [vmem:[%s905_s1 + $0x18] sm:$0xff] %vm183_vm3, %v247_v31  }
  0x96   :  { %v279_v32 = vpop.permute.xlu1 %278  }
  0x97   :  { %437 = vst.msk [vmem:[%s905_s1 + $0x20] sm:$0xff] %vm270_vm4, %v279_v32  }
  0x98   :  { %v269_v33 = vpop.permute.xlu0 %268  }
  0x99   :  { %271 = vst.msk [vmem:[%s905_s1] sm:$0xff] %vm270_vm4, %v269_v33  }
  0x9c   :  { %v301_v34 = vpop.permute.xlu1 %300  }
  0x9d   :  { %443 = vst.msk [vmem:[%s905_s1 + $0x28] sm:$0xff] %vm270_vm4, %v301_v34  }
  0x9e   :  { %v290_v35 = vpop.permute.xlu0 %289  }
  0x9f   :  { %440 = vst.msk [vmem:[%s905_s1 + $0x8] sm:$0xff] %vm270_vm4, %v290_v35  }
  0xa0   :  { %v323_v36 = vpop.permute.xlu1 %322  }
  0xa1   :  { %449 = vst.msk [vmem:[%s905_s1 + $0x30] sm:$0xff] %vm270_vm4, %v323_v36  }
  0xa2   :  { %v312_v37 = vpop.permute.xlu0 %311  }
  0xa3   :  { %446 = vst.msk [vmem:[%s905_s1 + $0x10] sm:$0xff] %vm270_vm4, %v312_v37  }
  0xa4   :  { %v345_v38 = vpop.permute.xlu1 %344  }
  0xa5   :  { %455 = vst.msk [vmem:[%s905_s1 + $0x38] sm:$0xff] %vm270_vm4, %v345_v38  }
  0xa6   :  { %v334_v39 = vpop.permute.xlu0 %333  }
  0xa7   :  { %452 = vst.msk [vmem:[%s905_s1 + $0x18] sm:$0xff] %vm270_vm4, %v334_v39  }

// kernel: tile.29
= control target key start
LH: loop header
LB: loop body
LE: loop exit
PB: predicated region body
PF: predicated region fallthrough
CT: control target
= control target key end

     0   :  { %vm55_vm0 = vcmask 1041409   ;;  %vm59_vm1 = vcmask 1042434   ;;  %vm63_vm2 = vcmask 1043459   ;;  %vm67_vm3 = vcmask 1044484   ;;  %s1367_s27 = smov 112   ;;  %s1368_s11 = smov 120   ;;  %s2478_s0 = inlined_call_operand.vmem [shape: f32[32,8,8], index: 0, kind: input, shape index: {}]   ;;  %s2479_s1 = inlined_call_operand.vmem [shape: f32[256,8], index: 1, kind: output, shape index: {}]  }
   0x1   :  { %vm71_vm4 = vcmask 1045509   ;;  %vm75_vm5 = vcmask 1046534   ;;  %vm79_vm6 = vcmask 1047559   ;;  %v1114_v0 = vld [vmem:[%s2478_s0 + $0xe] sm:$0x1]   ;;  %s1369_s30 = smov 104  }
   0x2   :  { %v1115_v1 = vld [vmem:[%s2478_s0 + $0x2d] sm:$0x2]   ;;  %v1097_v10 = vld [vmem:[%s2478_s0 + $0xf] sm:$0x1]   ;;  %v1122_v24 = vld [vmem:[%s2478_s0 + $0x1e] sm:$0x1]  }
   0x3   :  { %v1116_v2 = vld [vmem:[%s2478_s0 + $0x4c] sm:$0x4]   ;;  %v125_v4 = vsel %vm55_vm0, %v1115_v1, %v1114_v0  ;;  %v1098_v11 = vld [vmem:[%s2478_s0 + $0x2e] sm:$0x2]   ;;  %v1123_v25 = vld [vmem:[%s2478_s0 + $0x3d] sm:$0x2]  }
   0x4   :  { %v1117_v3 = vld [vmem:[%s2478_s0 + $0x6b] sm:$0x8]   ;;  %v129_v8 = vsel %vm59_vm1, %v1116_v2, %v125_v4  ;;  %v56_v13 = vsel %vm55_vm0, %v1098_v11, %v1097_v10  ;;  %v1099_v14 = vld [vmem:[%s2478_s0 + $0x4d] sm:$0x4]   ;;  %v1124_v26 = vld [vmem:[%s2478_s0 + $0x5c] sm:$0x4]   ;;  %v159_v29 = vsel %vm55_vm0, %v1123_v25, %v1122_v24 }
   0x5   :  { %v1118_v5 = vld [vmem:[%s2478_s0 + $0x8a] sm:$0x10]   ;;  %v133_v12 = vsel %vm63_vm2, %v1117_v3, %v129_v8  ;;  %v1100_v15 = vld [vmem:[%s2478_s0 + $0x6c] sm:$0x8]   ;;  %v60_v18 = vsel %vm59_vm1, %v1099_v14, %v56_v13  ;;  %v1125_v30 = vld [vmem:[%s2478_s0 + $0x7b] sm:$0x8]   ;;  %v163_v35 = vsel %vm59_vm1, %v1124_v26, %v159_v29 }
   0x6   :  { %v1119_v6 = vld [vmem:[%s2478_s0 + $0xa9] sm:$0x20]   ;;  %v1101_v16 = vld [vmem:[%s2478_s0 + $0x8b] sm:$0x10]   ;;  %v137_v17 = vsel %vm67_vm3, %v1118_v5, %v133_v12  ;;  %v64_v23 = vsel %vm63_vm2, %v1100_v15, %v60_v18  ;;  %v1126_v31 = vld [vmem:[%s2478_s0 + $0x9a] sm:$0x10]   ;;  %v167_v40 = vsel %vm63_vm2, %v1125_v30, %v163_v35 }
   0x7   :  { %v1120_v7 = vld [vmem:[%s2478_s0 + $0xc8] sm:$0x40]   ;;  %v1102_v19 = vld [vmem:[%s2478_s0 + $0xaa] sm:$0x20]   ;;  %v141_v22 = vsel %vm71_vm4, %v1119_v6, %v137_v17  ;;  %v68_v28 = vsel %vm67_vm3, %v1101_v16, %v64_v23  ;;  %v1127_v32 = vld [vmem:[%s2478_s0 + $0xb9] sm:$0x20]   ;;  %v171_v45 = vsel %vm67_vm3, %v1126_v31, %v167_v40 }
   0x8   :  { %v1121_v9 = vld [vmem:[%s2478_s0 + $0xe7] sm:$0x80]   ;;  %v1103_v20 = vld [vmem:[%s2478_s0 + $0xc9] sm:$0x40]   ;;  %v145_v27 = vsel %vm75_vm5, %v1120_v7, %v141_v22  ;;  %v72_v34 = vsel %vm71_vm4, %v1102_v19, %v68_v28  ;;  %v1128_v36 = vld [vmem:[%s2478_s0 + $0xd8] sm:$0x40]   ;;  %v175_v50 = vsel %vm71_vm4, %v1127_v32, %v171_v45 }
   0x9   :  { %v1104_v21 = vld [vmem:[%s2478_s0 + $0xe8] sm:$0x80]   ;;  %v149_v33 = vsel %vm79_vm6, %v1121_v9, %v145_v27  ;;  %v1129_v37 = vld [vmem:[%s2478_s0 + $0xf7] sm:$0x80]   ;;  %v1105_v38 = vld [vmem:[%s2478_s0 + $0x1f] sm:$0x1]   ;;  %v76_v39 = vsel %vm75_vm5, %v1103_v20, %v72_v34  ;;  %v179_v55 = vsel %vm75_vm5, %v1128_v36, %v175_v50 }
   0xa   :  { %150 = vrot.lane.b32.xlu1 %v149_v33, %s1367_s27  ;;  %v1106_v41 = vld [vmem:[%s2478_s0 + $0x3e] sm:$0x2]   ;;  %v80_v44 = vsel %vm79_vm6, %v1104_v21, %v76_v39  ;;  %v1139_v53 = vld [vmem:[%s2478_s0 + $0x1d] sm:$0x1]   ;;  %v183_v61 = vsel %vm79_vm6, %v1129_v37, %v179_v55  ;;  %v1131_v5 = vld [vmem:[%s2478_s0 + $0xd] sm:$0x1]  }
   0xb   :  { %v1107_v42 = vld [vmem:[%s2478_s0 + $0x5d] sm:$0x4]   ;;  %v90_v46 = vsel %vm55_vm0, %v1106_v41, %v1105_v38  ;;  %81 = vrot.lane.b32.xlu0 %v80_v44, %s1368_s11  ;;  %v1140_v54 = vld [vmem:[%s2478_s0 + $0x3c] sm:$0x2]   ;;  %v1132_v6 = vld [vmem:[%s2478_s0 + $0x2c] sm:$0x2]  }
   0xc   :  { %v1108_v43 = vld [vmem:[%s2478_s0 + $0x7c] sm:$0x8]   ;;  %v94_v51 = vsel %vm59_vm1, %v1107_v42, %v90_v46  ;;  %v228_v57 = vsel %vm55_vm0, %v1140_v54, %v1139_v53  ;;  %v1141_v58 = vld [vmem:[%s2478_s0 + $0x5b] sm:$0x4]   ;;  %v1133_v7 = vld [vmem:[%s2478_s0 + $0x4b] sm:$0x4]   ;;  %v194_v10 = vsel %vm55_vm0, %v1132_v6, %v1131_v5 }
   0xd   :  { %v1109_v47 = vld [vmem:[%s2478_s0 + $0x9b] sm:$0x10]   ;;  %v98_v56 = vsel %vm63_vm2, %v1108_v43, %v94_v51  ;;  %v1142_v59 = vld [vmem:[%s2478_s0 + $0x7a] sm:$0x8]   ;;  %v232_v63 = vsel %vm59_vm1, %v1141_v58, %v228_v57  ;;  %v1134_v11 = vld [vmem:[%s2478_s0 + $0x6a] sm:$0x8]   ;;  %v198_v16 = vsel %vm59_vm1, %v1133_v7, %v194_v10 }
   0xe   :  { %v1110_v48 = vld [vmem:[%s2478_s0 + $0xba] sm:$0x20]   ;;  %v1143_v60 = vld [vmem:[%s2478_s0 + $0x99] sm:$0x10]   ;;  %v102_v62 = vsel %vm67_vm3, %v1109_v47, %v98_v56  ;;  %184 = vrot.lane.b32.xlu1 %v183_v61, %s1367_s27  ;;  %v236_v4 = vsel %vm63_vm2, %v1142_v59, %v232_v63  ;;  %v1135_v12 = vld [vmem:[%s2478_s0 + $0x89] sm:$0x10]   ;;  %v202_v20 = vsel %vm63_vm2, %v1134_v11, %v198_v16 }
   0xf   :  { %v1111_v49 = vld [vmem:[%s2478_s0 + $0xd9] sm:$0x40]   ;;  %v1144_v0 = vld [vmem:[%s2478_s0 + $0xb8] sm:$0x20]   ;;  %v106_v3 = vsel %vm71_vm4, %v1110_v48, %v102_v62  ;;  %v240_v9 = vsel %vm67_vm3, %v1143_v60, %v236_v4  ;;  %v1136_v13 = vld [vmem:[%s2478_s0 + $0xa8] sm:$0x20]   ;;  %v206_v25 = vsel %vm67_vm3, %v1135_v12, %v202_v20 }
  0x10   :  { %v1112_v52 = vld [vmem:[%s2478_s0 + $0xf8] sm:$0x80]   ;;  %v1145_v1 = vld [vmem:[%s2478_s0 + $0xd7] sm:$0x40]   ;;  %v110_v8 = vsel %vm75_vm5, %v1111_v49, %v106_v3  ;;  %v244_v15 = vsel %vm71_vm4, %v1144_v0, %v240_v9  ;;  %v1137_v17 = vld [vmem:[%s2478_s0 + $0xc7] sm:$0x40]   ;;  %v210_v30 = vsel %vm71_vm4, %v1136_v13, %v206_v25 }
  0x11   :  { %v1146_v2 = vld [vmem:[%s2478_s0 + $0xf6] sm:$0x80]   ;;  %v114_v14 = vsel %vm79_vm6, %v1112_v52, %v110_v8  ;;  %v1138_v18 = vld [vmem:[%s2478_s0 + $0xe6] sm:$0x80]   ;;  %v248_v19 = vsel %vm75_vm5, %v1145_v1, %v244_v15  ;;  %v1156_v21 = vld [vmem:[%s2478_s0 + $0x1c] sm:$0x1]   ;;  %v214_v35 = vsel %vm75_vm5, %v1137_v17, %v210_v30 }
  0x12   :  { %115 = vrot.lane.b32.xlu0 %v114_v14, %s1368_s11  ;;  %v1157_v22 = vld [vmem:[%s2478_s0 + $0x3b] sm:$0x2]   ;;  %v252_v24 = vsel %vm79_vm6, %v1146_v2, %v248_v19  ;;  %v1148_v34 = vld [vmem:[%s2478_s0 + $0xc] sm:$0x1]   ;;  %v218_v40 = vsel %vm79_vm6, %v1138_v18, %v214_v35  ;;  %v1173_v49 = vld [vmem:[%s2478_s0 + $0x1b] sm:$0x1]  }
  0x13   :  { %v1158_v23 = vld [vmem:[%s2478_s0 + $0x5a] sm:$0x4]   ;;  %v297_v26 = vsel %vm55_vm0, %v1157_v22, %v1156_v21  ;;  %253 = vrot.lane.b32.xlu1 %v252_v24, %s1369_s30  ;;  %v1149_v37 = vld [vmem:[%s2478_s0 + $0x2b] sm:$0x2]   ;;  %v1174_v50 = vld [vmem:[%s2478_s0 + $0x3a] sm:$0x2]  }
  0x14   :  { %v1159_v27 = vld [vmem:[%s2478_s0 + $0x79] sm:$0x8]   ;;  %v301_v31 = vsel %vm59_vm1, %v1158_v23, %v297_v26  ;;  %v1150_v38 = vld [vmem:[%s2478_s0 + $0x4a] sm:$0x4]   ;;  %v263_v42 = vsel %vm55_vm0, %v1149_v37, %v1148_v34  ;;  %v366_v53 = vsel %vm55_vm0, %v1174_v50, %v1173_v49  ;;  %v1175_v54 = vld [vmem:[%s2478_s0 + $0x59] sm:$0x4]  }
  0x15   :  { %v1160_v28 = vld [vmem:[%s2478_s0 + $0x98] sm:$0x10]   ;;  %v305_v36 = vsel %vm63_vm2, %v1159_v27, %v301_v31  ;;  %v1151_v39 = vld [vmem:[%s2478_s0 + $0x69] sm:$0x8]   ;;  %v267_v47 = vsel %vm59_vm1, %v1150_v38, %v263_v42  ;;  %v1176_v55 = vld [vmem:[%s2478_s0 + $0x78] sm:$0x8]   ;;  %v370_v59 = vsel %vm59_vm1, %v1175_v54, %v366_v53 }
  0x16   :  { %v1161_v29 = vld [vmem:[%s2478_s0 + $0xb7] sm:$0x20]   ;;  %v309_v41 = vsel %vm67_vm3, %v1160_v28, %v305_v36  ;;  %v1152_v43 = vld [vmem:[%s2478_s0 + $0x88] sm:$0x10]   ;;  %219 = vrot.lane.b32.xlu0 %v218_v40, %s1369_s30  ;;  %v271_v52 = vsel %vm63_vm2, %v1151_v39, %v267_v47  ;;  %v1177_v56 = vld [vmem:[%s2478_s0 + $0x97] sm:$0x10]   ;;  %v374_v0 = vsel %vm63_vm2, %v1176_v55, %v370_v59 }
  0x17   :  { %v1162_v32 = vld [vmem:[%s2478_s0 + $0xd6] sm:$0x40]   ;;  %v1153_v44 = vld [vmem:[%s2478_s0 + $0xa7] sm:$0x20]   ;;  %v313_v46 = vsel %vm71_vm4, %v1161_v29, %v309_v41  ;;  %v275_v58 = vsel %vm67_vm3, %v1152_v43, %v271_v52  ;;  %v1178_v60 = vld [vmem:[%s2478_s0 + $0xb6] sm:$0x20]   ;;  %v378_v5 = vsel %vm67_vm3, %v1177_v56, %v374_v0 }
  0x18   :  { %v1163_v33 = vld [vmem:[%s2478_s0 + $0xf5] sm:$0x80]   ;;  %v1154_v45 = vld [vmem:[%s2478_s0 + $0xc6] sm:$0x40]   ;;  %v317_v51 = vsel %vm75_vm5, %v1162_v32, %v313_v46  ;;  %v1179_v61 = vld [vmem:[%s2478_s0 + $0xd5] sm:$0x40]   ;;  %v279_v63 = vsel %vm71_vm4, %v1153_v44, %v275_v58  ;;  %v382_v11 = vsel %vm71_vm4, %v1178_v60, %v378_v5 }
  0x19   :  { %v1155_v48 = vld [vmem:[%s2478_s0 + $0xe5] sm:$0x80]   ;;  %v321_v57 = vsel %vm79_vm6, %v1163_v33, %v317_v51  ;;  %v1180_v62 = vld [vmem:[%s2478_s0 + $0xf4] sm:$0x80]   ;;  %s1370_s8 = smov 96   ;;  %v283_v4 = vsel %vm75_vm5, %v1154_v45, %v279_v63  ;;  %v386_v15 = vsel %vm75_vm5, %v1179_v61, %v382_v11  ;;  %s1372_s17 = smov 80  }
  0x1a   :  { %322 = vrot.lane.b32.xlu1 %v321_v57, %s1370_s8  ;;  %v1165_v1 = vld [vmem:[%s2478_s0 + $0xb] sm:$0x1]   ;;  %v287_v10 = vsel %vm79_vm6, %v1155_v48, %v283_v4  ;;  %v1190_v17 = vld [vmem:[%s2478_s0 + $0x1a] sm:$0x1]   ;;  %v390_v20 = vsel %vm79_vm6, %v1180_v62, %v386_v15  ;;  %v1182_v30 = vld [vmem:[%s2478_s0 + $0xa] sm:$0x1]  }
  0x1b   :  { %v1166_v2 = vld [vmem:[%s2478_s0 + $0x2a] sm:$0x2]   ;;  %288 = vrot.lane.b32.xlu0 %v287_v10, %s1370_s8  ;;  %v1191_v18 = vld [vmem:[%s2478_s0 + $0x39] sm:$0x2]   ;;  %s1371_s8 = smov 88   ;;  %s1374_s24 = smov 64  }
  0x1c   :  { %v1167_v3 = vld [vmem:[%s2478_s0 + $0x49] sm:$0x4]   ;;  %v332_v6 = vsel %vm55_vm0, %v1166_v2, %v1165_v1  ;;  %v1192_v19 = vld [vmem:[%s2478_s0 + $0x58] sm:$0x4]   ;;  %v435_v22 = vsel %vm55_vm0, %v1191_v18, %v1190_v17  ;;  %v1183_v33 = vld [vmem:[%s2478_s0 + $0x29] sm:$0x2]  }
  0x1d   :  { %v1168_v7 = vld [vmem:[%s2478_s0 + $0x68] sm:$0x8]   ;;  %v336_v12 = vsel %vm59_vm1, %v1167_v3, %v332_v6  ;;  %v1193_v23 = vld [vmem:[%s2478_s0 + $0x77] sm:$0x8]   ;;  %v439_v27 = vsel %vm59_vm1, %v1192_v19, %v435_v22  ;;  %v1184_v34 = vld [vmem:[%s2478_s0 + $0x48] sm:$0x4]   ;;  %v401_v38 = vsel %vm55_vm0, %v1183_v33, %v1182_v30 }
  0x1e   :  { %v1169_v8 = vld [vmem:[%s2478_s0 + $0x87] sm:$0x10]   ;;  %v340_v16 = vsel %vm63_vm2, %v1168_v7, %v336_v12  ;;  %v1194_v24 = vld [vmem:[%s2478_s0 + $0x96] sm:$0x10]   ;;  %391 = vrot.lane.b32.xlu1 %v390_v20, %s1371_s8  ;;  %v443_v32 = vsel %vm63_vm2, %v1193_v23, %v439_v27  ;;  %v1185_v35 = vld [vmem:[%s2478_s0 + $0x67] sm:$0x8]   ;;  %v405_v43 = vsel %vm59_vm1, %v1184_v34, %v401_v38 }
  0x1f   :  { %v1170_v9 = vld [vmem:[%s2478_s0 + $0xa6] sm:$0x20]   ;;  %v344_v21 = vsel %vm67_vm3, %v1169_v8, %v340_v16  ;;  %v1195_v25 = vld [vmem:[%s2478_s0 + $0xb5] sm:$0x20]   ;;  %v447_v37 = vsel %vm67_vm3, %v1194_v24, %v443_v32  ;;  %v1186_v39 = vld [vmem:[%s2478_s0 + $0x86] sm:$0x10]   ;;  %v409_v48 = vsel %vm63_vm2, %v1185_v35, %v405_v43 }
  0x20   :  { %v1171_v13 = vld [vmem:[%s2478_s0 + $0xc5] sm:$0x40]   ;;  %v348_v26 = vsel %vm71_vm4, %v1170_v9, %v344_v21  ;;  %v1196_v28 = vld [vmem:[%s2478_s0 + $0xd4] sm:$0x40]   ;;  %v1187_v40 = vld [vmem:[%s2478_s0 + $0xa5] sm:$0x20]   ;;  %v451_v42 = vsel %vm71_vm4, %v1195_v25, %v447_v37  ;;  %v413_v54 = vsel %vm67_vm3, %v1186_v39, %v409_v48 }
  0x21   :  { %v1172_v14 = vld [vmem:[%s2478_s0 + $0xe4] sm:$0x80]   ;;  %v1197_v29 = vld [vmem:[%s2478_s0 + $0xf3] sm:$0x80]   ;;  %v352_v31 = vsel %vm75_vm5, %v1171_v13, %v348_v26  ;;  %v1188_v41 = vld [vmem:[%s2478_s0 + $0xc4] sm:$0x40]   ;;  %v455_v47 = vsel %vm75_vm5, %v1196_v28, %v451_v42  ;;  %v417_v59 = vsel %vm71_vm4, %v1187_v40, %v413_v54 }
  0x22   :  { %v356_v36 = vsel %vm79_vm6, %v1172_v14, %v352_v31  ;;  %v1189_v44 = vld [vmem:[%s2478_s0 + $0xe3] sm:$0x80]   ;;  %v1207_v45 = vld [vmem:[%s2478_s0 + $0x19] sm:$0x1]   ;;  %v459_v53 = vsel %vm79_vm6, %v1197_v29, %v455_v47  ;;  %v1199_v61 = vld [vmem:[%s2478_s0 + $0x9] sm:$0x1]   ;;  %v421_v0 = vsel %vm75_vm5, %v1188_v41, %v417_v59 }
  0x23   :  { %357 = vrot.lane.b32.xlu0 %v356_v36, %s1371_s8  ;;  %v1208_v46 = vld [vmem:[%s2478_s0 + $0x38] sm:$0x2]   ;;  %460 = vrot.lane.b32.xlu1 %v459_v53, %s1372_s17  ;;  %v1200_v62 = vld [vmem:[%s2478_s0 + $0x28] sm:$0x2]   ;;  %v425_v6 = vsel %vm79_vm6, %v1189_v44, %v421_v0  ;;  %s1376_s3 = smov 48   ;;  %s1378_s12 = smov 32  }
  0x24   :  { %v504_v49 = vsel %vm55_vm0, %v1208_v46, %v1207_v45  ;;  %v1209_v50 = vld [vmem:[%s2478_s0 + $0x57] sm:$0x4]   ;;  %v1201_v63 = vld [vmem:[%s2478_s0 + $0x47] sm:$0x4]   ;;  %v470_v2 = vsel %vm55_vm0, %v1200_v62, %v1199_v61  ;;  %v1224_v13 = vld [vmem:[%s2478_s0 + $0x18] sm:$0x1]  }
  0x25   :  { %v1210_v51 = vld [vmem:[%s2478_s0 + $0x76] sm:$0x8]   ;;  %v508_v55 = vsel %vm59_vm1, %v1209_v50, %v504_v49  ;;  %v1202_v3 = vld [vmem:[%s2478_s0 + $0x66] sm:$0x8]   ;;  %v474_v8 = vsel %vm59_vm1, %v1201_v63, %v470_v2  ;;  %v1225_v14 = vld [vmem:[%s2478_s0 + $0x37] sm:$0x2]  }
  0x26   :  { %v1211_v52 = vld [vmem:[%s2478_s0 + $0x95] sm:$0x10]   ;;  %v512_v60 = vsel %vm63_vm2, %v1210_v51, %v508_v55  ;;  %v1203_v4 = vld [vmem:[%s2478_s0 + $0x85] sm:$0x10]   ;;  %v478_v12 = vsel %vm63_vm2, %v1202_v3, %v474_v8  ;;  %v1226_v15 = vld [vmem:[%s2478_s0 + $0x56] sm:$0x4]   ;;  %v573_v18 = vsel %vm55_vm0, %v1225_v14, %v1224_v13 }
  0x27   :  { %v1212_v56 = vld [vmem:[%s2478_s0 + $0xb4] sm:$0x20]   ;;  %v516_v1 = vsel %vm67_vm3, %v1211_v52, %v512_v60  ;;  %v1204_v5 = vld [vmem:[%s2478_s0 + $0xa4] sm:$0x20]   ;;  %426 = vrot.lane.b32.xlu0 %v425_v6, %s1372_s17  ;;  %v482_v17 = vsel %vm67_vm3, %v1203_v4, %v478_v12  ;;  %v1227_v19 = vld [vmem:[%s2478_s0 + $0x75] sm:$0x8]   ;;  %v577_v23 = vsel %vm59_vm1, %v1226_v15, %v573_v18 }
  0x28   :  { %v1213_v57 = vld [vmem:[%s2478_s0 + $0xd3] sm:$0x40]   ;;  %v520_v7 = vsel %vm71_vm4, %v1212_v56, %v516_v1  ;;  %v1205_v9 = vld [vmem:[%s2478_s0 + $0xc3] sm:$0x40]   ;;  %v1228_v20 = vld [vmem:[%s2478_s0 + $0x94] sm:$0x10]   ;;  %v486_v22 = vsel %vm71_vm4, %v1204_v5, %v482_v17  ;;  %v581_v28 = vsel %vm63_vm2, %v1227_v19, %v577_v23 }
  0x29   :  { %v1214_v58 = vld [vmem:[%s2478_s0 + $0xf2] sm:$0x80]   ;;  %v1206_v10 = vld [vmem:[%s2478_s0 + $0xe2] sm:$0x80]   ;;  %v524_v11 = vsel %vm75_vm5, %v1213_v57, %v520_v7  ;;  %v1229_v21 = vld [vmem:[%s2478_s0 + $0xb3] sm:$0x20]   ;;  %v490_v27 = vsel %vm75_vm5, %v1205_v9, %v486_v22  ;;  %v585_v33 = vsel %vm67_vm3, %v1228_v20, %v581_v28 }
  0x2a   :  { %v528_v16 = vsel %vm79_vm6, %v1214_v58, %v524_v11  ;;  %s1373_s17 = smov 72   ;;  %v1230_v24 = vld [vmem:[%s2478_s0 + $0xd2] sm:$0x40]   ;;  %v1216_v26 = vld [vmem:[%s2478_s0 + $0x8] sm:$0x1]   ;;  %v494_v32 = vsel %vm79_vm6, %v1206_v10, %v490_v27  ;;  %v589_v38 = vsel %vm71_vm4, %v1229_v21, %v585_v33  ;;  %s1380_s19 = smov 16  }
  0x2b   :  { %529 = vrot.lane.b32.xlu1 %v528_v16, %s1373_s17  ;;  %v1231_v25 = vld [vmem:[%s2478_s0 + $0xf1] sm:$0x80]   ;;  %v1217_v29 = vld [vmem:[%s2478_s0 + $0x27] sm:$0x2]   ;;  %495 = vrot.lane.b32.xlu0 %v494_v32, %s1373_s17  ;;  %v593_v43 = vsel %vm75_vm5, %v1230_v24, %v589_v38  ;;  %s2_s7 = smov 3  ;;  %s4_s8 = smov 12 }
  0x2c   :  { %v1218_v30 = vld [vmem:[%s2478_s0 + $0x46] sm:$0x4]   ;;  %v539_v34 = vsel %vm55_vm0, %v1217_v29, %v1216_v26  ;;  %v1241_v41 = vld [vmem:[%s2478_s0 + $0x17] sm:$0x1]   ;;  %v597_v49 = vsel %vm79_vm6, %v1231_v25, %v593_v43  ;;  %v1233_v57 = vld [vmem:[%s2478_s0 + $0x7] sm:$0x1]  }
  0x2d   :  { %v1219_v31 = vld [vmem:[%s2478_s0 + $0x65] sm:$0x8]   ;;  %v543_v39 = vsel %vm59_vm1, %v1218_v30, %v539_v34  ;;  %v1242_v42 = vld [vmem:[%s2478_s0 + $0x36] sm:$0x2]   ;;  %v1234_v58 = vld [vmem:[%s2478_s0 + $0x26] sm:$0x2]  }
  0x2e   :  { %v1220_v35 = vld [vmem:[%s2478_s0 + $0x84] sm:$0x10]   ;;  %v547_v44 = vsel %vm63_vm2, %v1219_v31, %v543_v39  ;;  %v642_v45 = vsel %vm55_vm0, %v1242_v42, %v1241_v41  ;;  %v1243_v46 = vld [vmem:[%s2478_s0 + $0x55] sm:$0x4]   ;;  %v1235_v59 = vld [vmem:[%s2478_s0 + $0x45] sm:$0x4]   ;;  %v608_v62 = vsel %vm55_vm0, %v1234_v58, %v1233_v57 }
  0x2f   :  { %v1221_v36 = vld [vmem:[%s2478_s0 + $0xa3] sm:$0x20]   ;;  %v1244_v47 = vld [vmem:[%s2478_s0 + $0x74] sm:$0x8]   ;;  %v551_v50 = vsel %vm67_vm3, %v1220_v35, %v547_v44  ;;  %v646_v51 = vsel %vm59_vm1, %v1243_v46, %v642_v45  ;;  %598 = vrot.lane.b32.xlu1 %v597_v49, %s1374_s24  ;;  %v1236_v63 = vld [vmem:[%s2478_s0 + $0x64] sm:$0x8]   ;;  %v612_v4 = vsel %vm59_vm1, %v1235_v59, %v608_v62 }
  0x30   :  { %v1222_v37 = vld [vmem:[%s2478_s0 + $0xc2] sm:$0x40]   ;;  %v1245_v48 = vld [vmem:[%s2478_s0 + $0x93] sm:$0x10]   ;;  %v555_v55 = vsel %vm71_vm4, %v1221_v36, %v551_v50  ;;  %v650_v56 = vsel %vm63_vm2, %v1244_v47, %v646_v51  ;;  %v1237_v0 = vld [vmem:[%s2478_s0 + $0x83] sm:$0x10]   ;;  %v616_v8 = vsel %vm63_vm2, %v1236_v63, %v612_v4 }
  0x31   :  { %v1223_v40 = vld [vmem:[%s2478_s0 + $0xe1] sm:$0x80]   ;;  %v1246_v52 = vld [vmem:[%s2478_s0 + $0xb2] sm:$0x20]   ;;  %v559_v60 = vsel %vm75_vm5, %v1222_v37, %v555_v55  ;;  %v654_v61 = vsel %vm67_vm3, %v1245_v48, %v650_v56  ;;  %v1238_v1 = vld [vmem:[%s2478_s0 + $0xa2] sm:$0x20]   ;;  %v620_v13 = vsel %vm67_vm3, %v1237_v0, %v616_v8 }
  0x32   :  { %v1247_v53 = vld [vmem:[%s2478_s0 + $0xd1] sm:$0x40]   ;;  %v563_v2 = vsel %vm79_vm6, %v1223_v40, %v559_v60  ;;  %v658_v3 = vsel %vm71_vm4, %v1246_v52, %v654_v61  ;;  %v1239_v5 = vld [vmem:[%s2478_s0 + $0xc1] sm:$0x40]   ;;  %v1258_v9 = vld [vmem:[%s2478_s0 + $0x16] sm:$0x1]   ;;  %v624_v18 = vsel %vm71_vm4, %v1238_v1, %v620_v13 }
  0x33   :  { %v1248_v54 = vld [vmem:[%s2478_s0 + $0xf0] sm:$0x80]   ;;  %v1240_v6 = vld [vmem:[%s2478_s0 + $0xe0] sm:$0x80]   ;;  %564 = vrot.lane.b32.xlu0 %v563_v2, %s1374_s24  ;;  %v662_v7 = vsel %vm75_vm5, %v1247_v53, %v658_v3  ;;  %v1259_v10 = vld [vmem:[%s2478_s0 + $0x35] sm:$0x2]   ;;  %v628_v23 = vsel %vm75_vm5, %v1239_v5, %v624_v18 }
  0x34   :  { %v1260_v11 = vld [vmem:[%s2478_s0 + $0x54] sm:$0x4]   ;;  %v666_v12 = vsel %vm79_vm6, %v1248_v54, %v662_v7  ;;  %v711_v14 = vsel %vm55_vm0, %v1259_v10, %v1258_v9  ;;  %s1375_s24 = smov 56   ;;  %v1250_v22 = vld [vmem:[%s2478_s0 + $0x6] sm:$0x1]   ;;  %v632_v28 = vsel %vm79_vm6, %v1240_v6, %v628_v23  ;;  %vm6_vm7 = vcmask 1043458  }
  0x35   :  { %v1261_v15 = vld [vmem:[%s2478_s0 + $0x73] sm:$0x8]   ;;  %667 = vrot.lane.b32.xlu1 %v666_v12, %s1375_s24  ;;  %v715_v19 = vsel %vm59_vm1, %v1260_v11, %v711_v14  ;;  %v1251_v25 = vld [vmem:[%s2478_s0 + $0x25] sm:$0x2]   ;;  %v1275_v37 = vld [vmem:[%s2478_s0 + $0x15] sm:$0x1]  }
  0x36   :  { %v1262_v16 = vld [vmem:[%s2478_s0 + $0x92] sm:$0x10]   ;;  %v719_v24 = vsel %vm63_vm2, %v1261_v15, %v715_v19  ;;  %v1252_v26 = vld [vmem:[%s2478_s0 + $0x44] sm:$0x4]   ;;  %v677_v30 = vsel %vm55_vm0, %v1251_v25, %v1250_v22  ;;  %v1276_v38 = vld [vmem:[%s2478_s0 + $0x34] sm:$0x2]  }
  0x37   :  { %v1263_v17 = vld [vmem:[%s2478_s0 + $0xb1] sm:$0x20]   ;;  %v1253_v27 = vld [vmem:[%s2478_s0 + $0x63] sm:$0x8]   ;;  %v723_v29 = vsel %vm67_vm3, %v1262_v16, %v719_v24  ;;  %633 = vrot.lane.b32.xlu0 %v632_v28, %s1375_s24  ;;  %v681_v35 = vsel %vm59_vm1, %v1252_v26, %v677_v30  ;;  %v780_v41 = vsel %vm55_vm0, %v1276_v38, %v1275_v37  ;;  %v1277_v42 = vld [vmem:[%s2478_s0 + $0x53] sm:$0x4]  }
  0x38   :  { %v1264_v20 = vld [vmem:[%s2478_s0 + $0xd0] sm:$0x40]   ;;  %v1254_v31 = vld [vmem:[%s2478_s0 + $0x82] sm:$0x10]   ;;  %v727_v34 = vsel %vm71_vm4, %v1263_v17, %v723_v29  ;;  %v685_v40 = vsel %vm63_vm2, %v1253_v27, %v681_v35  ;;  %v1278_v43 = vld [vmem:[%s2478_s0 + $0x72] sm:$0x8]   ;;  %v784_v47 = vsel %vm59_vm1, %v1277_v42, %v780_v41 }
  0x39   :  { %v1265_v21 = vld [vmem:[%s2478_s0 + $0xef] sm:$0x80]   ;;  %v1255_v32 = vld [vmem:[%s2478_s0 + $0xa1] sm:$0x20]   ;;  %v731_v39 = vsel %vm75_vm5, %v1264_v20, %v727_v34  ;;  %v1279_v44 = vld [vmem:[%s2478_s0 + $0x91] sm:$0x10]   ;;  %v689_v46 = vsel %vm67_vm3, %v1254_v31, %v685_v40  ;;  %v788_v52 = vsel %vm63_vm2, %v1278_v43, %v784_v47 }
  0x3a   :  { %v1256_v33 = vld [vmem:[%s2478_s0 + $0xc0] sm:$0x40]   ;;  %v735_v45 = vsel %vm79_vm6, %v1265_v21, %v731_v39  ;;  %v1280_v48 = vld [vmem:[%s2478_s0 + $0xb0] sm:$0x20]   ;;  %v693_v51 = vsel %vm71_vm4, %v1255_v32, %v689_v46  ;;  %v1267_v53 = vld [vmem:[%s2478_s0 + $0x5] sm:$0x1]   ;;  %v792_v57 = vsel %vm67_vm3, %v1279_v44, %v788_v52 }
  0x3b   :  { %v1257_v36 = vld [vmem:[%s2478_s0 + $0xdf] sm:$0x80]   ;;  %v1281_v49 = vld [vmem:[%s2478_s0 + $0xcf] sm:$0x40]   ;;  %736 = vrot.lane.b32.xlu1 %v735_v45, %s1376_s3  ;;  %v1268_v54 = vld [vmem:[%s2478_s0 + $0x24] sm:$0x2]   ;;  %v697_v56 = vsel %vm75_vm5, %v1256_v33, %v693_v51  ;;  %v796_v63 = vsel %vm71_vm4, %v1280_v48, %v792_v57 }
  0x3c   :  { %v1282_v50 = vld [vmem:[%s2478_s0 + $0xee] sm:$0x80]   ;;  %v1269_v55 = vld [vmem:[%s2478_s0 + $0x43] sm:$0x4]   ;;  %v746_v58 = vsel %vm55_vm0, %v1268_v54, %v1267_v53  ;;  %v701_v62 = vsel %vm79_vm6, %v1257_v36, %v697_v56  ;;  %v800_v3 = vsel %vm75_vm5, %v1281_v49, %v796_v63  ;;  %v1292_v5 = vld [vmem:[%s2478_s0 + $0x14] sm:$0x1]  }
  0x3d   :  { %v1270_v59 = vld [vmem:[%s2478_s0 + $0x62] sm:$0x8]   ;;  %v750_v0 = vsel %vm59_vm1, %v1269_v55, %v746_v58  ;;  %702 = vrot.lane.b32.xlu0 %v701_v62, %s1376_s3  ;;  %v1293_v6 = vld [vmem:[%s2478_s0 + $0x33] sm:$0x2]   ;;  %v804_v8 = vsel %vm79_vm6, %v1282_v50, %v800_v3  ;;  %s1377_s3 = smov 40   ;;  %s8_s9 = smov 48 }
  0x3e   :  { %v1271_v60 = vld [vmem:[%s2478_s0 + $0x81] sm:$0x10]   ;;  %v754_v4 = vsel %vm63_vm2, %v1270_v59, %v750_v0  ;;  %v1294_v7 = vld [vmem:[%s2478_s0 + $0x52] sm:$0x4]   ;;  %v849_v10 = vsel %vm55_vm0, %v1293_v6, %v1292_v5  ;;  %v1284_v18 = vld [vmem:[%s2478_s0 + $0x4] sm:$0x1]  }
  0x3f   :  { %v1272_v61 = vld [vmem:[%s2478_s0 + $0xa0] sm:$0x20]   ;;  %v758_v9 = vsel %vm67_vm3, %v1271_v60, %v754_v4  ;;  %v1295_v11 = vld [vmem:[%s2478_s0 + $0x71] sm:$0x8]   ;;  %805 = vrot.lane.b32.xlu1 %v804_v8, %s1377_s3  ;;  %v853_v15 = vsel %vm59_vm1, %v1294_v7, %v849_v10  ;;  %v1285_v21 = vld [vmem:[%s2478_s0 + $0x23] sm:$0x2]  }
  0x40   :  { %v1273_v1 = vld [vmem:[%s2478_s0 + $0xbf] sm:$0x40]   ;;  %v1296_v12 = vld [vmem:[%s2478_s0 + $0x90] sm:$0x10]   ;;  %v762_v14 = vsel %vm71_vm4, %v1272_v61, %v758_v9  ;;  %v857_v20 = vsel %vm63_vm2, %v1295_v11, %v853_v15  ;;  %v1286_v22 = vld [vmem:[%s2478_s0 + $0x42] sm:$0x4]   ;;  %v815_v26 = vsel %vm55_vm0, %v1285_v21, %v1284_v18 }
  0x41   :  { %v1274_v2 = vld [vmem:[%s2478_s0 + $0xde] sm:$0x80]   ;;  %v1297_v13 = vld [vmem:[%s2478_s0 + $0xaf] sm:$0x20]   ;;  %v766_v19 = vsel %vm75_vm5, %v1273_v1, %v762_v14  ;;  %v1287_v23 = vld [vmem:[%s2478_s0 + $0x61] sm:$0x8]   ;;  %v861_v25 = vsel %vm67_vm3, %v1296_v12, %v857_v20  ;;  %v819_v31 = vsel %vm59_vm1, %v1286_v22, %v815_v26 }
  0x42   :  { %v1298_v16 = vld [vmem:[%s2478_s0 + $0xce] sm:$0x40]   ;;  %v770_v24 = vsel %vm79_vm6, %v1274_v2, %v766_v19  ;;  %v1288_v27 = vld [vmem:[%s2478_s0 + $0x80] sm:$0x10]   ;;  %v865_v30 = vsel %vm71_vm4, %v1297_v13, %v861_v25  ;;  %v1309_v33 = vld [vmem:[%s2478_s0 + $0x13] sm:$0x1]   ;;  %v823_v36 = vsel %vm63_vm2, %v1287_v23, %v819_v31 }
  0x43   :  { %v1299_v17 = vld [vmem:[%s2478_s0 + $0xed] sm:$0x80]   ;;  %v1289_v28 = vld [vmem:[%s2478_s0 + $0x9f] sm:$0x20]   ;;  %771 = vrot.lane.b32.xlu0 %v770_v24, %s1377_s3  ;;  %v1310_v34 = vld [vmem:[%s2478_s0 + $0x32] sm:$0x2]   ;;  %v869_v35 = vsel %vm75_vm5, %v1298_v16, %v865_v30  ;;  %v827_v42 = vsel %vm67_vm3, %v1288_v27, %v823_v36 }
  0x44   :  { %v1290_v29 = vld [vmem:[%s2478_s0 + $0xbe] sm:$0x40]   ;;  %v918_v37 = vsel %vm55_vm0, %v1310_v34, %v1309_v33  ;;  %v1311_v38 = vld [vmem:[%s2478_s0 + $0x51] sm:$0x4]   ;;  %v873_v41 = vsel %vm79_vm6, %v1299_v17, %v869_v35  ;;  %v831_v47 = vsel %vm71_vm4, %v1289_v28, %v827_v42  ;;  %v1301_v49 = vld [vmem:[%s2478_s0 + $0x3] sm:$0x1]  }
  0x45   :  { %v1291_v32 = vld [vmem:[%s2478_s0 + $0xdd] sm:$0x80]   ;;  %v1312_v39 = vld [vmem:[%s2478_s0 + $0x70] sm:$0x8]   ;;  %v922_v43 = vsel %vm59_vm1, %v1311_v38, %v918_v37  ;;  %874 = vrot.lane.b32.xlu1 %v873_v41, %s1378_s12  ;;  %v1302_v50 = vld [vmem:[%s2478_s0 + $0x22] sm:$0x2]   ;;  %v835_v52 = vsel %vm75_vm5, %v1290_v29, %v831_v47 }
  0x46   :  { %v1313_v40 = vld [vmem:[%s2478_s0 + $0x8f] sm:$0x10]   ;;  %v926_v48 = vsel %vm63_vm2, %v1312_v39, %v922_v43  ;;  %v1303_v51 = vld [vmem:[%s2478_s0 + $0x41] sm:$0x4]   ;;  %v884_v54 = vsel %vm55_vm0, %v1302_v50, %v1301_v49  ;;  %v839_v58 = vsel %vm79_vm6, %v1291_v32, %v835_v52  ;;  %v1326_v1 = vld [vmem:[%s2478_s0 + $0x12] sm:$0x1]  }
  0x47   :  { %v1314_v44 = vld [vmem:[%s2478_s0 + $0xae] sm:$0x20]   ;;  %v930_v53 = vsel %vm67_vm3, %v1313_v40, %v926_v48  ;;  %v1304_v55 = vld [vmem:[%s2478_s0 + $0x60] sm:$0x8]   ;;  %v888_v60 = vsel %vm59_vm1, %v1303_v51, %v884_v54  ;;  %840 = vrot.lane.b32.xlu0 %v839_v58, %s1378_s12  ;;  %v1327_v2 = vld [vmem:[%s2478_s0 + $0x31] sm:$0x2]  }
  0x48   :  { %v1315_v45 = vld [vmem:[%s2478_s0 + $0xcd] sm:$0x40]   ;;  %v1305_v56 = vld [vmem:[%s2478_s0 + $0x7f] sm:$0x10]   ;;  %v934_v59 = vsel %vm71_vm4, %v1314_v44, %v930_v53  ;;  %v892_v0 = vsel %vm63_vm2, %v1304_v55, %v888_v60  ;;  %v1328_v3 = vld [vmem:[%s2478_s0 + $0x50] sm:$0x4]   ;;  %v987_v6 = vsel %vm55_vm0, %v1327_v2, %v1326_v1 }
  0x49   :  { %v1316_v46 = vld [vmem:[%s2478_s0 + $0xec] sm:$0x80]   ;;  %v1306_v57 = vld [vmem:[%s2478_s0 + $0x9e] sm:$0x20]   ;;  %v938_v63 = vsel %vm75_vm5, %v1315_v45, %v934_v59  ;;  %v896_v5 = vsel %vm67_vm3, %v1305_v56, %v892_v0  ;;  %v1329_v7 = vld [vmem:[%s2478_s0 + $0x6f] sm:$0x8]   ;;  %v991_v11 = vsel %vm59_vm1, %v1328_v3, %v987_v6 }
  0x4a   :  { %v1307_v61 = vld [vmem:[%s2478_s0 + $0xbd] sm:$0x40]   ;;  %v942_v4 = vsel %vm79_vm6, %v1316_v46, %v938_v63  ;;  %v1330_v8 = vld [vmem:[%s2478_s0 + $0x8e] sm:$0x10]   ;;  %s1379_s12 = smov 24   ;;  %v900_v10 = vsel %vm71_vm4, %v1306_v57, %v896_v5  ;;  %v995_v16 = vsel %vm63_vm2, %v1329_v7, %v991_v11  ;;  %vm10_vm8 = vcmask 1045508  }
  0x4b   :  { %v1308_v62 = vld [vmem:[%s2478_s0 + $0xdc] sm:$0x80]   ;;  %v1331_v9 = vld [vmem:[%s2478_s0 + $0xad] sm:$0x20]   ;;  %943 = vrot.lane.b32.xlu1 %v942_v4, %s1379_s12  ;;  %v1318_v14 = vld [vmem:[%s2478_s0 + $0x2] sm:$0x1]   ;;  %v904_v15 = vsel %vm75_vm5, %v1307_v61, %v900_v10  ;;  %v999_v21 = vsel %vm67_vm3, %v1330_v8, %v995_v16 }
  0x4c   :  { %v1332_v12 = vld [vmem:[%s2478_s0 + $0xcc] sm:$0x40]   ;;  %v1319_v17 = vld [vmem:[%s2478_s0 + $0x21] sm:$0x2]   ;;  %v908_v20 = vsel %vm79_vm6, %v1308_v62, %v904_v15  ;;  %v1003_v26 = vsel %vm71_vm4, %v1331_v9, %v999_v21  ;;  %v1343_v29 = vld [vmem:[%s2478_s0 + $0x11] sm:$0x1]  }
  0x4d   :  { %v1333_v13 = vld [vmem:[%s2478_s0 + $0xeb] sm:$0x80]   ;;  %v1320_v18 = vld [vmem:[%s2478_s0 + $0x40] sm:$0x4]   ;;  %v953_v22 = vsel %vm55_vm0, %v1319_v17, %v1318_v14  ;;  %909 = vrot.lane.b32.xlu0 %v908_v20, %s1379_s12  ;;  %v1344_v30 = vld [vmem:[%s2478_s0 + $0x30] sm:$0x2]   ;;  %v1007_v31 = vsel %vm75_vm5, %v1332_v12, %v1003_v26 }
  0x4e   :  { %v1321_v19 = vld [vmem:[%s2478_s0 + $0x5f] sm:$0x8]   ;;  %v957_v27 = vsel %vm59_vm1, %v1320_v18, %v953_v22  ;;  %v1056_v33 = vsel %vm55_vm0, %v1344_v30, %v1343_v29  ;;  %v1345_v34 = vld [vmem:[%s2478_s0 + $0x4f] sm:$0x4]   ;;  %v1011_v37 = vsel %vm79_vm6, %v1333_v13, %v1007_v31  ;;  %v1335_v45 = vld [vmem:[%s2478_s0 + $0x1] sm:$0x1]  }
  0x4f   :  { %v1322_v23 = vld [vmem:[%s2478_s0 + $0x7e] sm:$0x10]   ;;  %v961_v32 = vsel %vm63_vm2, %v1321_v19, %v957_v27  ;;  %v1346_v35 = vld [vmem:[%s2478_s0 + $0x6e] sm:$0x8]   ;;  %v1060_v39 = vsel %vm59_vm1, %v1345_v34, %v1056_v33  ;;  %1012 = vrot.lane.b32.xlu1 %v1011_v37, %s1380_s19  ;;  %v1336_v46 = vld [vmem:[%s2478_s0 + $0x20] sm:$0x2]  }
  0x50   :  { %v1323_v24 = vld [vmem:[%s2478_s0 + $0x9d] sm:$0x20]   ;;  %v1347_v36 = vld [vmem:[%s2478_s0 + $0x8d] sm:$0x10]   ;;  %v965_v38 = vsel %vm67_vm3, %v1322_v23, %v961_v32  ;;  %v1064_v44 = vsel %vm63_vm2, %v1346_v35, %v1060_v39  ;;  %v1337_v47 = vld [vmem:[%s2478_s0 + $0x3f] sm:$0x4]   ;;  %v1022_v50 = vsel %vm55_vm0, %v1336_v46, %v1335_v45 }
  0x51   :  { %v1324_v25 = vld [vmem:[%s2478_s0 + $0xbc] sm:$0x40]   ;;  %v1348_v40 = vld [vmem:[%s2478_s0 + $0xac] sm:$0x20]   ;;  %v969_v43 = vsel %vm71_vm4, %v1323_v24, %v965_v38  ;;  %v1068_v49 = vsel %vm67_vm3, %v1347_v36, %v1064_v44  ;;  %v1338_v51 = vld [vmem:[%s2478_s0 + $0x5e] sm:$0x8]   ;;  %v1026_v56 = vsel %vm59_vm1, %v1337_v47, %v1022_v50 }
  0x52   :  { %v1325_v28 = vld [vmem:[%s2478_s0 + $0xdb] sm:$0x80]   ;;  %v1349_v41 = vld [vmem:[%s2478_s0 + $0xcb] sm:$0x40]   ;;  %v973_v48 = vsel %vm75_vm5, %v1324_v25, %v969_v43  ;;  %v1339_v52 = vld [vmem:[%s2478_s0 + $0x7d] sm:$0x10]   ;;  %v1072_v55 = vsel %vm71_vm4, %v1348_v40, %v1068_v49  ;;  %v1030_v60 = vsel %vm63_vm2, %v1338_v51, %v1026_v56 }
  0x53   :  { %v1350_v42 = vld [vmem:[%s2478_s0 + $0xea] sm:$0x80]   ;;  %v1340_v53 = vld [vmem:[%s2478_s0 + $0x9c] sm:$0x20]   ;;  %v977_v54 = vsel %vm79_vm6, %v1325_v28, %v973_v48  ;;  %v1076_v59 = vsel %vm75_vm5, %v1349_v41, %v1072_v55  ;;  %s12_s10 = smov 192  ;;  %v1034_v63 = vsel %vm67_vm3, %v1339_v52, %v1030_v60  ;;  %vm14_vm9 = vcmask 1047558  }
  0x54   :  { %v1341_v57 = vld [vmem:[%s2478_s0 + $0xbb] sm:$0x40]   ;;  %978 = vrot.lane.b32.xlu0 %v977_v54, %s1380_s19  ;;  %v3_v61 = vld [vmem:[%s2478_s0] ss:$16 sm:%s2_s7]   ;;  %v1080_v62 = vsel %vm79_vm6, %v1350_v42, %v1076_v59  ;;  %s25_s14 = smov 3  ;;  %s28_s15 = smov 12  ;;  %v1038_v1 = vsel %vm71_vm4, %v1340_v53, %v1034_v63 }
  0x55   :  { %v1342_v58 = vld [vmem:[%s2478_s0 + $0xda] sm:$0x80]   ;;  %v5_v0 = vld [vmem:[%s2478_s0] ss:$16 sm:%s4_s8]   ;;  %s1381_s11 = smov 8   ;;  %vm16_vm10 = vcmask 64512   ;;  %v1042_v4 = vsel %vm75_vm5, %v1341_v57, %v1038_v1 }
  0x56   :  { %1081 = vrot.lane.b32.xlu1 %v1080_v62, %s1381_s11  ;;  %s33_s18 = smov 48  ;;  %s38_s19 = smov 192  ;;  %v7_v2 = vsel %vm6_vm7, %v5_v0, %v3_v61  ;;  %v9_v3 = vld [vmem:[%s2478_s0] ss:$16 sm:%s8_s9]   ;;  %v1046_v8 = vsel %vm79_vm6, %v1342_v58, %v1042_v4  ;;  %vm83_vm11 = vcmask 1048512   ;;  %vm152_vm12 = vcmask 982912  }
  0x57   :  { %v11_v5 = vsel %vm10_vm8, %v9_v3, %v7_v2  ;;  %v13_v6 = vld [vmem:[%s2478_s0] ss:$16 sm:%s12_s10]   ;;  %vm221_vm13 = vcmask 917312   ;;  %vm290_vm14 = vcmask 851712   ;;  %vm359_vm15 = vcmask 786112  }
  0x58   :  { %v1089_v7 = vld [vmem:[%s2478_s0 + $0x80] ss:$16 sm:%s25_s14]   ;;  %v15_v9 = vsel %vm14_vm9, %v13_v6, %v11_v5  ;;  %1047 = vrot.lane.b32.xlu0 %v1046_v8, %s1381_s11  ;;  %vm428_vm0 = vcmask 720512   ;;  %vm497_vm1 = vcmask 654912   ;;  %vm566_vm2 = vcmask 589312  }
  0x59   :  { %v1090_v10 = vld [vmem:[%s2478_s0 + $0x80] ss:$16 sm:%s28_s15]   ;;  %17 = vst.msk [vmem:[%s2479_s1] ss:$8 sm:$0x3] %vm16_vm10, %v15_v9   ;;  %vm635_vm3 = vcmask 523712  }
  0x5a   :  { %v1091_v11 = vld [vmem:[%s2478_s0 + $0x80] ss:$16 sm:%s33_s18]   ;;  %1086 = vst.msk [vmem:[%s2479_s1 - $0xf] ss:$8 sm:$0xc] %vm16_vm10, %v15_v9   ;;  %v31_v12 = vsel %vm6_vm7, %v1090_v10, %v1089_v7  ;;  %vm704_vm4 = vcmask 458112  }
  0x5b   :  { %1087 = vst.msk [vmem:[%s2479_s1 - $0x1e] ss:$8 sm:$0x30] %vm16_vm10, %v15_v9   ;;  %1088 = vst.msk [vmem:[%s2479_s1 - $0x2d] ss:$8 sm:$0xc0] %vm16_vm10, %v15_v9   ;;  %v36_v14 = vsel %vm10_vm8, %v1091_v11, %v31_v12 }
  0x5c   :  { %v1092_v13 = vld [vmem:[%s2478_s0 + $0x80] ss:$16 sm:%s38_s19]   ;;  %vm773_vm5 = vcmask 392512   ;;  %vm842_vm6 = vcmask 326912   ;;  %vm911_vm7 = vcmask 261312   ;;  %vm980_vm8 = vcmask 195712  }
  0x5d   :  { %v41_v15 = vsel %vm14_vm9, %v1092_v13, %v36_v14  ;;  %vm1049_vm9 = vcmask 130112  }
  0x5e   :  { %1093 = vst.msk [vmem:[%s2479_s1 + $0x4] ss:$8 sm:$0x3] %vm16_vm10, %v41_v15   ;;  %1094 = vst.msk [vmem:[%s2479_s1 - $0xb] ss:$8 sm:$0xc] %vm16_vm10, %v41_v15  }
  0x5f   :  { %1095 = vst.msk [vmem:[%s2479_s1 - $0x1a] ss:$8 sm:$0x30] %vm16_vm10, %v41_v15   ;;  %1096 = vst.msk [vmem:[%s2479_s1 - $0x29] ss:$8 sm:$0xc0] %vm16_vm10, %v41_v15  }
  0x7c   :  { %v151_v16 = vpop.permute.xlu1 %150  }
  0x7d   :  { %v82_v17 = vpop.permute.xlu0 %81  }
  0x7e   :  { %84 = vst.msk [vmem:[%s2479_s1] sm:$0xff] %vm83_vm11, %v82_v17  }
  0x7f   :  { %153 = vst.msk [vmem:[%s2479_s1] sm:$0xff] %vm152_vm12, %v151_v16  }
  0x80   :  { %v185_v18 = vpop.permute.xlu1 %184  }
  0x84   :  { %v116_v19 = vpop.permute.xlu0 %115  }
  0x85   :  { %1113 = vst.msk [vmem:[%s2479_s1 + $0x8] sm:$0xff] %vm83_vm11, %v116_v19   ;;  %v254_v20 = vpop.permute.xlu1 %253  }
  0x86   :  { %1130 = vst.msk [vmem:[%s2479_s1 + $0x8] sm:$0xff] %vm152_vm12, %v185_v18  }
  0x87   :  { %1147 = vst.msk [vmem:[%s2479_s1 + $0x8] sm:$0xff] %vm221_vm13, %v254_v20  }
  0x88   :  { %v220_v21 = vpop.permute.xlu0 %219  }
  0x89   :  { %222 = vst.msk [vmem:[%s2479_s1] sm:$0xff] %vm221_vm13, %v220_v21  }
  0x8c   :  { %v323_v22 = vpop.permute.xlu1 %322  }
  0x8d   :  { %1164 = vst.msk [vmem:[%s2479_s1 + $0x8] sm:$0xff] %vm290_vm14, %v323_v22   ;;  %v289_v23 = vpop.permute.xlu0 %288  }
  0x8e   :  { %291 = vst.msk [vmem:[%s2479_s1] sm:$0xff] %vm290_vm14, %v289_v23  }
  0x90   :  { %v392_v24 = vpop.permute.xlu1 %391  }
  0x91   :  { %1181 = vst.msk [vmem:[%s2479_s1 + $0x8] sm:$0xff] %vm359_vm15, %v392_v24  }
  0x95   :  { %v358_v25 = vpop.permute.xlu0 %357   ;;  %v461_v26 = vpop.permute.xlu1 %460  }
  0x96   :  { %360 = vst.msk [vmem:[%s2479_s1] sm:$0xff] %vm359_vm15, %v358_v25  }
  0x97   :  { %1198 = vst.msk [vmem:[%s2479_s1 + $0x8] sm:$0xff] %vm428_vm0, %v461_v26  }
  0x99   :  { %v427_v27 = vpop.permute.xlu0 %426  }
  0x9a   :  { %429 = vst.msk [vmem:[%s2479_s1] sm:$0xff] %vm428_vm0, %v427_v27  }
  0x9d   :  { %v530_v28 = vpop.permute.xlu1 %529   ;;  %v496_v29 = vpop.permute.xlu0 %495  }
  0x9e   :  { %1215 = vst.msk [vmem:[%s2479_s1 + $0x8] sm:$0xff] %vm497_vm1, %v530_v28   ;;  %498 = vst.msk [vmem:[%s2479_s1] sm:$0xff] %vm497_vm1, %v496_v29  }
  0xa1   :  { %v599_v30 = vpop.permute.xlu1 %598  }
  0xa2   :  { %1232 = vst.msk [vmem:[%s2479_s1 + $0x8] sm:$0xff] %vm566_vm2, %v599_v30  }
  0xa5   :  { %v565_v31 = vpop.permute.xlu0 %564  }
  0xa6   :  { %567 = vst.msk [vmem:[%s2479_s1] sm:$0xff] %vm566_vm2, %v565_v31  }
  0xa7   :  { %v668_v32 = vpop.permute.xlu1 %667  }
  0xa8   :  { %1249 = vst.msk [vmem:[%s2479_s1 + $0x8] sm:$0xff] %vm635_vm3, %v668_v32  }
  0xa9   :  { %v634_v33 = vpop.permute.xlu0 %633  }
  0xaa   :  { %636 = vst.msk [vmem:[%s2479_s1] sm:$0xff] %vm635_vm3, %v634_v33  }
  0xad   :  { %v737_v34 = vpop.permute.xlu1 %736  }
  0xae   :  { %1266 = vst.msk [vmem:[%s2479_s1 + $0x8] sm:$0xff] %vm704_vm4, %v737_v34  }
  0xaf   :  { %v703_v35 = vpop.permute.xlu0 %702  }
  0xb0   :  { %705 = vst.msk [vmem:[%s2479_s1] sm:$0xff] %vm704_vm4, %v703_v35  }
  0xb1   :  { %v806_v36 = vpop.permute.xlu1 %805  }
  0xb2   :  { %1283 = vst.msk [vmem:[%s2479_s1 + $0x8] sm:$0xff] %vm773_vm5, %v806_v36  }
  0xb5   :  { %v772_v37 = vpop.permute.xlu0 %771  }
  0xb6   :  { %774 = vst.msk [vmem:[%s2479_s1] sm:$0xff] %vm773_vm5, %v772_v37  }
  0xb7   :  { %v875_v38 = vpop.permute.xlu1 %874  }
  0xb8   :  { %1300 = vst.msk [vmem:[%s2479_s1 + $0x8] sm:$0xff] %vm842_vm6, %v875_v38  }
  0xb9   :  { %v841_v39 = vpop.permute.xlu0 %840  }
  0xba   :  { %843 = vst.msk [vmem:[%s2479_s1] sm:$0xff] %vm842_vm6, %v841_v39  }
  0xbd   :  { %v944_v40 = vpop.permute.xlu1 %943  }
  0xbe   :  { %1317 = vst.msk [vmem:[%s2479_s1 + $0x8] sm:$0xff] %vm911_vm7, %v944_v40  }
  0xbf   :  { %v910_v41 = vpop.permute.xlu0 %909  }
  0xc0   :  { %912 = vst.msk [vmem:[%s2479_s1] sm:$0xff] %vm911_vm7, %v910_v41  }
  0xc1   :  { %v1013_v42 = vpop.permute.xlu1 %1012  }
  0xc2   :  { %1334 = vst.msk [vmem:[%s2479_s1 + $0x8] sm:$0xff] %vm980_vm8, %v1013_v42  }
  0xc6   :  { %v979_v43 = vpop.permute.xlu0 %978  }
  0xc7   :  { %981 = vst.msk [vmem:[%s2479_s1] sm:$0xff] %vm980_vm8, %v979_v43  }
  0xc8   :  { %v1082_v44 = vpop.permute.xlu1 %1081  }
  0xc9   :  { %1351 = vst.msk [vmem:[%s2479_s1 + $0x8] sm:$0xff] %vm1049_vm9, %v1082_v44  }
  0xca   :  { %v1048_v45 = vpop.permute.xlu0 %1047  }
  0xcb   :  { %1050 = vst.msk [vmem:[%s2479_s1] sm:$0xff] %vm1049_vm9, %v1048_v45  }

// kernel: tile.24
= control target key start
LH: loop header
LB: loop body
LE: loop exit
PB: predicated region body
PF: predicated region fallthrough
CT: control target
= control target key end

     0   :  { %vm65_vm0 = vcmask 1043458   ;;  %s105_s6 = smov 3  ;;  %vm70_vm1 = vcmask 1045508   ;;  %vm75_vm2 = vcmask 1047558   ;;  %s108_s9 = smov 12  ;;  %vm4_vm3 = vcmask 1047556   ;;  %s1498_s0 = inlined_call_operand.vmem [shape: f32[16,16,16], index: 0, kind: input, shape index: {}]   ;;  %s1499_s1 = inlined_call_operand.vmem [shape: f32[256,16], index: 1, kind: output, shape index: {}]  }
   0x1   :  { %v726_v0 = vld [vmem:[%s1498_s0 + $0x87] ss:$16 sm:%s105_s6]   ;;  %s113_s10 = smov 48  ;;  %s118_s15 = smov 192  ;;  %vm6_vm4 = vcmask 130048   ;;  %vm79_vm5 = vcmask 1048448  }
   0x2   :  { %v727_v1 = vld [vmem:[%s1498_s0 + $0x87] ss:$16 sm:%s108_s9]   ;;  %s60_s16 = smov 3  ;;  %s63_s21 = smov 12  ;;  %vm170_vm6 = vcmask 917248   ;;  %vm261_vm7 = vcmask 786048  }
   0x3   :  { %v728_v2 = vld [vmem:[%s1498_s0 + $0x87] ss:$16 sm:%s113_s10]   ;;  %v111_v3 = vsel %vm65_vm0, %v727_v1, %v726_v0  ;;  %s68_s22 = smov 48  ;;  %s73_s27 = smov 192  ;;  %vm352_vm8 = vcmask 654848   ;;  %vm443_vm9 = vcmask 523648  }
   0x4   :  { %v729_v4 = vld [vmem:[%s1498_s0 + $0x87] ss:$16 sm:%s118_s15]   ;;  %v116_v6 = vsel %vm70_vm1, %v728_v2, %v111_v3  ;;  %s128_s28 = smov 3  ;;  %s131_s4 = smov 12  ;;  %vm534_vm10 = vcmask 392448   ;;  %vm625_vm11 = vcmask 261248  }
   0x5   :  { %v717_v5 = vld [vmem:[%s1498_s0 + $0x7] ss:$16 sm:%s60_s16]   ;;  %v121_v9 = vsel %vm75_vm2, %v729_v4, %v116_v6  ;;  %v731_v12 = vld [vmem:[%s1498_s0 + $0x8f] ss:$16 sm:%s128_s28]   ;;  %s136_s5 = smov 48  ;;  %s857_s6 = smov 112  }
   0x6   :  { %v718_v7 = vld [vmem:[%s1498_s0 + $0x7] ss:$16 sm:%s63_s21]   ;;  %122 = vrot.lane.b32.xlu1 %v121_v9, %s857_s6  ;;  %s141_s9 = smov 192  ;;  %s82_s10 = smov 3 }
   0x7   :  { %v719_v8 = vld [vmem:[%s1498_s0 + $0x7] ss:$16 sm:%s68_s22]   ;;  %v66_v10 = vsel %vm65_vm0, %v718_v7, %v717_v5  ;;  %v732_v14 = vld [vmem:[%s1498_s0 + $0x8f] ss:$16 sm:%s131_s4]   ;;  %s85_s15 = smov 12  ;;  %s90_s16 = smov 48 }
   0x8   :  { %v720_v11 = vld [vmem:[%s1498_s0 + $0x7] ss:$16 sm:%s73_s27]   ;;  %v71_v13 = vsel %vm70_vm1, %v719_v8, %v66_v10  ;;  %v134_v16 = vsel %vm65_vm0, %v732_v14, %v731_v12  ;;  %v733_v17 = vld [vmem:[%s1498_s0 + $0x8f] ss:$16 sm:%s136_s5]   ;;  %s95_s19 = smov 192  ;;  %s173_s24 = smov 3 }
   0x9   :  { %v76_v15 = vsel %vm75_vm2, %v720_v11, %v71_v13  ;;  %v734_v18 = vld [vmem:[%s1498_s0 + $0x8f] ss:$16 sm:%s141_s9]   ;;  %v139_v19 = vsel %vm70_vm1, %v733_v17, %v134_v16  ;;  %s176_s25 = smov 12  ;;  %s181_s28 = smov 48  ;;  %v740_v27 = vld [vmem:[%s1498_s0 + $0xe] ss:$16 sm:%s173_s24]  }
   0xa   :  { %77 = vrot.lane.b32.xlu0 %v76_v15, %s857_s6  ;;  %v721_v20 = vld [vmem:[%s1498_s0 + $0xf] ss:$16 sm:%s82_s10]   ;;  %v144_v21 = vsel %vm75_vm2, %v734_v18, %v139_v19  ;;  %s186_s29 = smov 192  ;;  %s151_s5 = smov 3 }
   0xb   :  { %v722_v22 = vld [vmem:[%s1498_s0 + $0xf] ss:$16 sm:%s85_s15]   ;;  %145 = vrot.lane.b32.xlu1 %v144_v21, %s857_s6  ;;  %s154_s7 = smov 12  ;;  %s159_s12 = smov 48 }
   0xc   :  { %v723_v23 = vld [vmem:[%s1498_s0 + $0xf] ss:$16 sm:%s90_s16]   ;;  %v88_v24 = vsel %vm65_vm0, %v722_v22, %v721_v20  ;;  %v741_v28 = vld [vmem:[%s1498_s0 + $0xe] ss:$16 sm:%s176_s25]   ;;  %s164_s13 = smov 192  ;;  %s219_s15 = smov 3 }
   0xd   :  { %v724_v25 = vld [vmem:[%s1498_s0 + $0xf] ss:$16 sm:%s95_s19]   ;;  %v93_v26 = vsel %vm70_vm1, %v723_v23, %v88_v24  ;;  %v179_v30 = vsel %vm65_vm0, %v741_v28, %v740_v27  ;;  %v742_v31 = vld [vmem:[%s1498_s0 + $0xe] ss:$16 sm:%s181_s28]   ;;  %s222_s16 = smov 12  ;;  %s227_s21 = smov 48 }
   0xe   :  { %v98_v29 = vsel %vm75_vm2, %v724_v25, %v93_v26  ;;  %v743_v32 = vld [vmem:[%s1498_s0 + $0xe] ss:$16 sm:%s186_s29]   ;;  %v184_v33 = vsel %vm70_vm1, %v742_v31, %v179_v30  ;;  %v736_v34 = vld [vmem:[%s1498_s0 + $0x6] ss:$16 sm:%s151_s5]   ;;  %s232_s22 = smov 192  ;;  %s858_s23 = smov 96  }
   0xf   :  { %99 = vrot.lane.b32.xlu0 %v98_v29, %s857_s6  ;;  %v189_v35 = vsel %vm75_vm2, %v743_v32, %v184_v33  ;;  %v737_v36 = vld [vmem:[%s1498_s0 + $0x6] ss:$16 sm:%s154_s7]   ;;  %s196_s26 = smov 3  ;;  %s199_s2 = smov 12 }
  0x10   :  { %v738_v37 = vld [vmem:[%s1498_s0 + $0x6] ss:$16 sm:%s159_s12]   ;;  %190 = vrot.lane.b32.xlu1 %v189_v35, %s858_s23  ;;  %v157_v38 = vsel %vm65_vm0, %v737_v36, %v736_v34  ;;  %s204_s3 = smov 48  ;;  %s209_s9 = smov 192 }
  0x11   :  { %v739_v39 = vld [vmem:[%s1498_s0 + $0x6] ss:$16 sm:%s164_s13]   ;;  %v162_v40 = vsel %vm70_vm1, %v738_v37, %v157_v38  ;;  %v750_v41 = vld [vmem:[%s1498_s0 + $0x8e] ss:$16 sm:%s219_s15]   ;;  %s264_s12 = smov 3  ;;  %s267_s13 = smov 12 }
  0x12   :  { %v751_v42 = vld [vmem:[%s1498_s0 + $0x8e] ss:$16 sm:%s222_s16]   ;;  %v167_v43 = vsel %vm75_vm2, %v739_v39, %v162_v40  ;;  %v745_v48 = vld [vmem:[%s1498_s0 + $0x86] ss:$16 sm:%s196_s26]   ;;  %s272_s17 = smov 48  ;;  %s277_s18 = smov 192 }
  0x13   :  { %v225_v44 = vsel %vm65_vm0, %v751_v42, %v750_v41  ;;  %v752_v45 = vld [vmem:[%s1498_s0 + $0x8e] ss:$16 sm:%s227_s21]   ;;  %168 = vrot.lane.b32.xlu0 %v167_v43, %s858_s23  ;;  %s242_s21 = smov 3  ;;  %s245_s27 = smov 12 }
  0x14   :  { %v753_v46 = vld [vmem:[%s1498_s0 + $0x8e] ss:$16 sm:%s232_s22]   ;;  %v230_v47 = vsel %vm70_vm1, %v752_v45, %v225_v44  ;;  %v746_v50 = vld [vmem:[%s1498_s0 + $0x86] ss:$16 sm:%s199_s2]   ;;  %s250_s28 = smov 48  ;;  %s255_s4 = smov 192 }
  0x15   :  { %v235_v49 = vsel %vm75_vm2, %v753_v46, %v230_v47  ;;  %v747_v51 = vld [vmem:[%s1498_s0 + $0x86] ss:$16 sm:%s204_s3]   ;;  %v202_v52 = vsel %vm65_vm0, %v746_v50, %v745_v48  ;;  %v759_v55 = vld [vmem:[%s1498_s0 + $0xd] ss:$16 sm:%s264_s12]   ;;  %s310_s7 = smov 3  ;;  %s313_s8 = smov 12 }
  0x16   :  { %236 = vrot.lane.b32.xlu1 %v235_v49, %s858_s23  ;;  %v748_v53 = vld [vmem:[%s1498_s0 + $0x86] ss:$16 sm:%s209_s9]   ;;  %v207_v54 = vsel %vm70_vm1, %v747_v51, %v202_v52  ;;  %s323_s6 = smov 192  ;;  %s859_s14 = smov 80  }
  0x17   :  { %v760_v56 = vld [vmem:[%s1498_s0 + $0xd] ss:$16 sm:%s267_s13]   ;;  %v212_v57 = vsel %vm75_vm2, %v748_v53, %v207_v54  ;;  %v755_v62 = vld [vmem:[%s1498_s0 + $0x5] ss:$16 sm:%s242_s21]   ;;  %s318_s13 = smov 48  ;;  %s290_s22 = smov 12 }
  0x18   :  { %v270_v58 = vsel %vm65_vm0, %v760_v56, %v759_v55  ;;  %v761_v59 = vld [vmem:[%s1498_s0 + $0xd] ss:$16 sm:%s272_s17]   ;;  %213 = vrot.lane.b32.xlu0 %v212_v57, %s858_s23  ;;  %s287_s17 = smov 3  ;;  %s295_s24 = smov 48 }
  0x19   :  { %v762_v60 = vld [vmem:[%s1498_s0 + $0xd] ss:$16 sm:%s277_s18]   ;;  %v275_v61 = vsel %vm70_vm1, %v761_v59, %v270_v58  ;;  %v756_v0 = vld [vmem:[%s1498_s0 + $0x5] ss:$16 sm:%s245_s27]   ;;  %s300_s29 = smov 192  ;;  %s355_s3 = smov 3 }
  0x1a   :  { %v280_v63 = vsel %vm75_vm2, %v762_v60, %v275_v61  ;;  %v757_v1 = vld [vmem:[%s1498_s0 + $0x5] ss:$16 sm:%s250_s28]   ;;  %v248_v2 = vsel %vm65_vm0, %v756_v0, %v755_v62  ;;  %v769_v5 = vld [vmem:[%s1498_s0 + $0x8d] ss:$16 sm:%s310_s7]   ;;  %s363_s9 = smov 48  ;;  %s368_s10 = smov 192 }
  0x1b   :  { %281 = vrot.lane.b32.xlu1 %v280_v63, %s859_s14  ;;  %v758_v3 = vld [vmem:[%s1498_s0 + $0x5] ss:$16 sm:%s255_s4]   ;;  %v253_v4 = vsel %vm70_vm1, %v757_v1, %v248_v2  ;;  %s358_s4 = smov 12  ;;  %s336_s18 = smov 12 }
  0x1c   :  { %v770_v6 = vld [vmem:[%s1498_s0 + $0x8d] ss:$16 sm:%s313_s8]   ;;  %v258_v7 = vsel %vm75_vm2, %v758_v3, %v253_v4  ;;  %v764_v12 = vld [vmem:[%s1498_s0 + $0x85] ss:$16 sm:%s287_s17]   ;;  %s341_s19 = smov 48  ;;  %s346_s25 = smov 192 }
  0x1d   :  { %v316_v8 = vsel %vm65_vm0, %v770_v6, %v769_v5  ;;  %v771_v9 = vld [vmem:[%s1498_s0 + $0x8d] ss:$16 sm:%s318_s13]   ;;  %259 = vrot.lane.b32.xlu0 %v258_v7, %s859_s14  ;;  %s333_s13 = smov 3  ;;  %s401_s27 = smov 3 }
  0x1e   :  { %v772_v10 = vld [vmem:[%s1498_s0 + $0x8d] ss:$16 sm:%s323_s6]   ;;  %v321_v11 = vsel %vm70_vm1, %v771_v9, %v316_v8  ;;  %v765_v14 = vld [vmem:[%s1498_s0 + $0x85] ss:$16 sm:%s290_s22]   ;;  %s404_s28 = smov 12  ;;  %s414_s23 = smov 192 }
  0x1f   :  { %v326_v13 = vsel %vm75_vm2, %v772_v10, %v321_v11  ;;  %v766_v15 = vld [vmem:[%s1498_s0 + $0x85] ss:$16 sm:%s295_s24]   ;;  %v293_v16 = vsel %vm65_vm0, %v765_v14, %v764_v12  ;;  %v778_v19 = vld [vmem:[%s1498_s0 + $0xc] ss:$16 sm:%s355_s3]   ;;  %s860_s5 = smov 64   ;;  %s381_s6 = smov 12 }
  0x20   :  { %327 = vrot.lane.b32.xlu1 %v326_v13, %s859_s14  ;;  %v767_v17 = vld [vmem:[%s1498_s0 + $0x85] ss:$16 sm:%s300_s29]   ;;  %v298_v18 = vsel %vm70_vm1, %v766_v15, %v293_v16  ;;  %s386_s15 = smov 48  ;;  %s391_s20 = smov 192 }
  0x21   :  { %v779_v20 = vld [vmem:[%s1498_s0 + $0xc] ss:$16 sm:%s358_s4]   ;;  %v303_v21 = vsel %vm75_vm2, %v767_v17, %v298_v18  ;;  %v774_v26 = vld [vmem:[%s1498_s0 + $0x4] ss:$16 sm:%s333_s13]   ;;  %s409_s4 = smov 48  ;;  %s446_s24 = smov 3 }
  0x22   :  { %v361_v22 = vsel %vm65_vm0, %v779_v20, %v778_v19  ;;  %v780_v23 = vld [vmem:[%s1498_s0 + $0xc] ss:$16 sm:%s363_s9]   ;;  %304 = vrot.lane.b32.xlu0 %v303_v21, %s859_s14  ;;  %s378_s9 = smov 3  ;;  %s454_s29 = smov 48 }
  0x23   :  { %v781_v24 = vld [vmem:[%s1498_s0 + $0xc] ss:$16 sm:%s368_s10]   ;;  %v366_v25 = vsel %vm70_vm1, %v780_v23, %v361_v22  ;;  %v775_v28 = vld [vmem:[%s1498_s0 + $0x4] ss:$16 sm:%s336_s18]   ;;  %s459_s30 = smov 192  ;;  %s427_s10 = smov 12 }
  0x24   :  { %v371_v27 = vsel %vm75_vm2, %v781_v24, %v366_v25  ;;  %v776_v29 = vld [vmem:[%s1498_s0 + $0x4] ss:$16 sm:%s341_s19]   ;;  %v339_v30 = vsel %vm65_vm0, %v775_v28, %v774_v26  ;;  %v788_v33 = vld [vmem:[%s1498_s0 + $0x8c] ss:$16 sm:%s401_s27]   ;;  %s432_s11 = smov 48  ;;  %s437_s16 = smov 192 }
  0x25   :  { %372 = vrot.lane.b32.xlu1 %v371_v27, %s860_s5  ;;  %v777_v31 = vld [vmem:[%s1498_s0 + $0x4] ss:$16 sm:%s346_s25]   ;;  %v344_v32 = vsel %vm70_vm1, %v776_v29, %v339_v30  ;;  %s449_s25 = smov 12  ;;  %s492_s18 = smov 3 }
  0x26   :  { %v789_v34 = vld [vmem:[%s1498_s0 + $0x8c] ss:$16 sm:%s404_s28]   ;;  %v349_v35 = vsel %vm75_vm2, %v777_v31, %v344_v32  ;;  %v783_v40 = vld [vmem:[%s1498_s0 + $0x84] ss:$16 sm:%s378_s9]   ;;  %s495_s19 = smov 12  ;;  %s505_s14 = smov 192 }
  0x27   :  { %v407_v36 = vsel %vm65_vm0, %v789_v34, %v788_v33  ;;  %v790_v37 = vld [vmem:[%s1498_s0 + $0x8c] ss:$16 sm:%s409_s4]   ;;  %350 = vrot.lane.b32.xlu0 %v349_v35, %s860_s5  ;;  %s424_s4 = smov 3  ;;  %s861_s26 = smov 48  }
  0x28   :  { %v791_v38 = vld [vmem:[%s1498_s0 + $0x8c] ss:$16 sm:%s414_s23]   ;;  %v412_v39 = vsel %vm70_vm1, %v790_v37, %v407_v36  ;;  %v784_v42 = vld [vmem:[%s1498_s0 + $0x84] ss:$16 sm:%s381_s6]   ;;  %s472_s23 = smov 12  ;;  %s477_s7 = smov 48 }
  0x29   :  { %v417_v41 = vsel %vm75_vm2, %v791_v38, %v412_v39  ;;  %v785_v43 = vld [vmem:[%s1498_s0 + $0x84] ss:$16 sm:%s386_s15]   ;;  %v384_v44 = vsel %vm65_vm0, %v784_v42, %v783_v40  ;;  %v797_v47 = vld [vmem:[%s1498_s0 + $0xb] ss:$16 sm:%s446_s24]   ;;  %s482_s12 = smov 192  ;;  %s537_s15 = smov 3 }
  0x2a   :  { %418 = vrot.lane.b32.xlu1 %v417_v41, %s860_s5  ;;  %v786_v45 = vld [vmem:[%s1498_s0 + $0x84] ss:$16 sm:%s391_s20]   ;;  %v389_v46 = vsel %vm70_vm1, %v785_v43, %v384_v44  ;;  %s545_s20 = smov 48  ;;  %s550_s21 = smov 192 }
  0x2b   :  { %v798_v48 = vld [vmem:[%s1498_s0 + $0xb] ss:$16 sm:%s449_s25]   ;;  %v394_v49 = vsel %vm75_vm2, %v786_v45, %v389_v46  ;;  %v793_v54 = vld [vmem:[%s1498_s0 + $0x3] ss:$16 sm:%s424_s4]   ;;  %s500_s25 = smov 48  ;;  %s523_s2 = smov 48 }
  0x2c   :  { %v452_v50 = vsel %vm65_vm0, %v798_v48, %v797_v47  ;;  %v799_v51 = vld [vmem:[%s1498_s0 + $0xb] ss:$16 sm:%s454_s29]   ;;  %395 = vrot.lane.b32.xlu0 %v394_v49, %s860_s5  ;;  %s469_s29 = smov 3  ;;  %s528_s8 = smov 192 }
  0x2d   :  { %v800_v52 = vld [vmem:[%s1498_s0 + $0xb] ss:$16 sm:%s459_s30]   ;;  %v457_v53 = vsel %vm70_vm1, %v799_v51, %v452_v50  ;;  %v794_v56 = vld [vmem:[%s1498_s0 + $0x3] ss:$16 sm:%s427_s10]   ;;  %s518_s30 = smov 12  ;;  %s583_s10 = smov 3 }
  0x2e   :  { %v462_v55 = vsel %vm75_vm2, %v800_v52, %v457_v53  ;;  %v795_v57 = vld [vmem:[%s1498_s0 + $0x3] ss:$16 sm:%s432_s11]   ;;  %v430_v58 = vsel %vm65_vm0, %v794_v56, %v793_v54  ;;  %v807_v61 = vld [vmem:[%s1498_s0 + $0x8b] ss:$16 sm:%s492_s18]   ;;  %s586_s11 = smov 12  ;;  %s596_s5 = smov 192 }
  0x2f   :  { %463 = vrot.lane.b32.xlu1 %v462_v55, %s861_s26  ;;  %v796_v59 = vld [vmem:[%s1498_s0 + $0x3] ss:$16 sm:%s437_s16]   ;;  %v435_v60 = vsel %vm70_vm1, %v795_v57, %v430_v58  ;;  %s540_s16 = smov 12  ;;  %s862_s17 = smov 32  }
  0x30   :  { %v808_v62 = vld [vmem:[%s1498_s0 + $0x8b] ss:$16 sm:%s495_s19]   ;;  %v440_v63 = vsel %vm75_vm2, %v796_v59, %v435_v60  ;;  %v802_v4 = vld [vmem:[%s1498_s0 + $0x83] ss:$16 sm:%s469_s29]   ;;  %s568_s27 = smov 48  ;;  %s573_s3 = smov 192 }
  0x31   :  { %v498_v0 = vsel %vm65_vm0, %v808_v62, %v807_v61  ;;  %v809_v1 = vld [vmem:[%s1498_s0 + $0x8b] ss:$16 sm:%s500_s25]   ;;  %441 = vrot.lane.b32.xlu0 %v440_v63, %s861_s26  ;;  %s515_s25 = smov 3  ;;  %s641_s13 = smov 192 }
  0x32   :  { %v810_v2 = vld [vmem:[%s1498_s0 + $0x8b] ss:$16 sm:%s505_s14]   ;;  %v503_v3 = vsel %vm70_vm1, %v809_v1, %v498_v0  ;;  %v803_v6 = vld [vmem:[%s1498_s0 + $0x83] ss:$16 sm:%s472_s23]   ;;  %s563_s14 = smov 12  ;;  %s609_s24 = smov 12 }
  0x33   :  { %v508_v5 = vsel %vm75_vm2, %v810_v2, %v503_v3  ;;  %v804_v7 = vld [vmem:[%s1498_s0 + $0x83] ss:$16 sm:%s477_s7]   ;;  %v475_v8 = vsel %vm65_vm0, %v803_v6, %v802_v4  ;;  %v816_v11 = vld [vmem:[%s1498_s0 + $0xa] ss:$16 sm:%s537_s15]   ;;  %s628_s7 = smov 3  ;;  %s677_s4 = smov 12 }
  0x34   :  { %509 = vrot.lane.b32.xlu1 %v508_v5, %s861_s26  ;;  %v805_v9 = vld [vmem:[%s1498_s0 + $0x83] ss:$16 sm:%s482_s12]   ;;  %v480_v10 = vsel %vm70_vm1, %v804_v7, %v475_v8  ;;  %s636_s12 = smov 48  ;;  %v2_v38 = vld [vmem:[%s1498_s0] ss:$8 sm:$0xf]  }
  0x35   :  { %v817_v12 = vld [vmem:[%s1498_s0 + $0xa] ss:$16 sm:%s540_s16]   ;;  %v485_v13 = vsel %vm75_vm2, %v805_v9, %v480_v10  ;;  %v812_v18 = vld [vmem:[%s1498_s0 + $0x2] ss:$16 sm:%s515_s25]   ;;  %s591_s16 = smov 48  ;;  %s614_s25 = smov 48 }
  0x36   :  { %v543_v14 = vsel %vm65_vm0, %v817_v12, %v816_v11  ;;  %v818_v15 = vld [vmem:[%s1498_s0 + $0xa] ss:$16 sm:%s545_s20]   ;;  %486 = vrot.lane.b32.xlu0 %v485_v13, %s861_s26  ;;  %s560_s20 = smov 3  ;;  %v3_v48 = vld [vmem:[%s1498_s0] ss:$8 sm:$0xf0]  }
  0x37   :  { %v819_v16 = vld [vmem:[%s1498_s0 + $0xa] ss:$16 sm:%s550_s21]   ;;  %v548_v17 = vsel %vm70_vm1, %v818_v15, %v543_v14  ;;  %v813_v20 = vld [vmem:[%s1498_s0 + $0x2] ss:$16 sm:%s518_s30]   ;;  %s619_s30 = smov 192  ;;  %v5_v52 = vsel %vm4_vm3, %v3_v48, %v2_v38  ;;  %s664_s26 = smov 192 }
  0x38   :  { %v553_v19 = vsel %vm75_vm2, %v819_v16, %v548_v17  ;;  %v814_v21 = vld [vmem:[%s1498_s0 + $0x2] ss:$16 sm:%s523_s2]   ;;  %v521_v22 = vsel %vm65_vm0, %v813_v20, %v812_v18  ;;  %v826_v25 = vld [vmem:[%s1498_s0 + $0x8a] ss:$16 sm:%s583_s10]   ;;  %s674_s2 = smov 3 }
  0x39   :  { %554 = vrot.lane.b32.xlu1 %v553_v19, %s862_s17  ;;  %v815_v23 = vld [vmem:[%s1498_s0 + $0x2] ss:$16 sm:%s528_s8]   ;;  %v526_v24 = vsel %vm70_vm1, %v814_v21, %v521_v22  ;;  %s631_s8 = smov 12  ;;  %7 = vst.msk [vmem:[%s1499_s1] ss:$8 sm:$0x3] %vm6_vm4, %v5_v52  }
  0x3a   :  { %v827_v26 = vld [vmem:[%s1498_s0 + $0x8a] ss:$16 sm:%s586_s11]   ;;  %v531_v27 = vsel %vm75_vm2, %v815_v23, %v526_v24  ;;  %v821_v32 = vld [vmem:[%s1498_s0 + $0x82] ss:$16 sm:%s560_s20]   ;;  %s682_s11 = smov 48 }
  0x3b   :  { %v589_v28 = vsel %vm65_vm0, %v827_v26, %v826_v25  ;;  %v828_v29 = vld [vmem:[%s1498_s0 + $0x8a] ss:$16 sm:%s591_s16]   ;;  %532 = vrot.lane.b32.xlu0 %v531_v27, %s862_s17  ;;  %s606_s16 = smov 3  ;;  %696 = vst.msk [vmem:[%s1499_s1 - $0xf] ss:$8 sm:$0xc] %vm6_vm4, %v5_v52  }
  0x3c   :  { %v829_v30 = vld [vmem:[%s1498_s0 + $0x8a] ss:$16 sm:%s596_s5]   ;;  %v594_v31 = vsel %vm70_vm1, %v828_v29, %v589_v28  ;;  %v822_v34 = vld [vmem:[%s1498_s0 + $0x82] ss:$16 sm:%s563_s14]  }
  0x3d   :  { %v599_v33 = vsel %vm75_vm2, %v829_v30, %v594_v31  ;;  %v823_v35 = vld [vmem:[%s1498_s0 + $0x82] ss:$16 sm:%s568_s27]   ;;  %v566_v36 = vsel %vm65_vm0, %v822_v34, %v821_v32  ;;  %v835_v40 = vld [vmem:[%s1498_s0 + $0x9] ss:$16 sm:%s628_s7]  }
  0x3e   :  { %600 = vrot.lane.b32.xlu1 %v599_v33, %s862_s17  ;;  %v824_v37 = vld [vmem:[%s1498_s0 + $0x82] ss:$16 sm:%s573_s3]   ;;  %v571_v39 = vsel %vm70_vm1, %v823_v35, %v566_v36  ;;  %697 = vst.msk [vmem:[%s1499_s1 - $0x1e] ss:$8 sm:$0x30] %vm6_vm4, %v5_v52   ;;  %s659_s3 = smov 48 }
  0x3f   :  { %v836_v41 = vld [vmem:[%s1498_s0 + $0x9] ss:$16 sm:%s631_s8]   ;;  %v576_v42 = vsel %vm75_vm2, %v824_v37, %v571_v39  ;;  %v831_v47 = vld [vmem:[%s1498_s0 + $0x1] ss:$16 sm:%s606_s16]   ;;  %s651_s16 = smov 3 }
  0x40   :  { %v634_v43 = vsel %vm65_vm0, %v836_v41, %v835_v40  ;;  %v837_v44 = vld [vmem:[%s1498_s0 + $0x9] ss:$16 sm:%s636_s12]   ;;  %577 = vrot.lane.b32.xlu0 %v576_v42, %s862_s17  ;;  %s687_s12 = smov 192  ;;  %698 = vst.msk [vmem:[%s1499_s1 - $0x2d] ss:$8 sm:$0xc0] %vm6_vm4, %v5_v52  }
  0x41   :  { %v838_v45 = vld [vmem:[%s1498_s0 + $0x9] ss:$16 sm:%s641_s13]   ;;  %v639_v46 = vsel %vm70_vm1, %v837_v44, %v634_v43  ;;  %v832_v50 = vld [vmem:[%s1498_s0 + $0x1] ss:$16 sm:%s609_s24]   ;;  %s863_s13 = smov 16   ;;  %s654_s17 = smov 12 }
  0x42   :  { %v644_v49 = vsel %vm75_vm2, %v838_v45, %v639_v46  ;;  %v833_v51 = vld [vmem:[%s1498_s0 + $0x1] ss:$16 sm:%s614_s25]   ;;  %v612_v53 = vsel %vm65_vm0, %v832_v50, %v831_v47  ;;  %v699_v55 = vld [vmem:[%s1498_s0 + $0x40] ss:$8 sm:$0xf]  }
  0x43   :  { %645 = vrot.lane.b32.xlu1 %v644_v49, %s863_s13  ;;  %v834_v54 = vld [vmem:[%s1498_s0 + $0x1] ss:$16 sm:%s619_s30]   ;;  %v617_v56 = vsel %vm70_vm1, %v833_v51, %v612_v53  ;;  %v700_v1 = vld [vmem:[%s1498_s0 + $0x40] ss:$8 sm:$0xf0]  }
  0x44   :  { %v845_v57 = vld [vmem:[%s1498_s0 + $0x89] ss:$16 sm:%s674_s2]   ;;  %v622_v59 = vsel %vm75_vm2, %v834_v54, %v617_v56  ;;  %v840_v0 = vld [vmem:[%s1498_s0 + $0x81] ss:$16 sm:%s651_s16]   ;;  %v19_v5 = vsel %vm4_vm3, %v700_v1, %v699_v55 }
  0x45   :  { %v846_v58 = vld [vmem:[%s1498_s0 + $0x89] ss:$16 sm:%s677_s4]   ;;  %623 = vrot.lane.b32.xlu0 %v622_v59, %s863_s13  ;;  %701 = vst.msk [vmem:[%s1499_s1 + $0x4] ss:$8 sm:$0x3] %vm6_vm4, %v19_v5  }
  0x46   :  { %v680_v60 = vsel %vm65_vm0, %v846_v58, %v845_v57  ;;  %v847_v61 = vld [vmem:[%s1498_s0 + $0x89] ss:$16 sm:%s682_s11]   ;;  %v841_v3 = vld [vmem:[%s1498_s0 + $0x81] ss:$16 sm:%s654_s17]  }
  0x47   :  { %v848_v62 = vld [vmem:[%s1498_s0 + $0x89] ss:$16 sm:%s687_s12]   ;;  %v685_v63 = vsel %vm70_vm1, %v847_v61, %v680_v60  ;;  %v842_v4 = vld [vmem:[%s1498_s0 + $0x81] ss:$16 sm:%s659_s3]   ;;  %v657_v6 = vsel %vm65_vm0, %v841_v3, %v840_v0 }
  0x48   :  { %v690_v2 = vsel %vm75_vm2, %v848_v62, %v685_v63  ;;  %v843_v7 = vld [vmem:[%s1498_s0 + $0x81] ss:$16 sm:%s664_s26]   ;;  %702 = vst.msk [vmem:[%s1499_s1 - $0xb] ss:$8 sm:$0xc] %vm6_vm4, %v19_v5   ;;  %v662_v9 = vsel %vm70_vm1, %v842_v4, %v657_v6 }
  0x49   :  { %691 = vrot.lane.b32.xlu1 %v690_v2, %s863_s13  ;;  %703 = vst.msk [vmem:[%s1499_s1 - $0x1a] ss:$8 sm:$0x30] %vm6_vm4, %v19_v5   ;;  %704 = vst.msk [vmem:[%s1499_s1 - $0x29] ss:$8 sm:$0xc0] %vm6_vm4, %v19_v5   ;;  %v667_v12 = vsel %vm75_vm2, %v843_v7, %v662_v9 }
  0x4a   :  { %v705_v8 = vld [vmem:[%s1498_s0 + $0x80] ss:$8 sm:$0xf]   ;;  %668 = vrot.lane.b32.xlu0 %v667_v12, %s863_s13 }
  0x4b   :  { %v706_v10 = vld [vmem:[%s1498_s0 + $0x80] ss:$8 sm:$0xf0]  }
  0x4c   :  { %v711_v11 = vld [vmem:[%s1498_s0 + $0xc0] ss:$8 sm:$0xf]   ;;  %v34_v13 = vsel %vm4_vm3, %v706_v10, %v705_v8 }
  0x4d   :  { %v712_v14 = vld [vmem:[%s1498_s0 + $0xc0] ss:$8 sm:$0xf0]   ;;  %707 = vst.msk [vmem:[%s1499_s1 + $0x10] ss:$8 sm:$0x3] %vm6_vm4, %v34_v13  }
  0x4e   :  { %708 = vst.msk [vmem:[%s1499_s1 + $0x1] ss:$8 sm:$0xc] %vm6_vm4, %v34_v13   ;;  %709 = vst.msk [vmem:[%s1499_s1 - $0xe] ss:$8 sm:$0x30] %vm6_vm4, %v34_v13   ;;  %v49_v15 = vsel %vm4_vm3, %v712_v14, %v711_v11 }
  0x4f   :  { %710 = vst.msk [vmem:[%s1499_s1 - $0x1d] ss:$8 sm:$0xc0] %vm6_vm4, %v34_v13   ;;  %713 = vst.msk [vmem:[%s1499_s1 + $0x14] ss:$8 sm:$0x3] %vm6_vm4, %v49_v15  }
  0x50   :  { %714 = vst.msk [vmem:[%s1499_s1 + $0x5] ss:$8 sm:$0xc] %vm6_vm4, %v49_v15   ;;  %715 = vst.msk [vmem:[%s1499_s1 - $0xa] ss:$8 sm:$0x30] %vm6_vm4, %v49_v15  }
  0x51   :  { %716 = vst.msk [vmem:[%s1499_s1 - $0x19] ss:$8 sm:$0xc0] %vm6_vm4, %v49_v15  }
  0x78   :  { %v123_v16 = vpop.permute.xlu1 %122  }
  0x79   :  { %730 = vst.msk [vmem:[%s1499_s1 + $0x10] sm:$0xff] %vm79_vm5, %v123_v16  }
  0x7c   :  { %v78_v17 = vpop.permute.xlu0 %77  }
  0x7d   :  { %80 = vst.msk [vmem:[%s1499_s1] sm:$0xff] %vm79_vm5, %v78_v17   ;;  %v146_v18 = vpop.permute.xlu1 %145  }
  0x7e   :  { %735 = vst.msk [vmem:[%s1499_s1 + $0x18] sm:$0xff] %vm79_vm5, %v146_v18  }
  0x81   :  { %v100_v19 = vpop.permute.xlu0 %99  }
  0x82   :  { %725 = vst.msk [vmem:[%s1499_s1 + $0x8] sm:$0xff] %vm79_vm5, %v100_v19   ;;  %v191_v20 = vpop.permute.xlu1 %190  }
  0x83   :  { %744 = vst.msk [vmem:[%s1499_s1 + $0x8] sm:$0xff] %vm170_vm6, %v191_v20  }
  0x85   :  { %v169_v21 = vpop.permute.xlu0 %168  }
  0x86   :  { %171 = vst.msk [vmem:[%s1499_s1] sm:$0xff] %vm170_vm6, %v169_v21  }
  0x88   :  { %v237_v22 = vpop.permute.xlu1 %236  }
  0x89   :  { %754 = vst.msk [vmem:[%s1499_s1 + $0x18] sm:$0xff] %vm170_vm6, %v237_v22  }
  0x8a   :  { %v214_v23 = vpop.permute.xlu0 %213  }
  0x8b   :  { %749 = vst.msk [vmem:[%s1499_s1 + $0x10] sm:$0xff] %vm170_vm6, %v214_v23  }
  0x8d   :  { %v282_v24 = vpop.permute.xlu1 %281  }
  0x8e   :  { %763 = vst.msk [vmem:[%s1499_s1 + $0x8] sm:$0xff] %vm261_vm7, %v282_v24  }
  0x8f   :  { %v260_v25 = vpop.permute.xlu0 %259  }
  0x90   :  { %262 = vst.msk [vmem:[%s1499_s1] sm:$0xff] %vm261_vm7, %v260_v25  }
  0x92   :  { %v328_v26 = vpop.permute.xlu1 %327  }
  0x93   :  { %773 = vst.msk [vmem:[%s1499_s1 + $0x18] sm:$0xff] %vm261_vm7, %v328_v26  }
  0x94   :  { %v305_v27 = vpop.permute.xlu0 %304  }
  0x95   :  { %768 = vst.msk [vmem:[%s1499_s1 + $0x10] sm:$0xff] %vm261_vm7, %v305_v27  }
  0x97   :  { %v373_v28 = vpop.permute.xlu1 %372  }
  0x98   :  { %782 = vst.msk [vmem:[%s1499_s1 + $0x8] sm:$0xff] %vm352_vm8, %v373_v28  }
  0x99   :  { %v351_v29 = vpop.permute.xlu0 %350  }
  0x9a   :  { %353 = vst.msk [vmem:[%s1499_s1] sm:$0xff] %vm352_vm8, %v351_v29  }
  0x9c   :  { %v419_v30 = vpop.permute.xlu1 %418  }
  0x9d   :  { %792 = vst.msk [vmem:[%s1499_s1 + $0x18] sm:$0xff] %vm352_vm8, %v419_v30  }
  0x9e   :  { %v396_v31 = vpop.permute.xlu0 %395  }
  0x9f   :  { %787 = vst.msk [vmem:[%s1499_s1 + $0x10] sm:$0xff] %vm352_vm8, %v396_v31  }
  0xa1   :  { %v464_v32 = vpop.permute.xlu1 %463  }
  0xa2   :  { %801 = vst.msk [vmem:[%s1499_s1 + $0x8] sm:$0xff] %vm443_vm9, %v464_v32  }
  0xa3   :  { %v442_v33 = vpop.permute.xlu0 %441  }
  0xa4   :  { %444 = vst.msk [vmem:[%s1499_s1] sm:$0xff] %vm443_vm9, %v442_v33  }
  0xa6   :  { %v510_v34 = vpop.permute.xlu1 %509  }
  0xa7   :  { %811 = vst.msk [vmem:[%s1499_s1 + $0x18] sm:$0xff] %vm443_vm9, %v510_v34  }
  0xa8   :  { %v487_v35 = vpop.permute.xlu0 %486  }
  0xa9   :  { %806 = vst.msk [vmem:[%s1499_s1 + $0x10] sm:$0xff] %vm443_vm9, %v487_v35  }
  0xab   :  { %v555_v36 = vpop.permute.xlu1 %554  }
  0xac   :  { %820 = vst.msk [vmem:[%s1499_s1 + $0x8] sm:$0xff] %vm534_vm10, %v555_v36  }
  0xad   :  { %v533_v37 = vpop.permute.xlu0 %532  }
  0xae   :  { %535 = vst.msk [vmem:[%s1499_s1] sm:$0xff] %vm534_vm10, %v533_v37  }
  0xb0   :  { %v601_v38 = vpop.permute.xlu1 %600  }
  0xb1   :  { %830 = vst.msk [vmem:[%s1499_s1 + $0x18] sm:$0xff] %vm534_vm10, %v601_v38  }
  0xb2   :  { %v578_v39 = vpop.permute.xlu0 %577  }
  0xb3   :  { %825 = vst.msk [vmem:[%s1499_s1 + $0x10] sm:$0xff] %vm534_vm10, %v578_v39  }
  0xb5   :  { %v646_v40 = vpop.permute.xlu1 %645  }
  0xb6   :  { %839 = vst.msk [vmem:[%s1499_s1 + $0x8] sm:$0xff] %vm625_vm11, %v646_v40  }
  0xb7   :  { %v624_v41 = vpop.permute.xlu0 %623  }
  0xb8   :  { %626 = vst.msk [vmem:[%s1499_s1] sm:$0xff] %vm625_vm11, %v624_v41  }
  0xbb   :  { %v692_v42 = vpop.permute.xlu1 %691  }
  0xbc   :  { %849 = vst.msk [vmem:[%s1499_s1 + $0x18] sm:$0xff] %vm625_vm11, %v692_v42   ;;  %v669_v43 = vpop.permute.xlu0 %668  }
  0xbd   :  { %844 = vst.msk [vmem:[%s1499_s1 + $0x10] sm:$0xff] %vm625_vm11, %v669_v43  }

// kernel: generator_forward.9
= control target key start
LH: loop header
LB: loop body
LE: loop exit
PB: predicated region body
PF: predicated region fallthrough
CT: control target
= control target key end

     0   :  { %8 = vsyncpa [#allocation3], 0  ;;  %s560_s0 = inlined_call_operand.vmem [shape: bf16[64,256], index: 0, kind: input, shape index: {}]   ;;  %s561_s1 = inlined_call_operand.hbm [shape: bf16[256,128], index: 1, kind: input, shape index: {}]   ;;  %s562_s2 = inlined_call_operand.hbm [shape: f32[1,128], index: 2, kind: input, shape index: {}]   ;;  %s563_s3 = inlined_call_operand.vmem [shape: f32[64,128], index: 3, kind: output, shape index: {}]  }
   0x1   :  { %9 = vsyncpa [#allocation5], 0  ;;  %s464_s12 = smov [#allocation2]   ;;  %s416_s16 = scalar_lea.hbm %s561_s1, 2048 }
   0x2   :  { %s17_s13 = sshll.u32 %s464_s12, 4  ;;  %p417_p0 = scmp.ne.s32.totalorder %s561_s1, %s416_s16  ;;  %s18_s13 = int_to_ptr.vmem [resolvable:$true] %s17_s13 }
   0x3   :  { %p420_p1 = scmp.lt.u32.totalorder %s416_s16, %s561_s1 }
   0x5   :  { %p422_p2 = pnand %p420_p1, %p417_p0 }
   0x7   :  { %425 = shalt.err (!%p422_p2)
}
   0x8   :  { %s426_s21 = scalar_lea.vmem %s18_s13, 2048  ;;  %p431_p4 = scmp.lt.s32.totalorder %s18_s13, %s18_s13 }
   0x9   :  { %p427_p3 = scmp.ne.s32.totalorder %s18_s13, %s426_s21  ;;  %p432_p5 = scmp.lt.s32.totalorder %s426_s21, %s426_s21 }
   0xb   :  { %p433_p6 = por %p432_p5, %p431_p4 }
   0xd   :  { %p434_p7 = pnand %p433_p6, %p427_p3 }
   0xf   :  { %437 = shalt.err (!%p434_p7)
}
  0x10   :  { %s465_s22 = smov 64   ;;  %s466_s23 = smov 4  }
  0x11   :  { %23 = dma.hbm_to_vmem [thread:$0]  %s561_s1, 2048, %s18_s13, [#allocation3], %s465_s22, %s465_s22, %s466_s23  }
  0x12   :  { %s467_s26 = smov [#allocation4]   ;;  %s438_s30 = scalar_lea.hbm %s562_s2, 16 }
  0x13   :  { %s30_s27 = sshll.u32 %s467_s26, 4  ;;  %p439_p8 = scmp.ne.s32.totalorder %s562_s2, %s438_s30  ;;  %s31_s27 = int_to_ptr.vmem [resolvable:$true] %s30_s27 }
  0x14   :  { %p442_p9 = scmp.lt.u32.totalorder %s438_s30, %s562_s2 }
  0x16   :  { %p444_p10 = pnand %p442_p9, %p439_p8 }
  0x18   :  { %447 = shalt.err (!%p444_p10)
}
  0x19   :  { %s448_s8 = scalar_lea.vmem %s31_s27, 16  ;;  %s452_s1 = scalar_lea.vmem %s31_s27, 32 }
  0x1a   :  { %p449_p11 = scmp.ne.s32.totalorder %s31_s27, %s448_s8  ;;  %p453_p12 = scmp.lt.s32.totalorder %s31_s27, %s31_s27 }
  0x1b   :  { %p454_p13 = scmp.lt.s32.totalorder %s452_s1, %s448_s8 }
  0x1d   :  { %p455_p0 = por %p454_p13, %p453_p12 }
  0x1f   :  { %p456_p1 = pnand %p455_p0, %p449_p11 }
  0x21   :  { %459 = shalt.err (!%p456_p1)
}
  0x22   :  { %33 = dma.hbm_to_vmem [thread:$0]  %s562_s2, 16, %s31_s27, [#allocation5]  }
  0x23   :  { %460 = dma.done.wait [#allocation3], 2048  }
  0x24   :  { %461 = vsyncadd [#allocation3], 4294965248 }
  0x25   :  { %462 = dma.done.wait [#allocation5], 16  }
  0x26   :  { %463 = vsyncadd [#allocation5], 4294967280  ;;  %v388_v0 = vld [vmem:[#allocation2 + $0x40] sm:$0xff]   ;;  %v390_v2 = vld [vmem:[#allocation2 + $0x48] sm:$0xff]  }
  0x27   :  { %v389_v1 = vld [vmem:[#allocation2] sm:$0xff]   ;;  %328 = vmatprep.subr.bf16.mxu0 %v388_v0  ;;  %368 = vmatprep.subr.bf16.mxu1 %v388_v0  ;;  %v391_v3 = vld [vmem:[#allocation2 + $0x8] sm:$0xff]   ;;  %v392_v4 = vld [vmem:[#allocation2 + $0x50] sm:$0xff]  }
  0x28   :  { %329 = vmatpush3.bf16.msra.mxu0 %v389_v1  ;;  %376 = vmatpush3.bf16.msra.mxu1 %v389_v1  ;;  %v393_v5 = vld [vmem:[#allocation2 + $0x10] sm:$0xff]   ;;  %v394_v6 = vld [vmem:[#allocation2 + $0x58] sm:$0xff]   ;;  %v396_v8 = vld [vmem:[#allocation2 + $0x60] sm:$0xff]  }
  0x29   :  { %330 = vmatprep.subr.bf16.mxu0 %v390_v2  ;;  %369 = vmatprep.subr.bf16.mxu1 %v390_v2  ;;  %v395_v7 = vld [vmem:[#allocation2 + $0x18] sm:$0xff]   ;;  %v397_v9 = vld [vmem:[#allocation2 + $0x20] sm:$0xff]   ;;  %v398_v10 = vld [vmem:[#allocation2 + $0x68] sm:$0xff]  }
  0x2a   :  { %v406_v11 = vld [vmem:[%s560_s0 + $0x4] ss:$8 sps:$4 sm:$0xff]   ;;  %v400_v14 = vld [vmem:[#allocation2 + $0x70] sm:$0xff]   ;;  %v402_v16 = vld [vmem:[#allocation2 + $0x78] sm:$0xff]  }
  0x2b   :  { %v409_v12 = vld [vmem:[%s560_s0 + $0x24] ss:$8 sps:$4 sm:$0xff]   ;;  %256 = vmatprep.mubr.bf16.mxu0 %v406_v11  ;;  %v401_v15 = vld [vmem:[#allocation2 + $0x30] sm:$0xff]   ;;  %v403_v17 = vld [vmem:[#allocation2 + $0x38] sm:$0xff]  }
  0x2c   :  { %331 = vmatpush3.bf16.msra.mxu0 %v391_v3  ;;  %377 = vmatpush3.bf16.msra.mxu1 %v391_v3  ;;  %v399_v13 = vld [vmem:[#allocation2 + $0x28] sm:$0xff]   ;;  %v410_v20 = vld [vmem:[%s560_s0 + $0x14] ss:$8 sps:$4 sm:$0xff]   ;;  %v414_v22 = vld [vmem:[%s560_s0 + $0x10] ss:$8 sps:$4 sm:$0xff]  }
  0x2d   :  { %332 = vmatprep.subr.bf16.mxu0 %v392_v4  ;;  %370 = vmatprep.subr.bf16.mxu1 %v392_v4  ;;  %v404_v18 = vld [vmem:[%s560_s0] ss:$8 sps:$4 sm:$0xff]   ;;  %v412_v21 = vld [vmem:[%s560_s0 + $0x34] ss:$8 sps:$4 sm:$0xff]   ;;  %v415_v23 = vld [vmem:[%s560_s0 + $0x30] ss:$8 sps:$4 sm:$0xff]  }
  0x2e   :  { %272 = vmatprep.mubr.bf16.mxu1 %v409_v12  ;;  %v407_v19 = vld [vmem:[%s560_s0 + $0x20] ss:$8 sps:$4 sm:$0xff]  }
  0x2f   :  { %v303_v26 = vld [vmem:[#allocation4] ss:$0 sm:$0xff] }
  0x30   :  { %333 = vmatpush3.bf16.msra.mxu0 %v393_v5  ;;  %378 = vmatpush3.bf16.msra.mxu1 %v393_v5 }
  0x31   :  { %334 = vmatprep.subr.bf16.mxu0 %v394_v6  ;;  %371 = vmatprep.subr.bf16.mxu1 %v394_v6 }
  0x34   :  { %335 = vmatpush3.bf16.msra.mxu0 %v395_v7  ;;  %379 = vmatpush3.bf16.msra.mxu1 %v395_v7 }
  0x35   :  { %336 = vmatprep.subr.bf16.mxu0 %v396_v8  ;;  %372 = vmatprep.subr.bf16.mxu1 %v396_v8 }
  0x38   :  { %337 = vmatpush3.bf16.msra.mxu0 %v397_v9  ;;  %380 = vmatpush3.bf16.msra.mxu1 %v397_v9 }
  0x39   :  { %338 = vmatprep.subr.bf16.mxu0 %v398_v10  ;;  %373 = vmatprep.subr.bf16.mxu1 %v398_v10 }
  0x3c   :  { %339 = vmatpush3.bf16.msra.mxu0 %v399_v13  ;;  %381 = vmatpush3.bf16.msra.mxu1 %v399_v13 }
  0x3d   :  { %340 = vmatprep.subr.bf16.mxu0 %v400_v14  ;;  %374 = vmatprep.subr.bf16.mxu1 %v400_v14 }
  0x40   :  { %341 = vmatpush3.bf16.msra.mxu0 %v401_v15  ;;  %382 = vmatpush3.bf16.msra.mxu1 %v401_v15 }
  0x41   :  { %342 = vmatprep.subr.bf16.mxu0 %v402_v16  ;;  %375 = vmatprep.subr.bf16.mxu1 %v402_v16 }
  0x44   :  { %343 = vmatpush3.bf16.msra.mxu0 %v403_v17  ;;  %383 = vmatpush3.bf16.msra.mxu1 %v403_v17 }
  0x47   :  { %257 = vmatmul.mubr.bf16.vlgmr.msra.gmra.mrb[0].mxu0 %v404_v18  ;;  %273 = vmatmul.mubr.bf16.vlgmr.msra.gmra.mrb[0].mxu1 %v407_v19 }
  0x48   :  { %264 = vmatprep.mubr.bf16.mxu0 %v410_v20  ;;  %280 = vmatprep.mubr.bf16.mxu1 %v412_v21 }
  0x4f   :  { %265 = vmatmul.mubr.bf16.gmra.mrb[4].mxu0 %v414_v22  ;;  %281 = vmatmul.mubr.bf16.gmra.mrb[4].mxu1 %v415_v23 }
 0x11a   :  { %v344_v24 = vpop.f32.mrb[0].mxu0  ;;  %v356_v25 = vpop.f32.mrb[0].mxu1 }
 0x11b   :  { %v345_v27 = vpop.f32.mrb[1].mxu0  ;;  %v357_v28 = vpop.f32.mrb[1].mxu1 }
 0x11c   :  { %v346_v29 = vadd.f32 %v345_v27, %v344_v24  ;;  %v358_v30 = vadd.f32 %v357_v28, %v356_v25  ;;  %v347_v31 = vpop.f32.mrb[2].mxu0  ;;  %v359_v32 = vpop.f32.mrb[2].mxu1 }
 0x11d   :  { %v348_v33 = vpop.f32.mrb[3].mxu0  ;;  %v360_v34 = vpop.f32.mrb[3].mxu1 }
 0x11e   :  { %v259_v35 = vadd.f32 %v346_v29, %v303_v26  ;;  %v275_v36 = vadd.f32 %v358_v30, %v303_v26  ;;  %v349_v37 = vadd.f32 %v348_v33, %v347_v31  ;;  %v361_v38 = vadd.f32 %v360_v34, %v359_v32 }
 0x120   :  { %289 = vst [vmem:[%s563_s3] sm:$0xff] %v259_v35  ;;  %293 = vst [vmem:[%s563_s3 + $0x20] sm:$0xff] %v275_v36  ;;  %v262_v39 = vadd.f32 %v349_v37, %v303_v26  ;;  %v278_v40 = vadd.f32 %v361_v38, %v303_v26 }
 0x122   :  { %290 = vst [vmem:[%s563_s3 + $0x8] sm:$0xff] %v262_v39  ;;  %294 = vst [vmem:[%s563_s3 + $0x28] sm:$0xff] %v278_v40  ;;  %v350_v41 = vpop.f32.mrb[4].mxu0  ;;  %v362_v42 = vpop.f32.mrb[4].mxu1 }
 0x123   :  { %v351_v43 = vpop.f32.mrb[5].mxu0  ;;  %v363_v44 = vpop.f32.mrb[5].mxu1 }
 0x124   :  { %v352_v45 = vadd.f32 %v351_v43, %v350_v41  ;;  %v364_v46 = vadd.f32 %v363_v44, %v362_v42  ;;  %v353_v47 = vpop.f32.mrb[6].mxu0  ;;  %v365_v48 = vpop.f32.mrb[6].mxu1 }
 0x125   :  { %v354_v49 = vpop.f32.mrb[7].mxu0  ;;  %v366_v50 = vpop.f32.mrb[7].mxu1 }
 0x126   :  { %v267_v51 = vadd.f32 %v352_v45, %v303_v26  ;;  %v283_v52 = vadd.f32 %v364_v46, %v303_v26  ;;  %v355_v53 = vadd.f32 %v354_v49, %v353_v47  ;;  %v367_v54 = vadd.f32 %v366_v50, %v365_v48 }
 0x128   :  { %291 = vst [vmem:[%s563_s3 + $0x10] sm:$0xff] %v267_v51  ;;  %295 = vst [vmem:[%s563_s3 + $0x30] sm:$0xff] %v283_v52  ;;  %v270_v55 = vadd.f32 %v355_v53, %v303_v26  ;;  %v286_v56 = vadd.f32 %v367_v54, %v303_v26 }
 0x12a   :  { %292 = vst [vmem:[%s563_s3 + $0x18] sm:$0xff] %v270_v55  ;;  %296 = vst [vmem:[%s563_s3 + $0x38] sm:$0xff] %v286_v56 }
 0x12b   :  { %301 = vsyncpa [#allocation3], 1 }
 0x12c   :  { %302 = vsyncpa [#allocation5], 1 }

// kernel: generator_forward.10
= control target key start
LH: loop header
LB: loop body
LE: loop exit
PB: predicated region body
PF: predicated region fallthrough
CT: control target
= control target key end

     0   :  { %s1003_s12 = smov 0   ;;  %s1005_s13 = smov 0   ;;  %s1203_s0 = inlined_call_operand.vmem [shape: f32[16,256], index: 0, kind: input, shape index: {}]   ;;  %s1204_s1 = inlined_call_operand.vmem [shape: f32[256,32], index: 1, kind: input, shape index: {}]   ;;  %s1205_s2 = inlined_call_operand.vmem [shape: f32[32,256], index: 2, kind: input, shape index: {}]   ;;  %s1206_s3 = inlined_call_operand.vmem [shape: f32[16,256], index: 3, kind: output, shape index: {}]  }
   0x1   :  { %s1007_s14 = smov 0  }
   0x2 LB: > { %s25_s15 = sadd.s32 1, %s974_s13  ;;  %p766_p0 = scmp.ge.s32.totalorder %s978_s14, 1  ;;  %s978_s14 = sphi %s1007_s14, %s13_s14   ;;  %s974_s13 = sphi %s1005_s13, %s1208_s13   ;;  %s970_s12 = sphi %s1003_s12, %s1207_s12  }
   0x3   : > { %p27_p1 = scmp.ge.s32.totalorder %s25_s15, 2  ;;  %p151_p2 = scmp.lt.s32.totalorder %s978_s14, 3 }
   0x5   : > { %s1210_s15 = smov (%p27_p1, %s25_s15), 0  ;;  %p152_p3 = pnand %p766_p0, %p151_p2 }
   0x6   : > { %p191_p4 = scmp.eq.s32.totalorder (!%p152_p3), %s970_s12, 0 }
   0x7   : > { %155 = sbr.rel (%p152_p3) target bundleno = 542 (0x21e), region = 32 }
   0xe   : > { %196 = sbr.rel (!%p191_p4) target bundleno = 21 (0x15), region = 36  ;;  %v197_v0 = vlaneseq (%p191_p4)  ;;  %v980_v1 = vmov (%p191_p4), 0.0  }
  0x10   : > { %vm199_vm0 = vcmp.lt.s32.totalorder (%p191_p4), %v197_v0, 256 }
  0x11   : > { %201 = vst.msk [vmem:[#allocation2] sm:$0x3] (%p191_p4), %vm199_vm0, %v980_v1  ;;  %202 = vst.msk [vmem:[#allocation3] sm:$0x3] (%p191_p4), %vm199_vm0, %v980_v1 }
  0x15 PF: > { %p768_p5 = scmp.ne.s32.totalorder %s970_s12, 0 }
  0x16   : > { %v206_v2 = vld [vmem:[%s1203_s0] sm:$0xff] (!%p768_p5)  ;;  %v207_v3 = vld [vmem:[%s1203_s0 + $0x8] sm:$0xff] (!%p768_p5)  ;;  %v208_v4 = vld [vmem:[%s1203_s0 + $0x10] sm:$0xff] (!%p768_p5)  ;;  %v981_v18 = vmov (!%p768_p5), 1966171168   ;;  %v231_v20 = vlaneseq (!%p768_p5) }
  0x17   : > { %205 = sbr.rel (%p768_p5) target bundleno = 49 (0x31), region = 40  ;;  %v209_v5 = vld [vmem:[%s1203_s0 + $0x18] sm:$0xff] (!%p768_p5)  ;;  %v211_v6 = vadd.f32 (!%p768_p5), %v208_v4, %v206_v2  ;;  %v250_v7 = vmul.f32 (!%p768_p5), %v206_v2, %v206_v2  ;;  %v251_v8 = vmul.f32 (!%p768_p5), %v207_v3, %v207_v3  ;;  %v252_v10 = vmul.f32 (!%p768_p5), %v208_v4, %v208_v4 }
  0x18   : > { %v218_v9 = vadd.f32 (!%p768_p5), %v209_v5, %v207_v3  ;;  %v253_v12 = vmul.f32 (!%p768_p5), %v209_v5, %v209_v5  ;;  %v229_v19 = vunpack.c.l.s4 (!%p768_p5), %v981_v18  ;;  %v232_v30 = vshrl.u32 (!%p768_p5), %v231_v20, 7  ;;  %v210_v46 = vld [vmem:[#allocation2] sm:$0x3] (!%p768_p5)  ;;  %v249_v51 = vld [vmem:[#allocation3] sm:$0x3] (!%p768_p5) }
  0x19   : > { %v212_v11 = vrot.slane (!%p768_p5), %v211_v6, 4  ;;  %v254_v14 = vadd.f32 (!%p768_p5), %v252_v10, %v250_v7  ;;  %vm246_vm1 = vcmp.lt.s32.totalorder (!%p768_p5), %v231_v20, 256 }
  0x1a   : > { %v219_v13 = vrot.slane (!%p768_p5), %v218_v9, 4  ;;  %v261_v16 = vadd.f32 (!%p768_p5), %v253_v12, %v251_v8  ;;  %v230_v29 = vunpack.c.0.s8 (!%p768_p5), %v229_v19 }
  0x1b   : > { %v213_v15 = vadd.f32 (!%p768_p5), %v212_v11, %v211_v6  ;;  %v255_v21 = vrot.slane (!%p768_p5), %v254_v14, 4 }
  0x1c   : > { %v220_v17 = vadd.f32 (!%p768_p5), %v219_v13, %v218_v9  ;;  %v262_v23 = vrot.slane (!%p768_p5), %v261_v16, 4  ;;  %v233_v39 = vsub.s32 (!%p768_p5), %v230_v29, %v232_v30 }
  0x1d   : > { %v214_v22 = vrot.slane (!%p768_p5), %v213_v15, 2  ;;  %v256_v25 = vadd.f32 (!%p768_p5), %v255_v21, %v254_v14 }
  0x1e   : > { %v221_v24 = vrot.slane %v220_v17, 2  ;;  %v263_v27 = vadd.f32 %v262_v23, %v261_v16 }
  0x1f   : > { %v215_v26 = vadd.f32 %v214_v22, %v213_v15  ;;  %v257_v31 = vrot.slane %v256_v25, 2 }
  0x20   : > { %v222_v28 = vadd.f32 %v221_v24, %v220_v17  ;;  %v264_v33 = vrot.slane %v263_v27, 2 }
  0x21   : > { %v216_v32 = vrot.slane %v215_v26, 1  ;;  %v258_v35 = vadd.f32 %v257_v31, %v256_v25 }
  0x22   : > { %v223_v34 = vrot.slane %v222_v28, 1  ;;  %v265_v37 = vadd.f32 %v264_v33, %v263_v27 }
  0x23   : > { %v217_v36 = vadd.f32 %v216_v32, %v215_v26  ;;  %v259_v40 = vrot.slane %v258_v35, 1 }
  0x24   : > { %v224_v38 = vadd.f32 %v223_v34, %v222_v28  ;;  %v266_v41 = vrot.slane %v265_v37, 1 }
  0x25   : > { %v260_v43 = vadd.f32 %v259_v40, %v258_v35 }
  0x26   : > { %v227_v42 = vcombine.low %v217_v36, %v224_v38  ;;  %v267_v44 = vadd.f32 %v266_v41, %v265_v37 }
  0x28   : > { %v234_v45 = vrot.slane %v227_v42, %v233_v39  ;;  %v270_v47 = vcombine.low %v260_v43, %v267_v44 }
  0x2a   : > { %v241_v48 = vrot.slane %v234_v45, %v233_v39  ;;  %v277_v49 = vrot.slane %v270_v47, %v233_v39 }
  0x2c   : > { %v243_v50 = vadd.f32 %v241_v48, %v210_v46  ;;  %v284_v52 = vrot.slane %v277_v49, %v233_v39 }
  0x2e   : > { %248 = vst.msk [vmem:[#allocation2] sm:$0x3] %vm246_vm1, %v243_v50  ;;  %v286_v53 = vadd.f32 %v284_v52, %v249_v51 }
  0x30   : > { %287 = vst.msk [vmem:[#allocation3] sm:$0x3] %vm246_vm1, %v286_v53 }
  0x31 PF: > { %p769_p6 = scmp.ne.s32.totalorder %s970_s12, 1 }
  0x32   : > { %v313_v54 = vld [vmem:[%s1204_s1 + $0x80] sm:$0xff] (!%p769_p6)  ;;  %v314_v55 = vld [vmem:[%s1204_s1 + $0x88] sm:$0xff] (!%p769_p6)  ;;  %v330_v57 = vlaneseq (!%p769_p6)  ;;  %v315_v60 = vld [vmem:[%s1204_s1 + $0x90] sm:$0xff] (!%p769_p6)  ;;  %vm506_vm2 = vcmask (!%p769_p6), 261120  }
  0x33   : > { %291 = sbr.rel (%p769_p6) target bundleno = 542 (0x21e), region = 44  ;;  %v297_v56 = vld [vmem:[%s1204_s1] sm:$0xff] (!%p769_p6)  ;;  %v847_v58 = vpack.c.bf16 (!%p769_p6), %v314_v55, %v313_v54  ;;  %v298_v59 = vld [vmem:[%s1204_s1 + $0x8] sm:$0xff] (!%p769_p6)  ;;  %v316_v61 = vld [vmem:[%s1204_s1 + $0x98] sm:$0xff] (!%p769_p6)  ;;  %v982_v55 = vmov (!%p769_p6), 0.0  }
  0x34   : > { %v849_v62 = vpack.c.bf16 (!%p769_p6), %v298_v59, %v297_v56  ;;  %v851_v63 = vpack.c.bf16 (!%p769_p6), %v316_v61, %v315_v60  ;;  %v299_v0 = vld [vmem:[%s1204_s1 + $0x10] sm:$0xff] (!%p769_p6)  ;;  %v300_v1 = vld [vmem:[%s1204_s1 + $0x18] sm:$0xff] (!%p769_p6)  ;;  %v317_v2 = vld [vmem:[%s1204_s1 + $0xa0] sm:$0xff] (!%p769_p6)  ;;  %v1068_v4 = vshrl.u32 (!%p769_p6), %v330_v57, 7 }
  0x35   : > { %848 = vmatprep.subr.bf16.mxu0 (!%p769_p6), %v847_v58  ;;  %880 = vmatprep.subr.bf16.mxu1 (!%p769_p6), %v847_v58  ;;  %v318_v3 = vld [vmem:[%s1204_s1 + $0xa8] sm:$0xff] (!%p769_p6)  ;;  %v853_v5 = vpack.c.bf16 (!%p769_p6), %v300_v1, %v299_v0  ;;  %v301_v7 = vld [vmem:[%s1204_s1 + $0x20] sm:$0xff] (!%p769_p6)  ;;  %v319_v9 = vld [vmem:[%s1204_s1 + $0xb0] sm:$0xff] (!%p769_p6) }
  0x36   : > { %850 = vmatpush3.bf16.msra.mxu0 (!%p769_p6), %v849_v62  ;;  %882 = vmatpush3.bf16.msra.mxu1 (!%p769_p6), %v849_v62  ;;  %v855_v6 = vpack.c.bf16 (!%p769_p6), %v318_v3, %v317_v2  ;;  %v302_v8 = vld [vmem:[%s1204_s1 + $0x28] sm:$0xff] (!%p769_p6)  ;;  %v320_v10 = vld [vmem:[%s1204_s1 + $0xb8] sm:$0xff] (!%p769_p6)  ;;  %v336_v11 = vsub.s32 (!%p769_p6), 1, %v1068_v4  ;;  %v303_v14 = vld [vmem:[%s1204_s1 + $0x30] sm:$0xff] (!%p769_p6)  ;;  %v1138_v44 = vsub.s32 (!%p769_p6), 0, %v1068_v4 }
  0x37   : > { %852 = vmatprep.subr.bf16.mxu0 (!%p769_p6), %v851_v63  ;;  %884 = vmatprep.subr.bf16.mxu1 (!%p769_p6), %v851_v63  ;;  %v857_v12 = vpack.c.bf16 (!%p769_p6), %v302_v8, %v301_v7  ;;  %v859_v13 = vpack.c.bf16 (!%p769_p6), %v320_v10, %v319_v9  ;;  %v304_v15 = vld [vmem:[%s1204_s1 + $0x38] sm:$0xff] (!%p769_p6)  ;;  %v321_v16 = vld [vmem:[%s1204_s1 + $0xc0] sm:$0xff] (!%p769_p6)  ;;  %v322_v17 = vld [vmem:[%s1204_s1 + $0xc8] sm:$0xff] (!%p769_p6) }
  0x38   : > { %v296_v18 = vld [vmem:[#allocation2] sm:$0x3] (!%p769_p6)  ;;  %v410_v20 = vld [vmem:[#allocation3] sm:$0x3] (!%p769_p6)  ;;  %v861_v21 = vpack.c.bf16 (!%p769_p6), %v304_v15, %v303_v14  ;;  %v863_v23 = vpack.c.bf16 (!%p769_p6), %v322_v17, %v321_v16  ;;  %v306_v25 = vld [vmem:[%s1204_s1 + $0x48] sm:$0xff] (!%p769_p6) }
  0x39   : > { %v337_v19 = vrot.slane (!%p769_p6), %v296_v18, %v336_v11  ;;  %v419_v22 = vrot.slane (!%p769_p6), %v410_v20, %v336_v11  ;;  %v305_v24 = vld [vmem:[%s1204_s1 + $0x40] sm:$0xff] (!%p769_p6)  ;;  %v323_v26 = vld [vmem:[%s1204_s1 + $0xd0] sm:$0xff] (!%p769_p6)  ;;  %v324_v27 = vld [vmem:[%s1204_s1 + $0xd8] sm:$0xff] (!%p769_p6)  ;;  %v333_v46 = vrot.slane (!%p769_p6), %v296_v18, %v1138_v44  ;;  %v415_v47 = vrot.slane (!%p769_p6), %v410_v20, %v1138_v44 }
  0x3a   : > { %854 = vmatpush3.bf16.msra.mxu0 %v853_v5  ;;  %886 = vmatpush3.bf16.msra.mxu1 %v853_v5  ;;  %v865_v28 = vpack.c.bf16 %v306_v25, %v305_v24  ;;  %v867_v29 = vpack.c.bf16 %v324_v27, %v323_v26  ;;  %v307_v30 = vld [vmem:[%s1204_s1 + $0x50] sm:$0xff]  ;;  %v308_v31 = vld [vmem:[%s1204_s1 + $0x58] sm:$0xff]  ;;  %v325_v32 = vld [vmem:[%s1204_s1 + $0xe0] sm:$0xff] }
  0x3b   : > { %856 = vmatprep.subr.bf16.mxu0 %v855_v6  ;;  %888 = vmatprep.subr.bf16.mxu1 %v855_v6  ;;  %v326_v33 = vld [vmem:[%s1204_s1 + $0xe8] sm:$0xff]  ;;  %v869_v34 = vpack.c.bf16 %v308_v31, %v307_v30  ;;  %v309_v36 = vld [vmem:[%s1204_s1 + $0x60] sm:$0xff]  ;;  %v327_v38 = vld [vmem:[%s1204_s1 + $0xf0] sm:$0xff] }
  0x3c   : > { %404 = vmatprep.mubr.f32.mxu0 %v337_v19  ;;  %486 = vmatprep.mubr.f32.mxu1 %v419_v22  ;;  %v871_v35 = vpack.c.bf16 %v326_v33, %v325_v32  ;;  %v310_v37 = vld [vmem:[%s1204_s1 + $0x68] sm:$0xff]  ;;  %v328_v39 = vld [vmem:[%s1204_s1 + $0xf8] sm:$0xff]  ;;  %v311_v42 = vld [vmem:[%s1204_s1 + $0x70] sm:$0xff] }
  0x3d   : > { %v873_v40 = vpack.c.bf16 %v310_v37, %v309_v36  ;;  %v875_v41 = vpack.c.bf16 %v328_v39, %v327_v38  ;;  %v312_v43 = vld [vmem:[%s1204_s1 + $0x78] sm:$0xff]  ;;  %v499_v48 = vld [vmem:[%s1205_s2 + $0x8] sm:$0xff]  ;;  %v498_v50 = vld [vmem:[%s1205_s2] sm:$0xff] }
  0x3e   : > { %858 = vmatpush3.bf16.msra.mxu0 %v857_v12  ;;  %890 = vmatpush3.bf16.msra.mxu1 %v857_v12  ;;  %v877_v45 = vpack.c.bf16 %v312_v43, %v311_v42  ;;  %v501_v49 = vld [vmem:[%s1205_s2 + $0x18] sm:$0xff]  ;;  %v500_v52 = vld [vmem:[%s1205_s2 + $0x10] sm:$0xff]  ;;  %v503_v53 = vld [vmem:[%s1205_s2 + $0x28] sm:$0xff] }
  0x3f   : > { %860 = vmatprep.subr.bf16.mxu0 %v859_v13  ;;  %892 = vmatprep.subr.bf16.mxu1 %v859_v13  ;;  %v911_v51 = vpack.c.bf16 %v501_v49, %v499_v48  ;;  %v505_v54 = vld [vmem:[%s1205_s2 + $0x38] sm:$0xff]  ;;  %v913_v56 = vpack.c.bf16 %v500_v52, %v498_v50  ;;  %v502_v58 = vld [vmem:[%s1205_s2 + $0x20] sm:$0xff]  ;;  %v504_v59 = vld [vmem:[%s1205_s2 + $0x30] sm:$0xff] }
  0x40   : > { %v915_v57 = vpack.c.bf16 %v505_v54, %v503_v53  ;;  %v917_v60 = vpack.c.bf16 %v504_v59, %v502_v58  ;;  %v292_v10 = vld [vmem:[%s1203_s0] sm:$0xff]  ;;  %v294_v11 = vld [vmem:[%s1203_s0 + $0x10] sm:$0xff]  ;;  %v293_v14 = vld [vmem:[%s1203_s0 + $0x8] sm:$0xff] }
  0x41   : > { %v295_v15 = vld [vmem:[%s1203_s0 + $0x18] sm:$0xff] }
  0x42   : > { %862 = vmatpush3.bf16.msra.mxu0 %v861_v21  ;;  %894 = vmatpush3.bf16.msra.mxu1 %v861_v21 }
  0x43   : > { %864 = vmatprep.subr.bf16.mxu0 %v863_v23  ;;  %896 = vmatprep.subr.bf16.mxu1 %v863_v23 }
  0x46   : > { %866 = vmatpush3.bf16.msra.mxu0 %v865_v28  ;;  %898 = vmatpush3.bf16.msra.mxu1 %v865_v28 }
  0x47   : > { %868 = vmatprep.subr.bf16.mxu0 %v867_v29  ;;  %900 = vmatprep.subr.bf16.mxu1 %v867_v29 }
  0x4a   : > { %870 = vmatpush3.bf16.msra.mxu0 %v869_v34  ;;  %902 = vmatpush3.bf16.msra.mxu1 %v869_v34 }
  0x4b   : > { %872 = vmatprep.subr.bf16.mxu0 %v871_v35  ;;  %904 = vmatprep.subr.bf16.mxu1 %v871_v35 }
  0x4e   : > { %874 = vmatpush3.bf16.msra.mxu0 %v873_v40  ;;  %906 = vmatpush3.bf16.msra.mxu1 %v873_v40 }
  0x4f   : > { %876 = vmatprep.subr.bf16.mxu0 %v875_v41  ;;  %908 = vmatprep.subr.bf16.mxu1 %v875_v41 }
  0x52   : > { %878 = vmatpush3.bf16.msra.mxu0 %v877_v45  ;;  %910 = vmatpush3.bf16.msra.mxu1 %v877_v45 }
  0x53   : > { %912 = vmatprep.subr.bf16.mxu0 %v911_v51  ;;  %920 = vmatprep.subr.bf16.mxu1 %v911_v51 }
  0x55   : > { %405 = vmatmul.mubr.f32.vlgmr.msra.gmra.mrb[0].mxu0 %v333_v46  ;;  %487 = vmatmul.mubr.f32.vlgmr.msra.gmra.mrb[0].mxu1 %v415_v47 }
  0x56   : > { %574 = vmatprep.mubr.f32.mxu0 %v982_v55  ;;  %649 = vmatprep.mubr.f32.mxu1 %v982_v55 }
  0x57   : > { %914 = vmatpush1.bf16.msra.mxu0 %v913_v56  ;;  %922 = vmatpush1.bf16.msra.mxu1 %v913_v56 }
  0x58   : > { %916 = vmatprep.subr.bf16.mxu0 %v915_v57  ;;  %924 = vmatprep.subr.bf16.mxu1 %v915_v57 }
  0x5b   : > { %918 = vmatpush1.bf16.msra.mxu0 %v917_v60  ;;  %926 = vmatpush1.bf16.msra.mxu1 %v917_v60 }
 0x128   : > { %v809_v61 = vpop.f32.mrb[0].mxu0  ;;  %v844_v62 = vpop.f32.mrb[0].mxu1 }
 0x129   : > { %v810_v63 = vpop.f32.mrb[1].mxu0  ;;  %v845_v0 = vpop.f32.mrb[1].mxu1 }
 0x12a   : > { %v811_v1 = vadd.f32 %v810_v63, %v809_v61  ;;  %v846_v2 = vadd.f32 %v845_v0, %v844_v62 }
 0x12c   : > { %v492_v3 = vmul.f32 0.0078125, %v811_v1  ;;  %v493_v4 = vmul.f32 0.0078125, %v846_v2 }
 0x12e   : > { %v494_v5 = vmul.f32 %v492_v3, %v492_v3 }
 0x130   : > { %v495_v6 = vsub.f32 %v493_v4, %v494_v5 }
 0x132   : > { %v496_v7 = vadd.f32 1e-05, %v495_v6 }
 0x134   : > { %954 = vrsqrt.f32 %v496_v7 }
 0x13e   : > { %v955_v8 = vpop.eup %954 }
 0x13f   : > { %770 = vmatmul.mubr.msk.f32.vlgmr.msra.gmra.mrb[2].mxu0 %vm506_vm2, %v955_v8  ;;  %v581_v9 = vmul.f32 %v955_v8, %v492_v3 }
 0x141   : > { %771 = vmatmul.mubr.msk.f32.vlgmr.msra.gmra.mrb[2].mxu1 %vm506_vm2, %v581_v9 }
 0x212   : > { %v576_v12 = vpop.f32.mrb[2].mxu0 }
 0x213   : > { %v659_v13 = vrot.slane %v576_v12, %v1138_v44  ;;  %v578_v16 = vpop.f32.mrb[3].mxu0 }
 0x214   : > { %v663_v17 = vrot.slane %v578_v16, %v1138_v44  ;;  %v651_v18 = vpop.f32.mrb[2].mxu1 }
 0x215   : > { %v664_v19 = vmul.f32 %v659_v13, %v292_v10  ;;  %v666_v20 = vmul.f32 %v659_v13, %v294_v11  ;;  %v671_v21 = vrot.slane %v651_v18, %v1138_v44  ;;  %v653_v22 = vpop.f32.mrb[3].mxu1 }
 0x216   : > { %v665_v23 = vmul.f32 %v663_v17, %v293_v14  ;;  %v667_v24 = vmul.f32 %v663_v17, %v295_v15  ;;  %v675_v25 = vrot.slane %v653_v22, %v1138_v44 }
 0x217   : > { %v676_v26 = vsub.f32 %v664_v19, %v671_v21  ;;  %v678_v27 = vsub.f32 %v666_v20, %v671_v21 }
 0x218   : > { %v677_v28 = vsub.f32 %v665_v23, %v675_v25  ;;  %v679_v29 = vsub.f32 %v667_v24, %v675_v25 }
 0x219   : > { %vm680_vm3 = vcmp.gt.f32.partialorder %v676_v26, 0.0  ;;  %vm682_vm4 = vcmp.gt.f32.partialorder %v678_v27, 0.0  ;;  %v684_v30 = vmul.f32 0.2, %v676_v26  ;;  %v686_v31 = vmul.f32 0.2, %v678_v27 }
 0x21a   : > { %vm681_vm5 = vcmp.gt.f32.partialorder %v677_v28, 0.0  ;;  %vm683_vm6 = vcmp.gt.f32.partialorder %v679_v29, 0.0  ;;  %v685_v32 = vmul.f32 0.2, %v677_v28  ;;  %v687_v33 = vmul.f32 0.2, %v679_v29 }
 0x21b   : > { %v688_v34 = vsel %vm680_vm3, %v676_v26, %v684_v30  ;;  %v690_v35 = vsel %vm682_vm4, %v678_v27, %v686_v31 }
 0x21c   : > { %692 = vst [vmem:[%s1206_s3] sm:$0xff] %v688_v34  ;;  %694 = vst [vmem:[%s1206_s3 + $0x10] sm:$0xff] %v690_v35  ;;  %v689_v36 = vsel %vm681_vm5, %v677_v28, %v685_v32  ;;  %v691_v37 = vsel %vm683_vm6, %v679_v29, %v687_v33 }
 0x21d   : > { %693 = vst [vmem:[%s1206_s3 + $0x8] sm:$0xff] %v689_v36  ;;  %695 = vst [vmem:[%s1206_s3 + $0x18] sm:$0xff] %v691_v37 }
 0x21e PF: > { %s13_s14 = sadd.s32 1, %s978_s14   ;;  %s1207_s12 = smov %s974_s13 }
 0x21f   : > { %p10_p7 = scmp.ge.s32.totalorder %s13_s14, 4   ;;  %s1208_s13 = smov %s1210_s15 }
 0x221   :  { %12 = sbr.rel (!%p10_p7) target bundleno = 2 (0x2), region = 74 }

// kernel: generator_forward.11
= control target key start
LH: loop header
LB: loop body
LE: loop exit
PB: predicated region body
PF: predicated region fallthrough
CT: control target
= control target key end

     0   :  { %vm311_vm0 = vcmask 523264   ;;  %s662_s1 = inlined_call_operand.vmem [shape: bf16[128,64], index: 1, kind: input, shape index: {}]   ;;  %s663_s0 = inlined_call_operand.vmem [shape: bf16[192,128], index: 0, kind: input, shape index: {}]   ;;  %s664_s2 = inlined_call_operand.vmem [shape: f32[1,64], index: 2, kind: input, shape index: {}]   ;;  %s665_s3 = inlined_call_operand.vmem [shape: f32[192,64], index: 3, kind: output, shape index: {}]  }
   0x1   :  { %v437_v0 = vld [vmem:[%s662_s1] sm:$0xff]   ;;  %v438_v1 = vld [vmem:[%s662_s1 + $0x8] sm:$0xff]   ;;  %v439_v2 = vld [vmem:[%s662_s1 + $0x10] sm:$0xff]  }
   0x2   :  { %381 = vmatprep.subr.bf16.mxu0 %v437_v0  ;;  %421 = vmatprep.subr.bf16.mxu1 %v437_v0  ;;  %v440_v3 = vld [vmem:[%s662_s1 + $0x18] sm:$0xff]   ;;  %v445_v4 = vld [vmem:[%s663_s0] sm:$0xff]   ;;  %v446_v5 = vld [vmem:[%s663_s0 + $0x30] sm:$0xff]  }
   0x3   :  { %382 = vmatpush3.bf16.msra.mxu0 %v437_v0  ;;  %429 = vmatpush3.bf16.msra.mxu1 %v437_v0  ;;  %v441_v6 = vld [vmem:[%s662_s1 + $0x20] sm:$0xff]   ;;  %v442_v7 = vld [vmem:[%s662_s1 + $0x28] sm:$0xff]   ;;  %v443_v8 = vld [vmem:[%s662_s1 + $0x30] sm:$0xff]  }
   0x4   :  { %383 = vmatprep.subr.bf16.mxu0 %v438_v1  ;;  %422 = vmatprep.subr.bf16.mxu1 %v438_v1  ;;  %v444_v9 = vld [vmem:[%s662_s1 + $0x38] sm:$0xff]   ;;  %v447_v10 = vld [vmem:[%s663_s0 + $0x8] sm:$0xff]   ;;  %v449_v12 = vld [vmem:[%s663_s0 + $0x10] sm:$0xff]  }
   0x5   :  { %397 = vmatprep.mubr.bf16.mxu0 %v445_v4  ;;  %409 = vmatprep.mubr.bf16.mxu1 %v446_v5  ;;  %v448_v11 = vld [vmem:[%s663_s0 + $0x38] sm:$0xff]   ;;  %v450_v13 = vld [vmem:[%s663_s0 + $0x40] sm:$0xff]   ;;  %v452_v15 = vld [vmem:[%s663_s0 + $0x48] sm:$0xff]  }
   0x6   :  { %v451_v14 = vld [vmem:[%s663_s0 + $0x18] sm:$0xff]   ;;  %v453_v16 = vld [vmem:[%s663_s0 + $0x20] sm:$0xff]   ;;  %v454_v17 = vld [vmem:[%s663_s0 + $0x50] sm:$0xff]  }
   0x7   :  { %384 = vmatpush3.bf16.msra.mxu0 %v438_v1  ;;  %430 = vmatpush3.bf16.msra.mxu1 %v438_v1  ;;  %v455_v18 = vld [vmem:[%s663_s0 + $0x28] sm:$0xff]   ;;  %v456_v19 = vld [vmem:[%s663_s0 + $0x58] sm:$0xff]   ;;  %v540_v20 = vld [vmem:[%s664_s2] ss:$0 sm:$0xff] }
   0x8   :  { %385 = vmatprep.subr.bf16.mxu0 %v439_v2  ;;  %423 = vmatprep.subr.bf16.mxu1 %v439_v2 }
   0xb   :  { %386 = vmatpush3.bf16.msra.mxu0 %v439_v2  ;;  %431 = vmatpush3.bf16.msra.mxu1 %v439_v2 }
   0xc   :  { %387 = vmatprep.subr.bf16.mxu0 %v440_v3  ;;  %424 = vmatprep.subr.bf16.mxu1 %v440_v3 }
   0xf   :  { %388 = vmatpush3.bf16.msra.mxu0 %v440_v3  ;;  %432 = vmatpush3.bf16.msra.mxu1 %v440_v3 }
  0x10   :  { %389 = vmatprep.subr.bf16.mxu0 %v441_v6  ;;  %425 = vmatprep.subr.bf16.mxu1 %v441_v6 }
  0x13   :  { %390 = vmatpush3.bf16.msra.mxu0 %v441_v6  ;;  %433 = vmatpush3.bf16.msra.mxu1 %v441_v6 }
  0x14   :  { %391 = vmatprep.subr.bf16.mxu0 %v442_v7  ;;  %426 = vmatprep.subr.bf16.mxu1 %v442_v7 }
  0x17   :  { %392 = vmatpush3.bf16.msra.mxu0 %v442_v7  ;;  %434 = vmatpush3.bf16.msra.mxu1 %v442_v7 }
  0x18   :  { %393 = vmatprep.subr.bf16.mxu0 %v443_v8  ;;  %427 = vmatprep.subr.bf16.mxu1 %v443_v8 }
  0x1b   :  { %394 = vmatpush3.bf16.msra.mxu0 %v443_v8  ;;  %435 = vmatpush3.bf16.msra.mxu1 %v443_v8 }
  0x1c   :  { %395 = vmatprep.subr.bf16.mxu0 %v444_v9  ;;  %428 = vmatprep.subr.bf16.mxu1 %v444_v9 }
  0x1f   :  { %396 = vmatpush3.bf16.msra.mxu0 %v444_v9  ;;  %436 = vmatpush3.bf16.msra.mxu1 %v444_v9 }
  0x22   :  { %398 = vmatmul.mubr.bf16.vlgmr.msra.gmra.mrb[0].mxu0 %v447_v10  ;;  %410 = vmatmul.mubr.bf16.vlgmr.msra.gmra.mrb[0].mxu1 %v448_v11 }
  0x23   :  { %401 = vmatprep.mubr.bf16.mxu0 %v449_v12  ;;  %413 = vmatprep.mubr.bf16.mxu1 %v450_v13 }
  0x2a   :  { %402 = vmatmul.mubr.bf16.gmra.mrb[4].mxu0 %v451_v14  ;;  %414 = vmatmul.mubr.bf16.gmra.mrb[4].mxu1 %v452_v15 }
  0x2b   :  { %405 = vmatprep.mubr.bf16.mxu0 %v453_v16  ;;  %417 = vmatprep.mubr.bf16.mxu1 %v454_v17 }
  0x32   :  { %406 = vmatmul.mubr.bf16.gmra.mrb[8].mxu0 %v455_v18  ;;  %418 = vmatmul.mubr.bf16.gmra.mrb[8].mxu1 %v456_v19 }
  0xf5   :  { %v399_v21 = vpop.f32.mrb[0].mxu0  ;;  %v411_v22 = vpop.f32.mrb[0].mxu1 }
  0xf6   :  { %v225_v23 = vadd.f32 %v399_v21, %v540_v20  ;;  %v273_v24 = vadd.f32 %v411_v22, %v540_v20  ;;  %v216_v25 = vpop.f32.mrb[1].mxu0  ;;  %v264_v26 = vpop.f32.mrb[1].mxu1 }
  0xf7   :  { %v217_v27 = vadd.f32 %v540_v20, %v216_v25  ;;  %v265_v28 = vadd.f32 %v540_v20, %v264_v26  ;;  %v400_v29 = vpop.f32.mrb[2].mxu0  ;;  %v412_v30 = vpop.f32.mrb[2].mxu1 }
  0xf8   :  { %314 = vst.msk [vmem:[%s665_s3 + $0x10] sm:$0xff] %vm311_vm0, %v225_v23  ;;  %326 = vst.msk [vmem:[%s665_s3 + $0x70] sm:$0xff] %vm311_vm0, %v273_v24  ;;  %v228_v31 = vadd.f32 %v400_v29, %v540_v20  ;;  %v276_v32 = vadd.f32 %v412_v30, %v540_v20  ;;  %v219_v33 = vpop.f32.mrb[3].mxu0  ;;  %v267_v34 = vpop.f32.mrb[3].mxu1 }
  0xf9   :  { %312 = vst.msk [vmem:[%s665_s3] sm:$0xff] %vm311_vm0, %v217_v27  ;;  %324 = vst.msk [vmem:[%s665_s3 + $0x60] sm:$0xff] %vm311_vm0, %v265_v28  ;;  %v220_v35 = vadd.f32 %v540_v20, %v219_v33  ;;  %v268_v36 = vadd.f32 %v540_v20, %v267_v34 }
  0xfa   :  { %315 = vst.msk [vmem:[%s665_s3 + $0x18] sm:$0xff] %vm311_vm0, %v228_v31  ;;  %327 = vst.msk [vmem:[%s665_s3 + $0x78] sm:$0xff] %vm311_vm0, %v276_v32 }
  0xfb   :  { %313 = vst.msk [vmem:[%s665_s3 + $0x8] sm:$0xff] %vm311_vm0, %v220_v35  ;;  %325 = vst.msk [vmem:[%s665_s3 + $0x68] sm:$0xff] %vm311_vm0, %v268_v36 }
  0xfd   :  { %v403_v37 = vpop.f32.mrb[4].mxu0  ;;  %v415_v38 = vpop.f32.mrb[4].mxu1 }
  0xfe   :  { %v241_v39 = vadd.f32 %v403_v37, %v540_v20  ;;  %v289_v40 = vadd.f32 %v415_v38, %v540_v20  ;;  %v232_v41 = vpop.f32.mrb[5].mxu0  ;;  %v280_v42 = vpop.f32.mrb[5].mxu1 }
  0xff   :  { %v233_v43 = vadd.f32 %v540_v20, %v232_v41  ;;  %v281_v44 = vadd.f32 %v540_v20, %v280_v42  ;;  %v404_v45 = vpop.f32.mrb[6].mxu0  ;;  %v416_v46 = vpop.f32.mrb[6].mxu1 }
 0x100   :  { %318 = vst.msk [vmem:[%s665_s3 + $0x30] sm:$0xff] %vm311_vm0, %v241_v39  ;;  %330 = vst.msk [vmem:[%s665_s3 + $0x90] sm:$0xff] %vm311_vm0, %v289_v40  ;;  %v244_v47 = vadd.f32 %v404_v45, %v540_v20  ;;  %v292_v48 = vadd.f32 %v416_v46, %v540_v20  ;;  %v235_v49 = vpop.f32.mrb[7].mxu0  ;;  %v283_v50 = vpop.f32.mrb[7].mxu1 }
 0x101   :  { %316 = vst.msk [vmem:[%s665_s3 + $0x20] sm:$0xff] %vm311_vm0, %v233_v43  ;;  %328 = vst.msk [vmem:[%s665_s3 + $0x80] sm:$0xff] %vm311_vm0, %v281_v44  ;;  %v236_v51 = vadd.f32 %v540_v20, %v235_v49  ;;  %v284_v52 = vadd.f32 %v540_v20, %v283_v50 }
 0x102   :  { %319 = vst.msk [vmem:[%s665_s3 + $0x38] sm:$0xff] %vm311_vm0, %v244_v47  ;;  %331 = vst.msk [vmem:[%s665_s3 + $0x98] sm:$0xff] %vm311_vm0, %v292_v48 }
 0x103   :  { %317 = vst.msk [vmem:[%s665_s3 + $0x28] sm:$0xff] %vm311_vm0, %v236_v51  ;;  %329 = vst.msk [vmem:[%s665_s3 + $0x88] sm:$0xff] %vm311_vm0, %v284_v52 }
 0x105   :  { %v407_v53 = vpop.f32.mrb[8].mxu0  ;;  %v419_v54 = vpop.f32.mrb[8].mxu1 }
 0x106   :  { %v257_v55 = vadd.f32 %v407_v53, %v540_v20  ;;  %v305_v56 = vadd.f32 %v419_v54, %v540_v20  ;;  %v248_v57 = vpop.f32.mrb[9].mxu0  ;;  %v296_v58 = vpop.f32.mrb[9].mxu1 }
 0x107   :  { %v249_v59 = vadd.f32 %v540_v20, %v248_v57  ;;  %v297_v60 = vadd.f32 %v540_v20, %v296_v58  ;;  %v408_v61 = vpop.f32.mrb[10].mxu0  ;;  %v420_v62 = vpop.f32.mrb[10].mxu1 }
 0x108   :  { %322 = vst.msk [vmem:[%s665_s3 + $0x50] sm:$0xff] %vm311_vm0, %v257_v55  ;;  %334 = vst.msk [vmem:[%s665_s3 + $0xb0] sm:$0xff] %vm311_vm0, %v305_v56  ;;  %v260_v63 = vadd.f32 %v408_v61, %v540_v20  ;;  %v308_v0 = vadd.f32 %v420_v62, %v540_v20  ;;  %v251_v1 = vpop.f32.mrb[11].mxu0  ;;  %v299_v2 = vpop.f32.mrb[11].mxu1 }
 0x109   :  { %320 = vst.msk [vmem:[%s665_s3 + $0x40] sm:$0xff] %vm311_vm0, %v249_v59  ;;  %332 = vst.msk [vmem:[%s665_s3 + $0xa0] sm:$0xff] %vm311_vm0, %v297_v60  ;;  %v252_v3 = vadd.f32 %v540_v20, %v251_v1  ;;  %v300_v4 = vadd.f32 %v540_v20, %v299_v2 }
 0x10a   :  { %323 = vst.msk [vmem:[%s665_s3 + $0x58] sm:$0xff] %vm311_vm0, %v260_v63  ;;  %335 = vst.msk [vmem:[%s665_s3 + $0xb8] sm:$0xff] %vm311_vm0, %v308_v0 }
 0x10b   :  { %321 = vst.msk [vmem:[%s665_s3 + $0x48] sm:$0xff] %vm311_vm0, %v252_v3  ;;  %333 = vst.msk [vmem:[%s665_s3 + $0xa8] sm:$0xff] %vm311_vm0, %v300_v4 }

// kernel: generator_forward.12
= control target key start
LH: loop header
LB: loop body
LE: loop exit
PB: predicated region body
PF: predicated region fallthrough
CT: control target
= control target key end

     0   :  { %s1035_s12 = smov 0   ;;  %s1037_s13 = smov 0   ;;  %s1262_s0 = inlined_call_operand.vmem [shape: f32[32,256], index: 0, kind: input, shape index: {}]   ;;  %s1263_s1 = inlined_call_operand.vmem [shape: f32[256,16], index: 1, kind: input, shape index: {}]   ;;  %s1264_s2 = inlined_call_operand.vmem [shape: f32[16,256], index: 2, kind: input, shape index: {}]   ;;  %s1265_s3 = inlined_call_operand.vmem [shape: f32[32,256], index: 3, kind: output, shape index: {}]  }
   0x1   :  { %s1039_s14 = smov 0  }
   0x2 LB: > { %s25_s15 = sadd.s32 1, %s1006_s13  ;;  %p806_p0 = scmp.ge.s32.totalorder %s1010_s14, 1  ;;  %s1010_s14 = sphi %s1039_s14, %s13_s14   ;;  %s1006_s13 = sphi %s1037_s13, %s1267_s13   ;;  %s1002_s12 = sphi %s1035_s12, %s1266_s12  }
   0x3   : > { %p27_p1 = scmp.ge.s32.totalorder %s25_s15, 2  ;;  %p151_p2 = scmp.lt.s32.totalorder %s1010_s14, 3 }
   0x5   : > { %s1269_s15 = smov (%p27_p1, %s25_s15), 0  ;;  %p152_p3 = pnand %p806_p0, %p151_p2 }
   0x6   : > { %p191_p4 = scmp.eq.s32.totalorder (!%p152_p3), %s1002_s12, 0 }
   0x7   : > { %155 = sbr.rel (%p152_p3) target bundleno = 552 (0x228), region = 32 }
   0xe   : > { %196 = sbr.rel (!%p191_p4) target bundleno = 21 (0x15), region = 36  ;;  %v197_v0 = vlaneseq (%p191_p4)  ;;  %v1012_v1 = vmov (%p191_p4), 0.0  }
  0x10   : > { %vm199_vm0 = vcmp.lt.s32.totalorder (%p191_p4), %v197_v0, 256 }
  0x11   : > { %201 = vst.msk [vmem:[#allocation2] sm:$0x3] (%p191_p4), %vm199_vm0, %v1012_v1  ;;  %202 = vst.msk [vmem:[#allocation3] sm:$0x3] (%p191_p4), %vm199_vm0, %v1012_v1 }
  0x15 PF: > { %p808_p5 = scmp.ne.s32.totalorder %s1002_s12, 0 }
  0x16   : > { %v206_v2 = vld [vmem:[%s1262_s0] sm:$0xff] (!%p808_p5)  ;;  %v207_v3 = vld [vmem:[%s1262_s0 + $0x8] sm:$0xff] (!%p808_p5)  ;;  %v208_v4 = vld [vmem:[%s1262_s0 + $0x10] sm:$0xff] (!%p808_p5)  ;;  %v1013_v34 = vmov (!%p808_p5), 1966171168   ;;  %v239_v36 = vlaneseq (!%p808_p5) }
  0x17   : > { %205 = sbr.rel (%p808_p5) target bundleno = 53 (0x35), region = 40  ;;  %v209_v5 = vld [vmem:[%s1262_s0 + $0x18] sm:$0xff] (!%p808_p5)  ;;  %v210_v6 = vld [vmem:[%s1262_s0 + $0x20] sm:$0xff] (!%p808_p5)  ;;  %v211_v7 = vld [vmem:[%s1262_s0 + $0x28] sm:$0xff] (!%p808_p5)  ;;  %v215_v8 = vadd.f32 (!%p808_p5), %v208_v4, %v206_v2  ;;  %v258_v9 = vmul.f32 (!%p808_p5), %v206_v2, %v206_v2  ;;  %v259_v10 = vmul.f32 (!%p808_p5), %v207_v3, %v207_v3  ;;  %v260_v14 = vmul.f32 (!%p808_p5), %v208_v4, %v208_v4 }
  0x18   : > { %v212_v11 = vld [vmem:[%s1262_s0 + $0x30] sm:$0xff] (!%p808_p5)  ;;  %v213_v12 = vld [vmem:[%s1262_s0 + $0x38] sm:$0xff] (!%p808_p5)  ;;  %v224_v13 = vadd.f32 (!%p808_p5), %v209_v5, %v207_v3  ;;  %v261_v16 = vmul.f32 (!%p808_p5), %v209_v5, %v209_v5  ;;  %v262_v17 = vmul.f32 (!%p808_p5), %v210_v6, %v210_v6  ;;  %v263_v19 = vmul.f32 (!%p808_p5), %v211_v7, %v211_v7  ;;  %v214_v62 = vld [vmem:[#allocation2] sm:$0x3] (!%p808_p5) }
  0x19   : > { %v216_v15 = vadd.f32 (!%p808_p5), %v215_v8, %v210_v6  ;;  %v264_v20 = vmul.f32 (!%p808_p5), %v212_v11, %v212_v11  ;;  %v265_v22 = vmul.f32 (!%p808_p5), %v213_v12, %v213_v12  ;;  %v266_v23 = vadd.f32 (!%p808_p5), %v260_v14, %v258_v9  ;;  %v257_v3 = vld [vmem:[#allocation3] sm:$0x3] (!%p808_p5) }
  0x1a   : > { %v225_v18 = vadd.f32 (!%p808_p5), %v224_v13, %v211_v7  ;;  %v275_v24 = vadd.f32 (!%p808_p5), %v261_v16, %v259_v10  ;;  %v237_v35 = vunpack.c.l.s4 (!%p808_p5), %v1013_v34  ;;  %v240_v46 = vshrl.u32 (!%p808_p5), %v239_v36, 7 }
  0x1b   : > { %v217_v21 = vadd.f32 (!%p808_p5), %v216_v15, %v212_v11  ;;  %v267_v27 = vadd.f32 (!%p808_p5), %v266_v23, %v262_v17  ;;  %vm254_vm1 = vcmp.lt.s32.totalorder (!%p808_p5), %v239_v36, 256 }
  0x1c   : > { %v226_v25 = vadd.f32 (!%p808_p5), %v225_v18, %v213_v12  ;;  %v276_v28 = vadd.f32 (!%p808_p5), %v275_v24, %v263_v19  ;;  %v238_v45 = vunpack.c.0.s8 (!%p808_p5), %v237_v35 }
  0x1d   : > { %v218_v26 = vrot.slane (!%p808_p5), %v217_v21, 4  ;;  %v268_v31 = vadd.f32 (!%p808_p5), %v267_v27, %v264_v20 }
  0x1e   : > { %v227_v29 = vrot.slane %v226_v25, 4  ;;  %v277_v32 = vadd.f32 %v276_v28, %v265_v22  ;;  %v241_v55 = vsub.s32 %v238_v45, %v240_v46 }
  0x1f   : > { %v219_v30 = vadd.f32 %v218_v26, %v217_v21  ;;  %v269_v38 = vrot.slane %v268_v31, 4 }
  0x20   : > { %v228_v33 = vadd.f32 %v227_v29, %v226_v25  ;;  %v278_v39 = vrot.slane %v277_v32, 4 }
  0x21   : > { %v220_v37 = vrot.slane %v219_v30, 2  ;;  %v270_v42 = vadd.f32 %v269_v38, %v268_v31 }
  0x22   : > { %v229_v40 = vrot.slane %v228_v33, 2  ;;  %v279_v43 = vadd.f32 %v278_v39, %v277_v32 }
  0x23   : > { %v221_v41 = vadd.f32 %v220_v37, %v219_v30  ;;  %v271_v48 = vrot.slane %v270_v42, 2 }
  0x24   : > { %v230_v44 = vadd.f32 %v229_v40, %v228_v33  ;;  %v280_v49 = vrot.slane %v279_v43, 2 }
  0x25   : > { %v222_v47 = vrot.slane %v221_v41, 1  ;;  %v272_v52 = vadd.f32 %v271_v48, %v270_v42 }
  0x26   : > { %v231_v50 = vrot.slane %v230_v44, 1  ;;  %v281_v53 = vadd.f32 %v280_v49, %v279_v43 }
  0x27   : > { %v223_v51 = vadd.f32 %v222_v47, %v221_v41  ;;  %v273_v56 = vrot.slane %v272_v52, 1 }
  0x28   : > { %v232_v54 = vadd.f32 %v231_v50, %v230_v44  ;;  %v282_v57 = vrot.slane %v281_v53, 1 }
  0x29   : > { %v274_v59 = vadd.f32 %v273_v56, %v272_v52 }
  0x2a   : > { %v235_v58 = vcombine.low %v223_v51, %v232_v54  ;;  %v283_v60 = vadd.f32 %v282_v57, %v281_v53 }
  0x2c   : > { %v242_v61 = vrot.slane %v235_v58, %v241_v55  ;;  %v286_v63 = vcombine.low %v274_v59, %v283_v60 }
  0x2e   : > { %v249_v0 = vrot.slane %v242_v61, %v241_v55  ;;  %v293_v1 = vrot.slane %v286_v63, %v241_v55 }
  0x30   : > { %v251_v2 = vadd.f32 %v249_v0, %v214_v62  ;;  %v300_v4 = vrot.slane %v293_v1, %v241_v55 }
  0x32   : > { %256 = vst.msk [vmem:[#allocation2] sm:$0x3] %vm254_vm1, %v251_v2  ;;  %v302_v5 = vadd.f32 %v300_v4, %v257_v3 }
  0x34   : > { %303 = vst.msk [vmem:[#allocation3] sm:$0x3] %vm254_vm1, %v302_v5 }
  0x35 PF: > { %p809_p6 = scmp.ne.s32.totalorder %s1002_s12, 1 }
  0x36   : > { %v333_v6 = vld [vmem:[%s1263_s1 + $0x80] sm:$0xff] (!%p809_p6)  ;;  %v334_v7 = vld [vmem:[%s1263_s1 + $0x88] sm:$0xff] (!%p809_p6)  ;;  %v350_v9 = vlaneseq (!%p809_p6)  ;;  %v335_v12 = vld [vmem:[%s1263_s1 + $0x90] sm:$0xff] (!%p809_p6)  ;;  %v1014_v5 = vmov (!%p809_p6), 0.0   ;;  %vm522_vm2 = vcmask (!%p809_p6), 130048  }
  0x37   : > { %307 = sbr.rel (%p809_p6) target bundleno = 552 (0x228), region = 44  ;;  %v317_v8 = vld [vmem:[%s1263_s1] sm:$0xff] (!%p809_p6)  ;;  %v887_v10 = vpack.c.bf16 (!%p809_p6), %v334_v7, %v333_v6  ;;  %v318_v11 = vld [vmem:[%s1263_s1 + $0x8] sm:$0xff] (!%p809_p6)  ;;  %v336_v13 = vld [vmem:[%s1263_s1 + $0x98] sm:$0xff] (!%p809_p6) }
  0x38   : > { %v889_v14 = vpack.c.bf16 (!%p809_p6), %v318_v11, %v317_v8  ;;  %v891_v15 = vpack.c.bf16 (!%p809_p6), %v336_v13, %v335_v12  ;;  %v319_v16 = vld [vmem:[%s1263_s1 + $0x10] sm:$0xff] (!%p809_p6)  ;;  %v320_v17 = vld [vmem:[%s1263_s1 + $0x18] sm:$0xff] (!%p809_p6)  ;;  %v337_v18 = vld [vmem:[%s1263_s1 + $0xa0] sm:$0xff] (!%p809_p6)  ;;  %v1112_v20 = vshrl.u32 (!%p809_p6), %v350_v9, 7 }
  0x39   : > { %888 = vmatprep.subr.bf16.mxu0 (!%p809_p6), %v887_v10  ;;  %920 = vmatprep.subr.bf16.mxu1 (!%p809_p6), %v887_v10  ;;  %v338_v19 = vld [vmem:[%s1263_s1 + $0xa8] sm:$0xff] (!%p809_p6)  ;;  %v893_v21 = vpack.c.bf16 (!%p809_p6), %v320_v17, %v319_v16  ;;  %v321_v23 = vld [vmem:[%s1263_s1 + $0x20] sm:$0xff] (!%p809_p6)  ;;  %v339_v25 = vld [vmem:[%s1263_s1 + $0xb0] sm:$0xff] (!%p809_p6) }
  0x3a   : > { %890 = vmatpush3.bf16.msra.mxu0 (!%p809_p6), %v889_v14  ;;  %922 = vmatpush3.bf16.msra.mxu1 (!%p809_p6), %v889_v14  ;;  %v895_v22 = vpack.c.bf16 (!%p809_p6), %v338_v19, %v337_v18  ;;  %v322_v24 = vld [vmem:[%s1263_s1 + $0x28] sm:$0xff] (!%p809_p6)  ;;  %v340_v26 = vld [vmem:[%s1263_s1 + $0xb8] sm:$0xff] (!%p809_p6)  ;;  %v356_v27 = vsub.s32 (!%p809_p6), 1, %v1112_v20  ;;  %v323_v30 = vld [vmem:[%s1263_s1 + $0x30] sm:$0xff] (!%p809_p6)  ;;  %v1182_v60 = vsub.s32 (!%p809_p6), 0, %v1112_v20 }
  0x3b   : > { %892 = vmatprep.subr.bf16.mxu0 (!%p809_p6), %v891_v15  ;;  %924 = vmatprep.subr.bf16.mxu1 (!%p809_p6), %v891_v15  ;;  %v897_v28 = vpack.c.bf16 (!%p809_p6), %v322_v24, %v321_v23  ;;  %v899_v29 = vpack.c.bf16 (!%p809_p6), %v340_v26, %v339_v25  ;;  %v324_v31 = vld [vmem:[%s1263_s1 + $0x38] sm:$0xff] (!%p809_p6)  ;;  %v341_v32 = vld [vmem:[%s1263_s1 + $0xc0] sm:$0xff] (!%p809_p6)  ;;  %v342_v33 = vld [vmem:[%s1263_s1 + $0xc8] sm:$0xff] (!%p809_p6) }
  0x3c   : > { %v316_v34 = vld [vmem:[#allocation2] sm:$0x3] (!%p809_p6)  ;;  %v430_v36 = vld [vmem:[#allocation3] sm:$0x3] (!%p809_p6)  ;;  %v901_v37 = vpack.c.bf16 (!%p809_p6), %v324_v31, %v323_v30  ;;  %v903_v39 = vpack.c.bf16 (!%p809_p6), %v342_v33, %v341_v32  ;;  %v326_v41 = vld [vmem:[%s1263_s1 + $0x48] sm:$0xff] (!%p809_p6) }
  0x3d   : > { %v357_v35 = vrot.slane (!%p809_p6), %v316_v34, %v356_v27  ;;  %v439_v38 = vrot.slane (!%p809_p6), %v430_v36, %v356_v27  ;;  %v325_v40 = vld [vmem:[%s1263_s1 + $0x40] sm:$0xff] (!%p809_p6)  ;;  %v343_v42 = vld [vmem:[%s1263_s1 + $0xd0] sm:$0xff] (!%p809_p6)  ;;  %v344_v43 = vld [vmem:[%s1263_s1 + $0xd8] sm:$0xff] (!%p809_p6)  ;;  %v353_v62 = vrot.slane (!%p809_p6), %v316_v34, %v1182_v60  ;;  %v435_v63 = vrot.slane (!%p809_p6), %v430_v36, %v1182_v60 }
  0x3e   : > { %894 = vmatpush3.bf16.msra.mxu0 %v893_v21  ;;  %926 = vmatpush3.bf16.msra.mxu1 %v893_v21  ;;  %v905_v44 = vpack.c.bf16 %v326_v41, %v325_v40  ;;  %v907_v45 = vpack.c.bf16 %v344_v43, %v343_v42  ;;  %v327_v46 = vld [vmem:[%s1263_s1 + $0x50] sm:$0xff]  ;;  %v328_v47 = vld [vmem:[%s1263_s1 + $0x58] sm:$0xff]  ;;  %v345_v48 = vld [vmem:[%s1263_s1 + $0xe0] sm:$0xff] }
  0x3f   : > { %896 = vmatprep.subr.bf16.mxu0 %v895_v22  ;;  %928 = vmatprep.subr.bf16.mxu1 %v895_v22  ;;  %v346_v49 = vld [vmem:[%s1263_s1 + $0xe8] sm:$0xff]  ;;  %v909_v50 = vpack.c.bf16 %v328_v47, %v327_v46  ;;  %v329_v52 = vld [vmem:[%s1263_s1 + $0x60] sm:$0xff]  ;;  %v347_v54 = vld [vmem:[%s1263_s1 + $0xf0] sm:$0xff] }
  0x40   : > { %424 = vmatprep.mubr.f32.mxu0 %v357_v35  ;;  %506 = vmatprep.mubr.f32.mxu1 %v439_v38  ;;  %v911_v51 = vpack.c.bf16 %v346_v49, %v345_v48  ;;  %v330_v53 = vld [vmem:[%s1263_s1 + $0x68] sm:$0xff]  ;;  %v348_v55 = vld [vmem:[%s1263_s1 + $0xf8] sm:$0xff]  ;;  %v331_v58 = vld [vmem:[%s1263_s1 + $0x70] sm:$0xff] }
  0x41   : > { %v913_v56 = vpack.c.bf16 %v330_v53, %v329_v52  ;;  %v915_v57 = vpack.c.bf16 %v348_v55, %v347_v54  ;;  %v332_v59 = vld [vmem:[%s1263_s1 + $0x78] sm:$0xff]  ;;  %v519_v0 = vld [vmem:[%s1264_s2 + $0x8] sm:$0xff]  ;;  %v518_v2 = vld [vmem:[%s1264_s2] sm:$0xff] }
  0x42   : > { %898 = vmatpush3.bf16.msra.mxu0 %v897_v28  ;;  %930 = vmatpush3.bf16.msra.mxu1 %v897_v28  ;;  %v917_v61 = vpack.c.bf16 %v332_v59, %v331_v58  ;;  %v521_v1 = vld [vmem:[%s1264_s2 + $0x18] sm:$0xff]  ;;  %v520_v4 = vld [vmem:[%s1264_s2 + $0x10] sm:$0xff]  ;;  %v308_v20 = vld [vmem:[%s1262_s0] sm:$0xff] }
  0x43   : > { %900 = vmatprep.subr.bf16.mxu0 %v899_v29  ;;  %932 = vmatprep.subr.bf16.mxu1 %v899_v29  ;;  %v951_v3 = vpack.c.bf16 %v521_v1, %v519_v0  ;;  %v953_v6 = vpack.c.bf16 %v520_v4, %v518_v2  ;;  %v310_v21 = vld [vmem:[%s1262_s0 + $0x10] sm:$0xff]  ;;  %v312_v22 = vld [vmem:[%s1262_s0 + $0x20] sm:$0xff]  ;;  %v309_v25 = vld [vmem:[%s1262_s0 + $0x8] sm:$0xff] }
  0x44   : > { %v314_v23 = vld [vmem:[%s1262_s0 + $0x30] sm:$0xff]  ;;  %v311_v27 = vld [vmem:[%s1262_s0 + $0x18] sm:$0xff]  ;;  %v313_v28 = vld [vmem:[%s1262_s0 + $0x28] sm:$0xff] }
  0x45   : > { %v315_v29 = vld [vmem:[%s1262_s0 + $0x38] sm:$0xff] }
  0x46   : > { %902 = vmatpush3.bf16.msra.mxu0 %v901_v37  ;;  %934 = vmatpush3.bf16.msra.mxu1 %v901_v37 }
  0x47   : > { %904 = vmatprep.subr.bf16.mxu0 %v903_v39  ;;  %936 = vmatprep.subr.bf16.mxu1 %v903_v39 }
  0x4a   : > { %906 = vmatpush3.bf16.msra.mxu0 %v905_v44  ;;  %938 = vmatpush3.bf16.msra.mxu1 %v905_v44 }
  0x4b   : > { %908 = vmatprep.subr.bf16.mxu0 %v907_v45  ;;  %940 = vmatprep.subr.bf16.mxu1 %v907_v45 }
  0x4e   : > { %910 = vmatpush3.bf16.msra.mxu0 %v909_v50  ;;  %942 = vmatpush3.bf16.msra.mxu1 %v909_v50 }
  0x4f   : > { %912 = vmatprep.subr.bf16.mxu0 %v911_v51  ;;  %944 = vmatprep.subr.bf16.mxu1 %v911_v51 }
  0x52   : > { %914 = vmatpush3.bf16.msra.mxu0 %v913_v56  ;;  %946 = vmatpush3.bf16.msra.mxu1 %v913_v56 }
  0x53   : > { %916 = vmatprep.subr.bf16.mxu0 %v915_v57  ;;  %948 = vmatprep.subr.bf16.mxu1 %v915_v57 }
  0x56   : > { %918 = vmatpush3.bf16.msra.mxu0 %v917_v61  ;;  %950 = vmatpush3.bf16.msra.mxu1 %v917_v61 }
  0x57   : > { %952 = vmatprep.subr.bf16.mxu0 %v951_v3  ;;  %956 = vmatprep.subr.bf16.mxu1 %v951_v3 }
  0x59   : > { %425 = vmatmul.mubr.f32.vlgmr.msra.gmra.mrb[0].mxu0 %v353_v62  ;;  %507 = vmatmul.mubr.f32.vlgmr.msra.gmra.mrb[0].mxu1 %v435_v63 }
  0x5a   : > { %590 = vmatprep.mubr.f32.mxu0 %v1014_v5  ;;  %665 = vmatprep.mubr.f32.mxu1 %v1014_v5 }
  0x5b   : > { %954 = vmatpush1.bf16.msra.mxu0 %v953_v6  ;;  %958 = vmatpush1.bf16.msra.mxu1 %v953_v6 }
 0x12c   : > { %v849_v7 = vpop.f32.mrb[0].mxu0  ;;  %v884_v8 = vpop.f32.mrb[0].mxu1 }
 0x12d   : > { %v850_v9 = vpop.f32.mrb[1].mxu0  ;;  %v885_v10 = vpop.f32.mrb[1].mxu1 }
 0x12e   : > { %v851_v11 = vadd.f32 %v850_v9, %v849_v7  ;;  %v886_v12 = vadd.f32 %v885_v10, %v884_v8 }
 0x130   : > { %v512_v13 = vmul.f32 0.001953125, %v851_v11  ;;  %v513_v14 = vmul.f32 0.001953125, %v886_v12 }
 0x132   : > { %v514_v15 = vmul.f32 %v512_v13, %v512_v13 }
 0x134   : > { %v515_v16 = vsub.f32 %v513_v14, %v514_v15 }
 0x136   : > { %v516_v17 = vadd.f32 1e-05, %v515_v16 }
 0x138   : > { %986 = vrsqrt.f32 %v516_v17 }
 0x142   : > { %v987_v18 = vpop.eup %986 }
 0x143   : > { %810 = vmatmul.mubr.msk.f32.vlgmr.msra.gmra.mrb[2].mxu0 %vm522_vm2, %v987_v18  ;;  %v597_v19 = vmul.f32 %v987_v18, %v512_v13 }
 0x145   : > { %811 = vmatmul.mubr.msk.f32.vlgmr.msra.gmra.mrb[2].mxu1 %vm522_vm2, %v597_v19 }
 0x216   : > { %v592_v24 = vpop.f32.mrb[2].mxu0 }
 0x217   : > { %v675_v26 = vrot.slane %v592_v24, %v1182_v60  ;;  %v594_v30 = vpop.f32.mrb[3].mxu0 }
 0x218   : > { %v679_v31 = vrot.slane %v594_v30, %v1182_v60  ;;  %v667_v32 = vpop.f32.mrb[2].mxu1 }
 0x219   : > { %v680_v33 = vmul.f32 %v675_v26, %v308_v20  ;;  %v682_v34 = vmul.f32 %v675_v26, %v310_v21  ;;  %v684_v35 = vmul.f32 %v675_v26, %v312_v22  ;;  %v686_v36 = vmul.f32 %v675_v26, %v314_v23  ;;  %v669_v37 = vpop.f32.mrb[3].mxu1 }
 0x21a   : > { %v681_v38 = vmul.f32 %v679_v31, %v309_v25  ;;  %v683_v39 = vmul.f32 %v679_v31, %v311_v27  ;;  %v685_v40 = vmul.f32 %v679_v31, %v313_v28  ;;  %v687_v41 = vmul.f32 %v679_v31, %v315_v29 }
 0x21b   : > { %v691_v42 = vrot.slane %v667_v32, %v1182_v60  ;;  %v695_v43 = vrot.slane %v669_v37, %v1182_v60 }
 0x21d   : > { %v696_v44 = vsub.f32 %v680_v33, %v691_v42  ;;  %v698_v45 = vsub.f32 %v682_v34, %v691_v42  ;;  %v700_v46 = vsub.f32 %v684_v35, %v691_v42  ;;  %v702_v47 = vsub.f32 %v686_v36, %v691_v42 }
 0x21e   : > { %v697_v48 = vsub.f32 %v681_v38, %v695_v43  ;;  %v699_v49 = vsub.f32 %v683_v39, %v695_v43  ;;  %v701_v50 = vsub.f32 %v685_v40, %v695_v43  ;;  %v703_v51 = vsub.f32 %v687_v41, %v695_v43 }
 0x21f   : > { %vm704_vm3 = vcmp.gt.f32.partialorder %v696_v44, 0.0  ;;  %vm706_vm4 = vcmp.gt.f32.partialorder %v698_v45, 0.0  ;;  %vm708_vm5 = vcmp.gt.f32.partialorder %v700_v46, 0.0  ;;  %vm710_vm6 = vcmp.gt.f32.partialorder %v702_v47, 0.0 }
 0x220   : > { %v712_v52 = vmul.f32 0.2, %v696_v44  ;;  %v714_v53 = vmul.f32 0.2, %v698_v45  ;;  %v716_v54 = vmul.f32 0.2, %v700_v46 }
 0x221   : > { %v718_v55 = vmul.f32 0.2, %v702_v47  ;;  %vm705_vm7 = vcmp.gt.f32.partialorder %v697_v48, 0.0  ;;  %vm707_vm8 = vcmp.gt.f32.partialorder %v699_v49, 0.0  ;;  %vm709_vm9 = vcmp.gt.f32.partialorder %v701_v50, 0.0 }
 0x222   : > { %v720_v56 = vsel %vm704_vm3, %v696_v44, %v712_v52  ;;  %v722_v57 = vsel %vm706_vm4, %v698_v45, %v714_v53  ;;  %v724_v58 = vsel %vm708_vm5, %v700_v46, %v716_v54  ;;  %vm711_vm10 = vcmp.gt.f32.partialorder %v703_v51, 0.0 }
 0x223   : > { %v726_v59 = vsel %vm710_vm6, %v702_v47, %v718_v55  ;;  %728 = vst [vmem:[%s1265_s3] sm:$0xff] %v720_v56  ;;  %730 = vst [vmem:[%s1265_s3 + $0x10] sm:$0xff] %v722_v57  ;;  %v713_v60 = vmul.f32 0.2, %v697_v48  ;;  %v715_v61 = vmul.f32 0.2, %v699_v49 }
 0x224   : > { %732 = vst [vmem:[%s1265_s3 + $0x20] sm:$0xff] %v724_v58  ;;  %v717_v62 = vmul.f32 0.2, %v701_v50  ;;  %734 = vst [vmem:[%s1265_s3 + $0x30] sm:$0xff] %v726_v59  ;;  %v719_v63 = vmul.f32 0.2, %v703_v51 }
 0x225   : > { %v721_v0 = vsel %vm705_vm7, %v697_v48, %v713_v60  ;;  %v723_v1 = vsel %vm707_vm8, %v699_v49, %v715_v61 }
 0x226   : > { %v725_v2 = vsel %vm709_vm9, %v701_v50, %v717_v62  ;;  %v727_v3 = vsel %vm711_vm10, %v703_v51, %v719_v63  ;;  %729 = vst [vmem:[%s1265_s3 + $0x8] sm:$0xff] %v721_v0  ;;  %731 = vst [vmem:[%s1265_s3 + $0x18] sm:$0xff] %v723_v1 }
 0x227   : > { %733 = vst [vmem:[%s1265_s3 + $0x28] sm:$0xff] %v725_v2  ;;  %735 = vst [vmem:[%s1265_s3 + $0x38] sm:$0xff] %v727_v3 }
 0x228 PF: > { %s13_s14 = sadd.s32 1, %s1010_s14   ;;  %s1266_s12 = smov %s1006_s13 }
 0x229   : > { %p10_p7 = scmp.ge.s32.totalorder %s13_s14, 4   ;;  %s1267_s13 = smov %s1269_s15 }
 0x22b   :  { %12 = sbr.rel (!%p10_p7) target bundleno = 2 (0x2), region = 74 }

// kernel: generator_forward.13
= control target key start
LH: loop header
LB: loop body
LE: loop exit
PB: predicated region body
PF: predicated region fallthrough
CT: control target
= control target key end

     0   :  { %s899_s12 = smov 0   ;;  %s1101_s0 = inlined_call_operand.vmem [shape: bf16[640,64], index: 0, kind: input, shape index: {}]   ;;  %s1102_s1 = inlined_call_operand.vmem [shape: bf16[64,32], index: 1, kind: input, shape index: {}]   ;;  %s1103_s2 = inlined_call_operand.vmem [shape: f32[1,32], index: 2, kind: input, shape index: {}]   ;;  %s1104_s3 = inlined_call_operand.vmem [shape: f32[640,32], index: 3, kind: output, shape index: {}]  }
   0x1 LB: > { %s705_s13 = sadd.s32 4294967295, %s877_s12   ;;  %p709_p0 = scmp.ge.s32.totalorder %s877_s12, 1  ;;  %s877_s12 = sphi %s899_s12, %s13_s12  }
   0x2   : > { %p138_p1 = scmp.lt.s32.totalorder %s877_s12, 3 }
   0x4   : > { %p139_p2 = pnand %p709_p0, %p138_p1 }
   0x5   : > { %v847_v0 = vld [vmem:[%s1102_s1] sm:$0xff] (!%p139_p2)   ;;  %s162_s16 = smul.u32 (!%p139_p2), 40, %s705_s13  ;;  %v848_v1 = vld [vmem:[%s1102_s1 + $0x8] sm:$0xff] (!%p139_p2)   ;;  %v849_v2 = vld [vmem:[%s1102_s1 + $0x10] sm:$0xff] (!%p139_p2)   ;;  %vm354_vm0 = vcmask (!%p139_p2), 523264   ;;  %vm608_vm1 = vcmask (!%p139_p2), 261120  }
   0x6   : > { %142 = sbr.rel (%p139_p2) target bundleno = 272 (0x110), region = 32  ;;  %783 = vmatprep.subr.bf16.mxu0 (!%p139_p2), %v847_v0  ;;  %831 = vmatprep.subr.bf16.mxu1 (!%p139_p2), %v847_v0  ;;  %v850_v3 = vld [vmem:[%s1102_s1 + $0x18] sm:$0xff] (!%p139_p2)   ;;  %v971_v24 = vld [vmem:[%s1103_s2] ss:$0 sm:$0xff] (!%p139_p2) }
   0x7   : > { %p163_p3 = scmp.lt.s32.totalorder (!%p139_p2), %s162_s16, 79  ;;  %784 = vmatpush3.bf16.msra.mxu0 (!%p139_p2), %v847_v0  ;;  %835 = vmatpush3.bf16.msra.mxu1 (!%p139_p2), %v847_v0 }
   0x8   : > { %785 = vmatprep.subr.bf16.mxu0 (!%p139_p2), %v848_v1  ;;  %832 = vmatprep.subr.bf16.mxu1 (!%p139_p2), %v848_v1 }
   0xb   : > { %786 = vmatpush3.bf16.msra.mxu0 (!%p139_p2), %v848_v1  ;;  %836 = vmatpush3.bf16.msra.mxu1 (!%p139_p2), %v848_v1 }
   0xc   : > { %787 = vmatprep.subr.bf16.mxu0 (!%p139_p2), %v849_v2  ;;  %833 = vmatprep.subr.bf16.mxu1 (!%p139_p2), %v849_v2 }
   0xd   : > { %s1106_s16 = smov (!%p163_p3, %s162_s16), 79 }
   0xe   : > { %s710_s21 = sshll.u32 %s1106_s16, 2  ;;  %s711_s27 = sshll.u32 %s1106_s16, 3 }
   0xf   : > { %s925_s26 = scalar_lea.vmem %s1101_s0, %s710_s21  ;;  %788 = vmatpush3.bf16.msra.mxu0 %v849_v2  ;;  %837 = vmatpush3.bf16.msra.mxu1 %v849_v2  ;;  %s976_s5 = scalar_lea.vmem %s1104_s3, %s711_s27 }
  0x10   : > { %v851_v4 = vld [vmem:[%s925_s26] sm:$0xff]   ;;  %v852_v5 = vld [vmem:[%s925_s26 + $0x50] sm:$0xff]   ;;  %789 = vmatprep.subr.bf16.mxu0 %v850_v3  ;;  %834 = vmatprep.subr.bf16.mxu1 %v850_v3  ;;  %v853_v6 = vld [vmem:[%s925_s26 + $0x8] sm:$0xff]  }
  0x11   : > { %791 = vmatprep.mubr.msk.bf16.mxu0 %vm354_vm0, %v851_v4  ;;  %811 = vmatprep.mubr.msk.bf16.mxu1 %vm354_vm0, %v852_v5  ;;  %v854_v7 = vld [vmem:[%s925_s26 + $0x58] sm:$0xff]   ;;  %v855_v8 = vld [vmem:[%s925_s26 + $0x10] sm:$0xff]   ;;  %v856_v9 = vld [vmem:[%s925_s26 + $0x60] sm:$0xff]  }
  0x12   : > { %v857_v10 = vld [vmem:[%s925_s26 + $0x18] sm:$0xff]   ;;  %v858_v11 = vld [vmem:[%s925_s26 + $0x68] sm:$0xff]   ;;  %v859_v12 = vld [vmem:[%s925_s26 + $0x20] sm:$0xff]  }
  0x13   : > { %790 = vmatpush3.bf16.msra.mxu0 %v850_v3  ;;  %838 = vmatpush3.bf16.msra.mxu1 %v850_v3  ;;  %v860_v13 = vld [vmem:[%s925_s26 + $0x70] sm:$0xff]   ;;  %v861_v14 = vld [vmem:[%s925_s26 + $0x28] sm:$0xff]   ;;  %v862_v15 = vld [vmem:[%s925_s26 + $0x78] sm:$0xff]  }
  0x14   : > { %v863_v16 = vld [vmem:[%s925_s26 + $0x30] sm:$0xff]   ;;  %v864_v17 = vld [vmem:[%s925_s26 + $0x80] sm:$0xff]   ;;  %v865_v18 = vld [vmem:[%s925_s26 + $0x38] sm:$0xff]  }
  0x15   : > { %v866_v19 = vld [vmem:[%s925_s26 + $0x88] sm:$0xff]   ;;  %v867_v20 = vld [vmem:[%s925_s26 + $0x40] sm:$0xff]   ;;  %v868_v21 = vld [vmem:[%s925_s26 + $0x90] sm:$0xff]  }
  0x16   : > { %792 = vmatmul.mubr.msk.bf16.vlgmr.msra.gmra.mrb[0].mxu0 %vm354_vm0, %v853_v6  ;;  %812 = vmatmul.mubr.msk.bf16.vlgmr.msra.gmra.mrb[0].mxu1 %vm354_vm0, %v854_v7  ;;  %v869_v22 = vld [vmem:[%s925_s26 + $0x48] sm:$0xff]   ;;  %v870_v23 = vld [vmem:[%s925_s26 + $0x98] sm:$0xff]  }
  0x17   : > { %795 = vmatprep.mubr.msk.bf16.mxu0 %vm354_vm0, %v855_v8  ;;  %815 = vmatprep.mubr.msk.bf16.mxu1 %vm354_vm0, %v856_v9 }
  0x1e   : > { %796 = vmatmul.mubr.msk.bf16.gmra.mrb[4].mxu0 %vm354_vm0, %v857_v10  ;;  %816 = vmatmul.mubr.msk.bf16.gmra.mrb[4].mxu1 %vm354_vm0, %v858_v11 }
  0x1f   : > { %799 = vmatprep.mubr.msk.bf16.mxu0 %vm354_vm0, %v859_v12  ;;  %819 = vmatprep.mubr.msk.bf16.mxu1 %vm354_vm0, %v860_v13 }
  0x26   : > { %800 = vmatmul.mubr.msk.bf16.gmra.mrb[8].mxu0 %vm354_vm0, %v861_v14  ;;  %820 = vmatmul.mubr.msk.bf16.gmra.mrb[8].mxu1 %vm354_vm0, %v862_v15 }
  0x27   : > { %803 = vmatprep.mubr.msk.bf16.mxu0 %vm354_vm0, %v863_v16  ;;  %823 = vmatprep.mubr.msk.bf16.mxu1 %vm354_vm0, %v864_v17 }
  0x2e   : > { %804 = vmatmul.mubr.msk.bf16.gmra.mrb[12].mxu0 %vm354_vm0, %v865_v18  ;;  %824 = vmatmul.mubr.msk.bf16.gmra.mrb[12].mxu1 %vm354_vm0, %v866_v19 }
  0x2f   : > { %807 = vmatprep.mubr.msk.bf16.mxu0 %vm354_vm0, %v867_v20  ;;  %827 = vmatprep.mubr.msk.bf16.mxu1 %vm354_vm0, %v868_v21 }
  0x36   : > { %808 = vmatmul.mubr.msk.bf16.gmra.mrb[16].mxu0 %vm354_vm0, %v869_v22  ;;  %828 = vmatmul.mubr.msk.bf16.gmra.mrb[16].mxu1 %vm354_vm0, %v870_v23 }
  0xe9   : > { %v793_v25 = vpop.f32.mrb[0].mxu0  ;;  %v813_v26 = vpop.f32.mrb[0].mxu1 }
  0xea   : > { %v458_v27 = vadd.f32 %v793_v25, %v971_v24  ;;  %v538_v28 = vadd.f32 %v813_v26, %v971_v24  ;;  %v449_v29 = vpop.f32.mrb[1].mxu0  ;;  %v529_v30 = vpop.f32.mrb[1].mxu1 }
  0xeb   : > { %v450_v31 = vadd.f32 %v971_v24, %v449_v29  ;;  %v530_v32 = vadd.f32 %v971_v24, %v529_v30  ;;  %v794_v33 = vpop.f32.mrb[2].mxu0  ;;  %v814_v34 = vpop.f32.mrb[2].mxu1 }
  0xec   : > { %611 = vst.msk [vmem:[%s976_s5 + $0x10] sm:$0xff] %vm608_vm1, %v458_v27  ;;  %631 = vst.msk [vmem:[%s976_s5 + $0xb0] sm:$0xff] %vm608_vm1, %v538_v28  ;;  %v461_v35 = vadd.f32 %v794_v33, %v971_v24  ;;  %v541_v36 = vadd.f32 %v814_v34, %v971_v24  ;;  %v452_v37 = vpop.f32.mrb[3].mxu0  ;;  %v532_v38 = vpop.f32.mrb[3].mxu1 }
  0xed   : > { %609 = vst.msk [vmem:[%s976_s5] sm:$0xff] %vm608_vm1, %v450_v31  ;;  %629 = vst.msk [vmem:[%s976_s5 + $0xa0] sm:$0xff] %vm608_vm1, %v530_v32  ;;  %v453_v39 = vadd.f32 %v971_v24, %v452_v37  ;;  %v533_v40 = vadd.f32 %v971_v24, %v532_v38 }
  0xee   : > { %612 = vst.msk [vmem:[%s976_s5 + $0x18] sm:$0xff] %vm608_vm1, %v461_v35  ;;  %632 = vst.msk [vmem:[%s976_s5 + $0xb8] sm:$0xff] %vm608_vm1, %v541_v36 }
  0xef   : > { %610 = vst.msk [vmem:[%s976_s5 + $0x8] sm:$0xff] %vm608_vm1, %v453_v39  ;;  %630 = vst.msk [vmem:[%s976_s5 + $0xa8] sm:$0xff] %vm608_vm1, %v533_v40 }
  0xf1   : > { %v797_v41 = vpop.f32.mrb[4].mxu0  ;;  %v817_v42 = vpop.f32.mrb[4].mxu1 }
  0xf2   : > { %v474_v43 = vadd.f32 %v797_v41, %v971_v24  ;;  %v554_v44 = vadd.f32 %v817_v42, %v971_v24  ;;  %v465_v45 = vpop.f32.mrb[5].mxu0  ;;  %v545_v46 = vpop.f32.mrb[5].mxu1 }
  0xf3   : > { %v466_v47 = vadd.f32 %v971_v24, %v465_v45  ;;  %v546_v48 = vadd.f32 %v971_v24, %v545_v46  ;;  %v798_v49 = vpop.f32.mrb[6].mxu0  ;;  %v818_v50 = vpop.f32.mrb[6].mxu1 }
  0xf4   : > { %615 = vst.msk [vmem:[%s976_s5 + $0x30] sm:$0xff] %vm608_vm1, %v474_v43  ;;  %635 = vst.msk [vmem:[%s976_s5 + $0xd0] sm:$0xff] %vm608_vm1, %v554_v44  ;;  %v477_v51 = vadd.f32 %v798_v49, %v971_v24  ;;  %v557_v52 = vadd.f32 %v818_v50, %v971_v24  ;;  %v468_v53 = vpop.f32.mrb[7].mxu0  ;;  %v548_v54 = vpop.f32.mrb[7].mxu1 }
  0xf5   : > { %613 = vst.msk [vmem:[%s976_s5 + $0x20] sm:$0xff] %vm608_vm1, %v466_v47  ;;  %633 = vst.msk [vmem:[%s976_s5 + $0xc0] sm:$0xff] %vm608_vm1, %v546_v48  ;;  %v469_v55 = vadd.f32 %v971_v24, %v468_v53  ;;  %v549_v56 = vadd.f32 %v971_v24, %v548_v54 }
  0xf6   : > { %616 = vst.msk [vmem:[%s976_s5 + $0x38] sm:$0xff] %vm608_vm1, %v477_v51  ;;  %636 = vst.msk [vmem:[%s976_s5 + $0xd8] sm:$0xff] %vm608_vm1, %v557_v52 }
  0xf7   : > { %614 = vst.msk [vmem:[%s976_s5 + $0x28] sm:$0xff] %vm608_vm1, %v469_v55  ;;  %634 = vst.msk [vmem:[%s976_s5 + $0xc8] sm:$0xff] %vm608_vm1, %v549_v56 }
  0xf9   : > { %v801_v57 = vpop.f32.mrb[8].mxu0  ;;  %v821_v58 = vpop.f32.mrb[8].mxu1 }
  0xfa   : > { %v490_v59 = vadd.f32 %v801_v57, %v971_v24  ;;  %v570_v60 = vadd.f32 %v821_v58, %v971_v24  ;;  %v481_v61 = vpop.f32.mrb[9].mxu0  ;;  %v561_v62 = vpop.f32.mrb[9].mxu1 }
  0xfb   : > { %v482_v63 = vadd.f32 %v971_v24, %v481_v61  ;;  %v562_v0 = vadd.f32 %v971_v24, %v561_v62  ;;  %v802_v1 = vpop.f32.mrb[10].mxu0  ;;  %v822_v2 = vpop.f32.mrb[10].mxu1 }
  0xfc   : > { %619 = vst.msk [vmem:[%s976_s5 + $0x50] sm:$0xff] %vm608_vm1, %v490_v59  ;;  %639 = vst.msk [vmem:[%s976_s5 + $0xf0] sm:$0xff] %vm608_vm1, %v570_v60  ;;  %v493_v3 = vadd.f32 %v802_v1, %v971_v24  ;;  %v573_v4 = vadd.f32 %v822_v2, %v971_v24  ;;  %v484_v5 = vpop.f32.mrb[11].mxu0  ;;  %v564_v6 = vpop.f32.mrb[11].mxu1 }
  0xfd   : > { %617 = vst.msk [vmem:[%s976_s5 + $0x40] sm:$0xff] %vm608_vm1, %v482_v63  ;;  %637 = vst.msk [vmem:[%s976_s5 + $0xe0] sm:$0xff] %vm608_vm1, %v562_v0  ;;  %v485_v7 = vadd.f32 %v971_v24, %v484_v5  ;;  %v565_v8 = vadd.f32 %v971_v24, %v564_v6 }
  0xfe   : > { %620 = vst.msk [vmem:[%s976_s5 + $0x58] sm:$0xff] %vm608_vm1, %v493_v3  ;;  %640 = vst.msk [vmem:[%s976_s5 + $0xf8] sm:$0xff] %vm608_vm1, %v573_v4 }
  0xff   : > { %618 = vst.msk [vmem:[%s976_s5 + $0x48] sm:$0xff] %vm608_vm1, %v485_v7  ;;  %638 = vst.msk [vmem:[%s976_s5 + $0xe8] sm:$0xff] %vm608_vm1, %v565_v8 }
 0x101   : > { %v805_v9 = vpop.f32.mrb[12].mxu0  ;;  %v825_v10 = vpop.f32.mrb[12].mxu1 }
 0x102   : > { %v506_v11 = vadd.f32 %v805_v9, %v971_v24  ;;  %v586_v12 = vadd.f32 %v825_v10, %v971_v24  ;;  %v497_v13 = vpop.f32.mrb[13].mxu0  ;;  %v577_v14 = vpop.f32.mrb[13].mxu1 }
 0x103   : > { %v498_v15 = vadd.f32 %v971_v24, %v497_v13  ;;  %v578_v16 = vadd.f32 %v971_v24, %v577_v14  ;;  %v806_v17 = vpop.f32.mrb[14].mxu0  ;;  %v826_v18 = vpop.f32.mrb[14].mxu1 }
 0x104   : > { %623 = vst.msk [vmem:[%s976_s5 + $0x70] sm:$0xff] %vm608_vm1, %v506_v11  ;;  %643 = vst.msk [vmem:[%s976_s5 + $0x110] sm:$0xff] %vm608_vm1, %v586_v12  ;;  %v509_v19 = vadd.f32 %v806_v17, %v971_v24  ;;  %v589_v20 = vadd.f32 %v826_v18, %v971_v24  ;;  %v500_v21 = vpop.f32.mrb[15].mxu0  ;;  %v580_v22 = vpop.f32.mrb[15].mxu1 }
 0x105   : > { %621 = vst.msk [vmem:[%s976_s5 + $0x60] sm:$0xff] %vm608_vm1, %v498_v15  ;;  %641 = vst.msk [vmem:[%s976_s5 + $0x100] sm:$0xff] %vm608_vm1, %v578_v16  ;;  %v501_v23 = vadd.f32 %v971_v24, %v500_v21  ;;  %v581_v25 = vadd.f32 %v971_v24, %v580_v22 }
 0x106   : > { %624 = vst.msk [vmem:[%s976_s5 + $0x78] sm:$0xff] %vm608_vm1, %v509_v19  ;;  %644 = vst.msk [vmem:[%s976_s5 + $0x118] sm:$0xff] %vm608_vm1, %v589_v20 }
 0x107   : > { %622 = vst.msk [vmem:[%s976_s5 + $0x68] sm:$0xff] %vm608_vm1, %v501_v23  ;;  %642 = vst.msk [vmem:[%s976_s5 + $0x108] sm:$0xff] %vm608_vm1, %v581_v25 }
 0x109   : > { %v809_v26 = vpop.f32.mrb[16].mxu0  ;;  %v829_v27 = vpop.f32.mrb[16].mxu1 }
 0x10a   : > { %v522_v28 = vadd.f32 %v809_v26, %v971_v24  ;;  %v602_v29 = vadd.f32 %v829_v27, %v971_v24  ;;  %v513_v30 = vpop.f32.mrb[17].mxu0  ;;  %v593_v31 = vpop.f32.mrb[17].mxu1 }
 0x10b   : > { %v514_v32 = vadd.f32 %v971_v24, %v513_v30  ;;  %v594_v33 = vadd.f32 %v971_v24, %v593_v31  ;;  %v810_v34 = vpop.f32.mrb[18].mxu0  ;;  %v830_v35 = vpop.f32.mrb[18].mxu1 }
 0x10c   : > { %627 = vst.msk [vmem:[%s976_s5 + $0x90] sm:$0xff] %vm608_vm1, %v522_v28  ;;  %647 = vst.msk [vmem:[%s976_s5 + $0x130] sm:$0xff] %vm608_vm1, %v602_v29  ;;  %v525_v36 = vadd.f32 %v810_v34, %v971_v24  ;;  %v605_v37 = vadd.f32 %v830_v35, %v971_v24  ;;  %v516_v38 = vpop.f32.mrb[19].mxu0  ;;  %v596_v39 = vpop.f32.mrb[19].mxu1 }
 0x10d   : > { %625 = vst.msk [vmem:[%s976_s5 + $0x80] sm:$0xff] %vm608_vm1, %v514_v32  ;;  %645 = vst.msk [vmem:[%s976_s5 + $0x120] sm:$0xff] %vm608_vm1, %v594_v33  ;;  %v517_v40 = vadd.f32 %v971_v24, %v516_v38  ;;  %v597_v41 = vadd.f32 %v971_v24, %v596_v39 }
 0x10e   : > { %628 = vst.msk [vmem:[%s976_s5 + $0x98] sm:$0xff] %vm608_vm1, %v525_v36  ;;  %648 = vst.msk [vmem:[%s976_s5 + $0x138] sm:$0xff] %vm608_vm1, %v605_v37 }
 0x10f   : > { %626 = vst.msk [vmem:[%s976_s5 + $0x88] sm:$0xff] %vm608_vm1, %v517_v40  ;;  %646 = vst.msk [vmem:[%s976_s5 + $0x128] sm:$0xff] %vm608_vm1, %v597_v41 }
 0x110 PF: > { %s13_s12 = sadd.s32 1, %s877_s12  }
 0x111   : > { %p10_p4 = scmp.ge.s32.totalorder %s13_s12, 4  }
 0x113   :  { %12 = sbr.rel (!%p10_p4) target bundleno = 1 (0x1), region = 62 }

// kernel: generator_forward.14
= control target key start
LH: loop header
LB: loop body
LE: loop exit
PB: predicated region body
PF: predicated region fallthrough
CT: control target
= control target key end

     0   :  { %s1113_s12 = smov 0   ;;  %s1115_s13 = smov 0   ;;  %s1419_s0 = inlined_call_operand.vmem [shape: f32[64,256], index: 0, kind: input, shape index: {}]   ;;  %s1420_s1 = inlined_call_operand.vmem [shape: f32[256,8], index: 1, kind: input, shape index: {}]   ;;  %s1421_s2 = inlined_call_operand.vmem [shape: f32[8,256], index: 2, kind: input, shape index: {}]   ;;  %s1422_s3 = inlined_call_operand.vmem [shape: f32[64,256], index: 3, kind: output, shape index: {}]  }
   0x1   :  { %s1117_s14 = smov 0  }
   0x2 LB: > { %s25_s15 = sadd.s32 1, %s1084_s13  ;;  %p892_p0 = scmp.ge.s32.totalorder %s1088_s14, 1  ;;  %s1088_s14 = sphi %s1117_s14, %s13_s14   ;;  %s1084_s13 = sphi %s1115_s13, %s1424_s13   ;;  %s1080_s12 = sphi %s1113_s12, %s1423_s12  }
   0x3   : > { %p27_p1 = scmp.ge.s32.totalorder %s25_s15, 2  ;;  %p151_p2 = scmp.lt.s32.totalorder %s1088_s14, 3 }
   0x5   : > { %s1426_s15 = smov (%p27_p1, %s25_s15), 0  ;;  %p152_p3 = pnand %p892_p0, %p151_p2 }
   0x6   : > { %p191_p4 = scmp.eq.s32.totalorder (!%p152_p3), %s1080_s12, 0 }
   0x7   : > { %155 = sbr.rel (%p152_p3) target bundleno = 569 (0x239), region = 32 }
   0xe   : > { %196 = sbr.rel (!%p191_p4) target bundleno = 21 (0x15), region = 36  ;;  %v197_v0 = vlaneseq (%p191_p4)  ;;  %v1090_v1 = vmov (%p191_p4), 0.0  }
  0x10   : > { %vm199_vm0 = vcmp.lt.s32.totalorder (%p191_p4), %v197_v0, 256 }
  0x11   : > { %201 = vst.msk [vmem:[#allocation2] sm:$0x3] (%p191_p4), %vm199_vm0, %v1090_v1  ;;  %202 = vst.msk [vmem:[#allocation3] sm:$0x3] (%p191_p4), %vm199_vm0, %v1090_v1 }
  0x15 PF: > { %p894_p5 = scmp.ne.s32.totalorder %s1080_s12, 0 }
  0x16   : > { %v206_v2 = vld [vmem:[%s1419_s0] sm:$0xff] (!%p894_p5)  ;;  %v208_v3 = vld [vmem:[%s1419_s0 + $0x10] sm:$0xff] (!%p894_p5)  ;;  %v207_v4 = vld [vmem:[%s1419_s0 + $0x8] sm:$0xff] (!%p894_p5)  ;;  %v255_v61 = vlaneseq (!%p894_p5)  ;;  %v1091_v63 = vmov (!%p894_p5), 1966171168  }
  0x17   : > { %205 = sbr.rel (%p894_p5) target bundleno = 61 (0x3d), region = 40  ;;  %v209_v5 = vld [vmem:[%s1419_s0 + $0x18] sm:$0xff] (!%p894_p5)  ;;  %v223_v6 = vadd.f32 (!%p894_p5), %v208_v3, %v206_v2  ;;  %v210_v7 = vld [vmem:[%s1419_s0 + $0x20] sm:$0xff] (!%p894_p5)  ;;  %v211_v9 = vld [vmem:[%s1419_s0 + $0x28] sm:$0xff] (!%p894_p5)  ;;  %v274_v11 = vmul.f32 (!%p894_p5), %v206_v2, %v206_v2  ;;  %v275_v14 = vmul.f32 (!%p894_p5), %v207_v4, %v207_v4  ;;  %v276_v15 = vmul.f32 (!%p894_p5), %v208_v3, %v208_v3 }
  0x18   : > { %v236_v8 = vadd.f32 (!%p894_p5), %v209_v5, %v207_v4  ;;  %v212_v12 = vld [vmem:[%s1419_s0 + $0x30] sm:$0xff] (!%p894_p5)  ;;  %v277_v16 = vmul.f32 (!%p894_p5), %v209_v5, %v209_v5  ;;  %v213_v17 = vld [vmem:[%s1419_s0 + $0x38] sm:$0xff] (!%p894_p5)  ;;  %v214_v19 = vld [vmem:[%s1419_s0 + $0x40] sm:$0xff] (!%p894_p5)  ;;  %v278_v21 = vmul.f32 (!%p894_p5), %v210_v7, %v210_v7  ;;  %v279_v22 = vmul.f32 (!%p894_p5), %v211_v9, %v211_v9 }
  0x19   : > { %v224_v10 = vadd.f32 (!%p894_p5), %v223_v6, %v210_v7  ;;  %v215_v23 = vld [vmem:[%s1419_s0 + $0x48] sm:$0xff] (!%p894_p5)  ;;  %v280_v25 = vmul.f32 (!%p894_p5), %v212_v12, %v212_v12  ;;  %v216_v26 = vld [vmem:[%s1419_s0 + $0x50] sm:$0xff] (!%p894_p5)  ;;  %v281_v28 = vmul.f32 (!%p894_p5), %v213_v17, %v213_v17  ;;  %v290_v29 = vadd.f32 (!%p894_p5), %v276_v15, %v274_v11  ;;  %v217_v31 = vld [vmem:[%s1419_s0 + $0x58] sm:$0xff] (!%p894_p5) }
  0x1a   : > { %v237_v13 = vadd.f32 (!%p894_p5), %v236_v8, %v211_v9  ;;  %v303_v30 = vadd.f32 (!%p894_p5), %v277_v16, %v275_v14  ;;  %v282_v33 = vmul.f32 (!%p894_p5), %v214_v19, %v214_v19  ;;  %v218_v34 = vld [vmem:[%s1419_s0 + $0x60] sm:$0xff] (!%p894_p5)  ;;  %v283_v36 = vmul.f32 (!%p894_p5), %v215_v23, %v215_v23  ;;  %v219_v39 = vld [vmem:[%s1419_s0 + $0x68] sm:$0xff] (!%p894_p5)  ;;  %v220_v42 = vld [vmem:[%s1419_s0 + $0x70] sm:$0xff] (!%p894_p5) }
  0x1b   : > { %v225_v18 = vadd.f32 (!%p894_p5), %v224_v10, %v212_v12  ;;  %v291_v37 = vadd.f32 (!%p894_p5), %v290_v29, %v278_v21  ;;  %v284_v41 = vmul.f32 (!%p894_p5), %v216_v26, %v216_v26  ;;  %v285_v44 = vmul.f32 (!%p894_p5), %v217_v31, %v217_v31  ;;  %v221_v47 = vld [vmem:[%s1419_s0 + $0x78] sm:$0xff] (!%p894_p5) }
  0x1c   : > { %v238_v20 = vadd.f32 (!%p894_p5), %v237_v13, %v213_v17  ;;  %v304_v38 = vadd.f32 (!%p894_p5), %v303_v30, %v279_v22  ;;  %v286_v49 = vmul.f32 (!%p894_p5), %v218_v34, %v218_v34  ;;  %v287_v51 = vmul.f32 (!%p894_p5), %v219_v39, %v219_v39 }
  0x1d   : > { %v226_v24 = vadd.f32 (!%p894_p5), %v225_v18, %v214_v19  ;;  %v292_v45 = vadd.f32 (!%p894_p5), %v291_v37, %v280_v25  ;;  %v288_v55 = vmul.f32 (!%p894_p5), %v220_v42, %v220_v42  ;;  %v289_v57 = vmul.f32 (!%p894_p5), %v221_v47, %v221_v47 }
  0x1e   : > { %v239_v27 = vadd.f32 %v238_v20, %v215_v23  ;;  %v305_v46 = vadd.f32 %v304_v38, %v281_v28  ;;  %v253_v0 = vunpack.c.l.s4 %v1091_v63  ;;  %v256_v8 = vshrl.u32 %v255_v61, 7  ;;  %v222_v28 = vld [vmem:[#allocation2] sm:$0x3] }
  0x1f   : > { %v227_v32 = vadd.f32 %v226_v24, %v216_v26  ;;  %v293_v52 = vadd.f32 %v292_v45, %v282_v33  ;;  %vm270_vm1 = vcmp.lt.s32.totalorder %v255_v61, 256 }
  0x20   : > { %v240_v35 = vadd.f32 %v239_v27, %v217_v31  ;;  %v306_v53 = vadd.f32 %v305_v46, %v283_v36  ;;  %v254_v10 = vunpack.c.0.s8 %v253_v0 }
  0x21   : > { %v228_v40 = vadd.f32 %v227_v32, %v218_v34  ;;  %v294_v58 = vadd.f32 %v293_v52, %v284_v41 }
  0x22   : > { %v241_v43 = vadd.f32 %v240_v35, %v219_v39  ;;  %v307_v59 = vadd.f32 %v306_v53, %v285_v44  ;;  %v257_v19 = vsub.s32 %v254_v10, %v256_v8  ;;  %v273_v35 = vld [vmem:[#allocation3] sm:$0x3] }
  0x23   : > { %v229_v48 = vadd.f32 %v228_v40, %v220_v42  ;;  %v295_v1 = vadd.f32 %v294_v58, %v286_v49 }
  0x24   : > { %v242_v50 = vadd.f32 %v241_v43, %v221_v47  ;;  %v308_v2 = vadd.f32 %v307_v59, %v287_v51 }
  0x25   : > { %v230_v54 = vrot.slane %v229_v48, 4  ;;  %v296_v5 = vadd.f32 %v295_v1, %v288_v55 }
  0x26   : > { %v243_v56 = vrot.slane %v242_v50, 4  ;;  %v309_v6 = vadd.f32 %v308_v2, %v289_v57 }
  0x27   : > { %v231_v60 = vadd.f32 %v230_v54, %v229_v48  ;;  %v297_v11 = vrot.slane %v296_v5, 4 }
  0x28   : > { %v244_v62 = vadd.f32 %v243_v56, %v242_v50  ;;  %v310_v12 = vrot.slane %v309_v6, 4 }
  0x29   : > { %v232_v3 = vrot.slane %v231_v60, 2  ;;  %v298_v15 = vadd.f32 %v297_v11, %v296_v5 }
  0x2a   : > { %v245_v4 = vrot.slane %v244_v62, 2  ;;  %v311_v16 = vadd.f32 %v310_v12, %v309_v6 }
  0x2b   : > { %v233_v7 = vadd.f32 %v232_v3, %v231_v60  ;;  %v299_v20 = vrot.slane %v298_v15, 2 }
  0x2c   : > { %v246_v9 = vadd.f32 %v245_v4, %v244_v62  ;;  %v312_v21 = vrot.slane %v311_v16, 2 }
  0x2d   : > { %v234_v13 = vrot.slane %v233_v7, 1  ;;  %v300_v23 = vadd.f32 %v299_v20, %v298_v15 }
  0x2e   : > { %v247_v14 = vrot.slane %v246_v9, 1  ;;  %v313_v24 = vadd.f32 %v312_v21, %v311_v16 }
  0x2f   : > { %v235_v17 = vadd.f32 %v234_v13, %v233_v7  ;;  %v301_v26 = vrot.slane %v300_v23, 1 }
  0x30   : > { %v248_v18 = vadd.f32 %v247_v14, %v246_v9  ;;  %v314_v27 = vrot.slane %v313_v24, 1 }
  0x31   : > { %v302_v30 = vadd.f32 %v301_v26, %v300_v23 }
  0x32   : > { %v251_v22 = vcombine.low %v235_v17, %v248_v18  ;;  %v315_v31 = vadd.f32 %v314_v27, %v313_v24 }
  0x34   : > { %v258_v25 = vrot.slane %v251_v22, %v257_v19  ;;  %v318_v33 = vcombine.low %v302_v30, %v315_v31 }
  0x36   : > { %v265_v29 = vrot.slane %v258_v25, %v257_v19  ;;  %v325_v34 = vrot.slane %v318_v33, %v257_v19 }
  0x38   : > { %v267_v32 = vadd.f32 %v265_v29, %v222_v28  ;;  %v332_v36 = vrot.slane %v325_v34, %v257_v19 }
  0x3a   : > { %272 = vst.msk [vmem:[#allocation2] sm:$0x3] %vm270_vm1, %v267_v32  ;;  %v334_v37 = vadd.f32 %v332_v36, %v273_v35 }
  0x3c   : > { %335 = vst.msk [vmem:[#allocation3] sm:$0x3] %vm270_vm1, %v334_v37 }
  0x3d PF: > { %p895_p6 = scmp.ne.s32.totalorder %s1080_s12, 1 }
  0x3e   : > { %v373_v38 = vld [vmem:[%s1420_s1 + $0x80] sm:$0xff] (!%p895_p6)  ;;  %v374_v39 = vld [vmem:[%s1420_s1 + $0x88] sm:$0xff] (!%p895_p6)  ;;  %v390_v41 = vlaneseq (!%p895_p6)  ;;  %v375_v44 = vld [vmem:[%s1420_s1 + $0x90] sm:$0xff] (!%p895_p6)  ;;  %v1092_v34 = vmov (!%p895_p6), 0.0   ;;  %vm560_vm2 = vcmask (!%p895_p6), 64512  }
  0x3f   : > { %339 = sbr.rel (%p895_p6) target bundleno = 569 (0x239), region = 44  ;;  %v357_v40 = vld [vmem:[%s1420_s1] sm:$0xff] (!%p895_p6)  ;;  %v973_v42 = vpack.c.bf16 (!%p895_p6), %v374_v39, %v373_v38  ;;  %v358_v43 = vld [vmem:[%s1420_s1 + $0x8] sm:$0xff] (!%p895_p6)  ;;  %v376_v45 = vld [vmem:[%s1420_s1 + $0x98] sm:$0xff] (!%p895_p6) }
  0x40   : > { %v975_v46 = vpack.c.bf16 (!%p895_p6), %v358_v43, %v357_v40  ;;  %v977_v47 = vpack.c.bf16 (!%p895_p6), %v376_v45, %v375_v44  ;;  %v359_v48 = vld [vmem:[%s1420_s1 + $0x10] sm:$0xff] (!%p895_p6)  ;;  %v360_v49 = vld [vmem:[%s1420_s1 + $0x18] sm:$0xff] (!%p895_p6)  ;;  %v377_v50 = vld [vmem:[%s1420_s1 + $0xa0] sm:$0xff] (!%p895_p6)  ;;  %v1214_v52 = vshrl.u32 (!%p895_p6), %v390_v41, 7 }
  0x41   : > { %974 = vmatprep.subr.bf16.mxu0 (!%p895_p6), %v973_v42  ;;  %1006 = vmatprep.subr.bf16.mxu1 (!%p895_p6), %v973_v42  ;;  %v378_v51 = vld [vmem:[%s1420_s1 + $0xa8] sm:$0xff] (!%p895_p6)  ;;  %v979_v53 = vpack.c.bf16 (!%p895_p6), %v360_v49, %v359_v48  ;;  %v361_v55 = vld [vmem:[%s1420_s1 + $0x20] sm:$0xff] (!%p895_p6)  ;;  %v379_v57 = vld [vmem:[%s1420_s1 + $0xb0] sm:$0xff] (!%p895_p6) }
  0x42   : > { %976 = vmatpush3.bf16.msra.mxu0 (!%p895_p6), %v975_v46  ;;  %1008 = vmatpush3.bf16.msra.mxu1 (!%p895_p6), %v975_v46  ;;  %v981_v54 = vpack.c.bf16 (!%p895_p6), %v378_v51, %v377_v50  ;;  %v362_v56 = vld [vmem:[%s1420_s1 + $0x28] sm:$0xff] (!%p895_p6)  ;;  %v380_v58 = vld [vmem:[%s1420_s1 + $0xb8] sm:$0xff] (!%p895_p6)  ;;  %v396_v59 = vsub.s32 (!%p895_p6), 1, %v1214_v52  ;;  %v363_v62 = vld [vmem:[%s1420_s1 + $0x30] sm:$0xff] (!%p895_p6)  ;;  %v1284_v28 = vsub.s32 (!%p895_p6), 0, %v1214_v52 }
  0x43   : > { %978 = vmatprep.subr.bf16.mxu0 (!%p895_p6), %v977_v47  ;;  %1010 = vmatprep.subr.bf16.mxu1 (!%p895_p6), %v977_v47  ;;  %v983_v60 = vpack.c.bf16 (!%p895_p6), %v362_v56, %v361_v55  ;;  %v985_v61 = vpack.c.bf16 (!%p895_p6), %v380_v58, %v379_v57  ;;  %v364_v63 = vld [vmem:[%s1420_s1 + $0x38] sm:$0xff] (!%p895_p6)  ;;  %v381_v0 = vld [vmem:[%s1420_s1 + $0xc0] sm:$0xff] (!%p895_p6)  ;;  %v382_v1 = vld [vmem:[%s1420_s1 + $0xc8] sm:$0xff] (!%p895_p6) }
  0x44   : > { %v356_v2 = vld [vmem:[#allocation2] sm:$0x3] (!%p895_p6)  ;;  %v470_v4 = vld [vmem:[#allocation3] sm:$0x3] (!%p895_p6)  ;;  %v987_v5 = vpack.c.bf16 (!%p895_p6), %v364_v63, %v363_v62  ;;  %v989_v7 = vpack.c.bf16 (!%p895_p6), %v382_v1, %v381_v0  ;;  %v366_v9 = vld [vmem:[%s1420_s1 + $0x48] sm:$0xff] (!%p895_p6) }
  0x45   : > { %v397_v3 = vrot.slane (!%p895_p6), %v356_v2, %v396_v59  ;;  %v479_v6 = vrot.slane (!%p895_p6), %v470_v4, %v396_v59  ;;  %v365_v8 = vld [vmem:[%s1420_s1 + $0x40] sm:$0xff] (!%p895_p6)  ;;  %v383_v10 = vld [vmem:[%s1420_s1 + $0xd0] sm:$0xff] (!%p895_p6)  ;;  %v384_v11 = vld [vmem:[%s1420_s1 + $0xd8] sm:$0xff] (!%p895_p6)  ;;  %v393_v30 = vrot.slane (!%p895_p6), %v356_v2, %v1284_v28  ;;  %v475_v31 = vrot.slane (!%p895_p6), %v470_v4, %v1284_v28 }
  0x46   : > { %980 = vmatpush3.bf16.msra.mxu0 %v979_v53  ;;  %1012 = vmatpush3.bf16.msra.mxu1 %v979_v53  ;;  %v991_v12 = vpack.c.bf16 %v366_v9, %v365_v8  ;;  %v993_v13 = vpack.c.bf16 %v384_v11, %v383_v10  ;;  %v367_v14 = vld [vmem:[%s1420_s1 + $0x50] sm:$0xff]  ;;  %v368_v15 = vld [vmem:[%s1420_s1 + $0x58] sm:$0xff]  ;;  %v385_v16 = vld [vmem:[%s1420_s1 + $0xe0] sm:$0xff] }
  0x47   : > { %982 = vmatprep.subr.bf16.mxu0 %v981_v54  ;;  %1014 = vmatprep.subr.bf16.mxu1 %v981_v54  ;;  %v386_v17 = vld [vmem:[%s1420_s1 + $0xe8] sm:$0xff]  ;;  %v995_v18 = vpack.c.bf16 %v368_v15, %v367_v14  ;;  %v369_v20 = vld [vmem:[%s1420_s1 + $0x60] sm:$0xff]  ;;  %v387_v22 = vld [vmem:[%s1420_s1 + $0xf0] sm:$0xff] }
  0x48   : > { %464 = vmatprep.mubr.f32.mxu0 %v397_v3  ;;  %546 = vmatprep.mubr.f32.mxu1 %v479_v6  ;;  %v997_v19 = vpack.c.bf16 %v386_v17, %v385_v16  ;;  %v370_v21 = vld [vmem:[%s1420_s1 + $0x68] sm:$0xff]  ;;  %v388_v23 = vld [vmem:[%s1420_s1 + $0xf8] sm:$0xff]  ;;  %v371_v26 = vld [vmem:[%s1420_s1 + $0x70] sm:$0xff] }
  0x49   : > { %v999_v24 = vpack.c.bf16 %v370_v21, %v369_v20  ;;  %v1001_v25 = vpack.c.bf16 %v388_v23, %v387_v22  ;;  %v372_v27 = vld [vmem:[%s1420_s1 + $0x78] sm:$0xff]  ;;  %v559_v32 = vld [vmem:[%s1421_s2 + $0x8] sm:$0xff]  ;;  %v558_v33 = vld [vmem:[%s1421_s2] sm:$0xff] }
  0x4a   : > { %984 = vmatpush3.bf16.msra.mxu0 %v983_v60  ;;  %1016 = vmatpush3.bf16.msra.mxu1 %v983_v60  ;;  %v1003_v29 = vpack.c.bf16 %v372_v27, %v371_v26  ;;  %v340_v48 = vld [vmem:[%s1419_s0] sm:$0xff]  ;;  %v342_v50 = vld [vmem:[%s1419_s0 + $0x10] sm:$0xff]  ;;  %v343_v62 = vld [vmem:[%s1419_s0 + $0x18] sm:$0xff] }
  0x4b   : > { %986 = vmatprep.subr.bf16.mxu0 %v985_v61  ;;  %1018 = vmatprep.subr.bf16.mxu1 %v985_v61  ;;  %v344_v51 = vld [vmem:[%s1419_s0 + $0x20] sm:$0xff]  ;;  %v346_v52 = vld [vmem:[%s1419_s0 + $0x30] sm:$0xff]  ;;  %v341_v61 = vld [vmem:[%s1419_s0 + $0x8] sm:$0xff] }
  0x4c   : > { %v348_v55 = vld [vmem:[%s1419_s0 + $0x40] sm:$0xff]  ;;  %v350_v56 = vld [vmem:[%s1419_s0 + $0x50] sm:$0xff]  ;;  %v345_v2 = vld [vmem:[%s1419_s0 + $0x28] sm:$0xff] }
  0x4d   : > { %v352_v57 = vld [vmem:[%s1419_s0 + $0x60] sm:$0xff]  ;;  %v354_v60 = vld [vmem:[%s1419_s0 + $0x70] sm:$0xff]  ;;  %v347_v3 = vld [vmem:[%s1419_s0 + $0x38] sm:$0xff] }
  0x4e   : > { %988 = vmatpush3.bf16.msra.mxu0 %v987_v5  ;;  %1020 = vmatpush3.bf16.msra.mxu1 %v987_v5  ;;  %v349_v4 = vld [vmem:[%s1419_s0 + $0x48] sm:$0xff]  ;;  %v351_v9 = vld [vmem:[%s1419_s0 + $0x58] sm:$0xff] }
  0x4f   : > { %990 = vmatprep.subr.bf16.mxu0 %v989_v7  ;;  %1022 = vmatprep.subr.bf16.mxu1 %v989_v7  ;;  %v353_v10 = vld [vmem:[%s1419_s0 + $0x68] sm:$0xff]  ;;  %v355_v11 = vld [vmem:[%s1419_s0 + $0x78] sm:$0xff] }
  0x52   : > { %992 = vmatpush3.bf16.msra.mxu0 %v991_v12  ;;  %1024 = vmatpush3.bf16.msra.mxu1 %v991_v12 }
  0x53   : > { %994 = vmatprep.subr.bf16.mxu0 %v993_v13  ;;  %1026 = vmatprep.subr.bf16.mxu1 %v993_v13 }
  0x56   : > { %996 = vmatpush3.bf16.msra.mxu0 %v995_v18  ;;  %1028 = vmatpush3.bf16.msra.mxu1 %v995_v18 }
  0x57   : > { %998 = vmatprep.subr.bf16.mxu0 %v997_v19  ;;  %1030 = vmatprep.subr.bf16.mxu1 %v997_v19 }
  0x5a   : > { %1000 = vmatpush3.bf16.msra.mxu0 %v999_v24  ;;  %1032 = vmatpush3.bf16.msra.mxu1 %v999_v24 }
  0x5b   : > { %1002 = vmatprep.subr.bf16.mxu0 %v1001_v25  ;;  %1034 = vmatprep.subr.bf16.mxu1 %v1001_v25 }
  0x5e   : > { %1004 = vmatpush3.bf16.msra.mxu0 %v1003_v29  ;;  %1036 = vmatpush3.bf16.msra.mxu1 %v1003_v29 }
  0x5f   : > { %564 = vmatprep.subr.mxu0 %v559_v32  ;;  %639 = vmatprep.subr.mxu1 %v559_v32 }
  0x61   : > { %465 = vmatmul.mubr.f32.vlgmr.msra.gmra.mrb[0].mxu0 %v393_v30  ;;  %547 = vmatmul.mubr.f32.vlgmr.msra.gmra.mrb[0].mxu1 %v475_v31 }
  0x62   : > { %565 = vmatpush1.msra.mxu0 %v558_v33  ;;  %640 = vmatpush1.msra.mxu1 %v558_v33 }
  0x63   : > { %628 = vmatprep.mubr.f32.mxu0 %v1092_v34  ;;  %703 = vmatprep.mubr.f32.mxu1 %v1092_v34 }
 0x134   : > { %v935_v35 = vpop.f32.mrb[0].mxu0  ;;  %v970_v36 = vpop.f32.mrb[0].mxu1 }
 0x135   : > { %v936_v37 = vpop.f32.mrb[1].mxu0  ;;  %v971_v38 = vpop.f32.mrb[1].mxu1 }
 0x136   : > { %v937_v39 = vadd.f32 %v936_v37, %v935_v35  ;;  %v972_v40 = vadd.f32 %v971_v38, %v970_v36 }
 0x138   : > { %v552_v41 = vmul.f32 0.00048828125, %v937_v39  ;;  %v553_v42 = vmul.f32 0.00048828125, %v972_v40 }
 0x13a   : > { %v554_v43 = vmul.f32 %v552_v41, %v552_v41 }
 0x13c   : > { %v555_v44 = vsub.f32 %v553_v42, %v554_v43 }
 0x13e   : > { %v556_v45 = vadd.f32 1e-05, %v555_v44 }
 0x140   : > { %1064 = vrsqrt.f32 %v556_v45 }
 0x14a   : > { %v1065_v46 = vpop.eup %1064 }
 0x14b   : > { %896 = vmatmul.mubr.msk.f32.vlgmr.msra.gmra.mrb[2].mxu0 %vm560_vm2, %v1065_v46  ;;  %v635_v47 = vmul.f32 %v1065_v46, %v552_v41 }
 0x14d   : > { %897 = vmatmul.mubr.msk.f32.vlgmr.msra.gmra.mrb[2].mxu1 %vm560_vm2, %v635_v47 }
 0x21e   : > { %v630_v49 = vpop.f32.mrb[2].mxu0 }
 0x21f   : > { %v713_v53 = vrot.slane %v630_v49, %v1284_v28  ;;  %v632_v54 = vpop.f32.mrb[3].mxu0 }
 0x220   : > { %v717_v58 = vrot.slane %v632_v54, %v1284_v28  ;;  %v705_v59 = vpop.f32.mrb[2].mxu1 }
 0x221   : > { %v707_v63 = vpop.f32.mrb[3].mxu1  ;;  %v718_v0 = vmul.f32 %v713_v53, %v340_v48  ;;  %v720_v1 = vmul.f32 %v713_v53, %v342_v50  ;;  %v722_v5 = vmul.f32 %v713_v53, %v344_v51  ;;  %v724_v6 = vmul.f32 %v713_v53, %v346_v52 }
 0x222   : > { %v726_v7 = vmul.f32 %v713_v53, %v348_v55  ;;  %v728_v8 = vmul.f32 %v713_v53, %v350_v56  ;;  %v730_v12 = vmul.f32 %v713_v53, %v352_v57  ;;  %v732_v13 = vmul.f32 %v713_v53, %v354_v60 }
 0x223   : > { %v719_v14 = vmul.f32 %v717_v58, %v341_v61  ;;  %v721_v15 = vmul.f32 %v717_v58, %v343_v62  ;;  %v723_v16 = vmul.f32 %v717_v58, %v345_v2  ;;  %v725_v17 = vmul.f32 %v717_v58, %v347_v3 }
 0x224   : > { %v727_v18 = vmul.f32 %v717_v58, %v349_v4  ;;  %v737_v19 = vrot.slane %v705_v59, %v1284_v28  ;;  %v729_v20 = vmul.f32 %v717_v58, %v351_v9  ;;  %v731_v21 = vmul.f32 %v717_v58, %v353_v10 }
 0x225   : > { %v733_v22 = vmul.f32 %v717_v58, %v355_v11  ;;  %v741_v23 = vrot.slane %v707_v63, %v1284_v28 }
 0x226   : > { %v742_v24 = vsub.f32 %v718_v0, %v737_v19  ;;  %v744_v25 = vsub.f32 %v720_v1, %v737_v19  ;;  %v746_v26 = vsub.f32 %v722_v5, %v737_v19  ;;  %v748_v27 = vsub.f32 %v724_v6, %v737_v19 }
 0x227   : > { %v750_v29 = vsub.f32 %v726_v7, %v737_v19  ;;  %v752_v30 = vsub.f32 %v728_v8, %v737_v19  ;;  %v754_v31 = vsub.f32 %v730_v12, %v737_v19  ;;  %v756_v32 = vsub.f32 %v732_v13, %v737_v19 }
 0x228   : > { %vm758_vm3 = vcmp.gt.f32.partialorder %v742_v24, 0.0  ;;  %vm760_vm4 = vcmp.gt.f32.partialorder %v744_v25, 0.0  ;;  %vm762_vm5 = vcmp.gt.f32.partialorder %v746_v26, 0.0  ;;  %vm764_vm6 = vcmp.gt.f32.partialorder %v748_v27, 0.0 }
 0x229   : > { %vm766_vm7 = vcmp.gt.f32.partialorder %v750_v29, 0.0  ;;  %vm768_vm8 = vcmp.gt.f32.partialorder %v752_v30, 0.0  ;;  %vm770_vm9 = vcmp.gt.f32.partialorder %v754_v31, 0.0  ;;  %vm772_vm10 = vcmp.gt.f32.partialorder %v756_v32, 0.0 }
 0x22a   : > { %v774_v33 = vmul.f32 0.2, %v742_v24  ;;  %v776_v34 = vmul.f32 0.2, %v744_v25  ;;  %v778_v35 = vmul.f32 0.2, %v746_v26  ;;  %v743_v28 = vsub.f32 %v719_v14, %v741_v23 }
 0x22b   : > { %v780_v36 = vmul.f32 0.2, %v748_v27  ;;  %v782_v37 = vmul.f32 0.2, %v750_v29  ;;  %v784_v38 = vmul.f32 0.2, %v752_v30  ;;  %v745_v39 = vsub.f32 %v721_v15, %v741_v23 }
 0x22c   : > { %v786_v40 = vmul.f32 0.2, %v754_v31  ;;  %v788_v41 = vmul.f32 0.2, %v756_v32  ;;  %v790_v42 = vsel %vm758_vm3, %v742_v24, %v774_v33  ;;  %v792_v43 = vsel %vm760_vm4, %v744_v25, %v776_v34 }
 0x22d   : > { %v794_v44 = vsel %vm762_vm5, %v746_v26, %v778_v35  ;;  %v796_v45 = vsel %vm764_vm6, %v748_v27, %v780_v36  ;;  %v798_v46 = vsel %vm766_vm7, %v750_v29, %v782_v37  ;;  %v800_v47 = vsel %vm768_vm8, %v752_v30, %v784_v38  ;;  %806 = vst [vmem:[%s1422_s3] sm:$0xff] %v790_v42 }
 0x22e   : > { %808 = vst [vmem:[%s1422_s3 + $0x10] sm:$0xff] %v792_v43  ;;  %v802_v48 = vsel %vm770_vm9, %v754_v31, %v786_v40  ;;  %v804_v49 = vsel %vm772_vm10, %v756_v32, %v788_v41  ;;  %810 = vst [vmem:[%s1422_s3 + $0x20] sm:$0xff] %v794_v44  ;;  %v747_v50 = vsub.f32 %v723_v16, %v741_v23  ;;  %vm759_vm11 = vcmp.gt.f32.partialorder %v743_v28, 0.0 }
 0x22f   : > { %812 = vst [vmem:[%s1422_s3 + $0x30] sm:$0xff] %v796_v45  ;;  %814 = vst [vmem:[%s1422_s3 + $0x40] sm:$0xff] %v798_v46  ;;  %v749_v51 = vsub.f32 %v725_v17, %v741_v23  ;;  %v751_v52 = vsub.f32 %v727_v18, %v741_v23  ;;  %v753_v53 = vsub.f32 %v729_v20, %v741_v23  ;;  %vm761_vm12 = vcmp.gt.f32.partialorder %v745_v39, 0.0 }
 0x230   : > { %816 = vst [vmem:[%s1422_s3 + $0x50] sm:$0xff] %v800_v47  ;;  %818 = vst [vmem:[%s1422_s3 + $0x60] sm:$0xff] %v802_v48  ;;  %v755_v54 = vsub.f32 %v731_v21, %v741_v23  ;;  %v757_v55 = vsub.f32 %v733_v22, %v741_v23  ;;  %vm763_vm13 = vcmp.gt.f32.partialorder %v747_v50, 0.0  ;;  %v775_v56 = vmul.f32 0.2, %v743_v28 }
 0x231   : > { %820 = vst [vmem:[%s1422_s3 + $0x70] sm:$0xff] %v804_v49  ;;  %vm765_vm14 = vcmp.gt.f32.partialorder %v749_v51, 0.0  ;;  %vm767_vm15 = vcmp.gt.f32.partialorder %v751_v52, 0.0  ;;  %vm769_vm0 = vcmp.gt.f32.partialorder %v753_v53, 0.0  ;;  %v777_v57 = vmul.f32 0.2, %v745_v39 }
 0x232   : > { %vm771_vm1 = vcmp.gt.f32.partialorder %v755_v54, 0.0  ;;  %vm773_vm2 = vcmp.gt.f32.partialorder %v757_v55, 0.0  ;;  %v779_v58 = vmul.f32 0.2, %v747_v50  ;;  %v781_v59 = vmul.f32 0.2, %v749_v51 }
 0x233   : > { %v783_v60 = vmul.f32 0.2, %v751_v52  ;;  %v785_v61 = vmul.f32 0.2, %v753_v53  ;;  %v787_v62 = vmul.f32 0.2, %v755_v54  ;;  %v791_v0 = vsel %vm759_vm11, %v743_v28, %v775_v56 }
 0x234   : > { %v789_v63 = vmul.f32 0.2, %v757_v55  ;;  %v793_v1 = vsel %vm761_vm12, %v745_v39, %v777_v57  ;;  %v795_v2 = vsel %vm763_vm13, %v747_v50, %v779_v58  ;;  %v797_v3 = vsel %vm765_vm14, %v749_v51, %v781_v59  ;;  %807 = vst [vmem:[%s1422_s3 + $0x8] sm:$0xff] %v791_v0 }
 0x235   : > { %v799_v4 = vsel %vm767_vm15, %v751_v52, %v783_v60  ;;  %v801_v5 = vsel %vm769_vm0, %v753_v53, %v785_v61  ;;  %809 = vst [vmem:[%s1422_s3 + $0x18] sm:$0xff] %v793_v1  ;;  %v803_v6 = vsel %vm771_vm1, %v755_v54, %v787_v62  ;;  %811 = vst [vmem:[%s1422_s3 + $0x28] sm:$0xff] %v795_v2 }
 0x236   : > { %v805_v7 = vsel %vm773_vm2, %v757_v55, %v789_v63  ;;  %813 = vst [vmem:[%s1422_s3 + $0x38] sm:$0xff] %v797_v3  ;;  %815 = vst [vmem:[%s1422_s3 + $0x48] sm:$0xff] %v799_v4 }
 0x237   : > { %817 = vst [vmem:[%s1422_s3 + $0x58] sm:$0xff] %v801_v5  ;;  %819 = vst [vmem:[%s1422_s3 + $0x68] sm:$0xff] %v803_v6 }
 0x238   : > { %821 = vst [vmem:[%s1422_s3 + $0x78] sm:$0xff] %v805_v7 }
 0x239 PF: > { %s13_s14 = sadd.s32 1, %s1088_s14   ;;  %s1423_s12 = smov %s1084_s13 }
 0x23a   : > { %p10_p7 = scmp.ge.s32.totalorder %s13_s14, 4   ;;  %s1424_s13 = smov %s1426_s15 }
 0x23c   :  { %12 = sbr.rel (!%p10_p7) target bundleno = 2 (0x2), region = 74 }

// kernel: generator_forward.15
= control target key start
LH: loop header
LB: loop body
LE: loop exit
PB: predicated region body
PF: predicated region fallthrough
CT: control target
= control target key end

     0   :  { %s1245_s12 = smov 0   ;;  %s1505_s0 = inlined_call_operand.vmem [shape: bf16[2240,32], index: 0, kind: input, shape index: {}]   ;;  %s1506_s1 = inlined_call_operand.vmem [shape: bf16[32,12], index: 1, kind: input, shape index: {}]   ;;  %s1507_s2 = inlined_call_operand.vmem [shape: f32[1,12], index: 2, kind: input, shape index: {}]   ;;  %s1508_s3 = inlined_call_operand.vmem [shape: f32[2240,12], index: 3, kind: output, shape index: {}]  }
   0x1 LB: > { %s905_s13 = sadd.s32 4294967295, %s1223_s12   ;;  %p909_p0 = scmp.ge.s32.totalorder %s1223_s12, 1  ;;  %s1223_s12 = sphi %s1245_s12, %s13_s12  }
   0x2   : > { %p138_p1 = scmp.lt.s32.totalorder %s1223_s12, 6 }
   0x4   : > { %p139_p2 = pnand %p909_p0, %p138_p1 }
   0x5   : > { %v1075_v0 = vld [vmem:[%s1506_s1] sm:$0xff] (!%p139_p2)   ;;  %s162_s16 = smul.u32 (!%p139_p2), 56, %s905_s13  ;;  %v1076_v1 = vld [vmem:[%s1506_s1 + $0x8] sm:$0xff] (!%p139_p2)   ;;  %vm394_vm0 = vcmask (!%p139_p2), 261120   ;;  %vm792_vm1 = vcmask (!%p139_p2), 97280  }
   0x6   : > { %142 = sbr.rel (%p139_p2) target bundleno = 301 (0x12d), region = 32  ;;  %1003 = vmatprep.subr.bf16.mxu0 (!%p139_p2), %v1075_v0  ;;  %1063 = vmatprep.subr.bf16.mxu1 (!%p139_p2), %v1075_v0  ;;  %v1326_v30 = vld [vmem:[%s1507_s2] ss:$0 sm:$0xff] (!%p139_p2) }
   0x7   : > { %p163_p3 = scmp.lt.s32.totalorder (!%p139_p2), %s162_s16, 279  ;;  %1004 = vmatpush3.bf16.msra.mxu0 (!%p139_p2), %v1075_v0  ;;  %1065 = vmatpush3.bf16.msra.mxu1 (!%p139_p2), %v1075_v0 }
   0x8   : > { %1005 = vmatprep.subr.bf16.mxu0 (!%p139_p2), %v1076_v1  ;;  %1064 = vmatprep.subr.bf16.mxu1 (!%p139_p2), %v1076_v1 }
   0xb   : > { %1006 = vmatpush3.bf16.msra.mxu0 (!%p139_p2), %v1076_v1  ;;  %1066 = vmatpush3.bf16.msra.mxu1 (!%p139_p2), %v1076_v1 }
   0xd   : > { %s1510_s16 = smov (!%p163_p3, %s162_s16), 279 }
   0xe   : > { %s910_s19 = sshll.u32 %s1510_s16, 2  ;;  %s911_s25 = sshll.u32 %s1510_s16, 3 }
   0xf   : > { %s1265_s22 = scalar_lea.vmem %s1505_s0, %s910_s19  ;;  %s1343_s28 = scalar_lea.vmem %s1508_s3, %s911_s25 }
  0x10   : > { %v1077_v2 = vld [vmem:[%s1265_s22] sm:$0xff]   ;;  %v1078_v3 = vld [vmem:[%s1265_s22 + $0x70] sm:$0xff]   ;;  %v1079_v4 = vld [vmem:[%s1265_s22 + $0x8] sm:$0xff]  }
  0x11   : > { %1007 = vmatprep.mubr.msk.bf16.mxu0 %vm394_vm0, %v1077_v2  ;;  %1035 = vmatprep.mubr.msk.bf16.mxu1 %vm394_vm0, %v1078_v3  ;;  %v1080_v5 = vld [vmem:[%s1265_s22 + $0x78] sm:$0xff]   ;;  %v1081_v6 = vld [vmem:[%s1265_s22 + $0x10] sm:$0xff]   ;;  %v1082_v7 = vld [vmem:[%s1265_s22 + $0x80] sm:$0xff]  }
  0x12   : > { %1008 = vmatmul.mubr.msk.bf16.vlgmr.msra.gmra.mrb[0].mxu0 %vm394_vm0, %v1079_v4  ;;  %1036 = vmatmul.mubr.msk.bf16.vlgmr.msra.gmra.mrb[0].mxu1 %vm394_vm0, %v1080_v5  ;;  %v1083_v8 = vld [vmem:[%s1265_s22 + $0x18] sm:$0xff]   ;;  %v1084_v9 = vld [vmem:[%s1265_s22 + $0x88] sm:$0xff]   ;;  %v1085_v10 = vld [vmem:[%s1265_s22 + $0x20] sm:$0xff]  }
  0x13   : > { %1011 = vmatprep.mubr.msk.bf16.mxu0 %vm394_vm0, %v1081_v6  ;;  %1039 = vmatprep.mubr.msk.bf16.mxu1 %vm394_vm0, %v1082_v7  ;;  %v1086_v11 = vld [vmem:[%s1265_s22 + $0x90] sm:$0xff]   ;;  %v1087_v12 = vld [vmem:[%s1265_s22 + $0x28] sm:$0xff]   ;;  %v1088_v13 = vld [vmem:[%s1265_s22 + $0x98] sm:$0xff]  }
  0x14   : > { %v1089_v14 = vld [vmem:[%s1265_s22 + $0x30] sm:$0xff]   ;;  %v1090_v15 = vld [vmem:[%s1265_s22 + $0xa0] sm:$0xff]   ;;  %v1091_v16 = vld [vmem:[%s1265_s22 + $0x38] sm:$0xff]  }
  0x15   : > { %v1092_v17 = vld [vmem:[%s1265_s22 + $0xa8] sm:$0xff]   ;;  %v1093_v18 = vld [vmem:[%s1265_s22 + $0x40] sm:$0xff]   ;;  %v1094_v19 = vld [vmem:[%s1265_s22 + $0xb0] sm:$0xff]  }
  0x16   : > { %v1095_v20 = vld [vmem:[%s1265_s22 + $0x48] sm:$0xff]   ;;  %v1096_v21 = vld [vmem:[%s1265_s22 + $0xb8] sm:$0xff]   ;;  %v1097_v22 = vld [vmem:[%s1265_s22 + $0x50] sm:$0xff]  }
  0x17   : > { %v1098_v23 = vld [vmem:[%s1265_s22 + $0xc0] sm:$0xff]   ;;  %v1099_v24 = vld [vmem:[%s1265_s22 + $0x58] sm:$0xff]   ;;  %v1100_v25 = vld [vmem:[%s1265_s22 + $0xc8] sm:$0xff]  }
  0x18   : > { %v1101_v26 = vld [vmem:[%s1265_s22 + $0x60] sm:$0xff]   ;;  %v1102_v27 = vld [vmem:[%s1265_s22 + $0xd0] sm:$0xff]   ;;  %v1103_v28 = vld [vmem:[%s1265_s22 + $0x68] sm:$0xff]  }
  0x19   : > { %v1104_v29 = vld [vmem:[%s1265_s22 + $0xd8] sm:$0xff]  }
  0x1a   : > { %1012 = vmatmul.mubr.msk.bf16.gmra.mrb[4].mxu0 %vm394_vm0, %v1083_v8  ;;  %1040 = vmatmul.mubr.msk.bf16.gmra.mrb[4].mxu1 %vm394_vm0, %v1084_v9 }
  0x1b   : > { %1015 = vmatprep.mubr.msk.bf16.mxu0 %vm394_vm0, %v1085_v10  ;;  %1043 = vmatprep.mubr.msk.bf16.mxu1 %vm394_vm0, %v1086_v11 }
  0x22   : > { %1016 = vmatmul.mubr.msk.bf16.gmra.mrb[8].mxu0 %vm394_vm0, %v1087_v12  ;;  %1044 = vmatmul.mubr.msk.bf16.gmra.mrb[8].mxu1 %vm394_vm0, %v1088_v13 }
  0x23   : > { %1019 = vmatprep.mubr.msk.bf16.mxu0 %vm394_vm0, %v1089_v14  ;;  %1047 = vmatprep.mubr.msk.bf16.mxu1 %vm394_vm0, %v1090_v15 }
  0x2a   : > { %1020 = vmatmul.mubr.msk.bf16.gmra.mrb[12].mxu0 %vm394_vm0, %v1091_v16  ;;  %1048 = vmatmul.mubr.msk.bf16.gmra.mrb[12].mxu1 %vm394_vm0, %v1092_v17 }
  0x2b   : > { %1023 = vmatprep.mubr.msk.bf16.mxu0 %vm394_vm0, %v1093_v18  ;;  %1051 = vmatprep.mubr.msk.bf16.mxu1 %vm394_vm0, %v1094_v19 }
  0x32   : > { %1024 = vmatmul.mubr.msk.bf16.gmra.mrb[16].mxu0 %vm394_vm0, %v1095_v20  ;;  %1052 = vmatmul.mubr.msk.bf16.gmra.mrb[16].mxu1 %vm394_vm0, %v1096_v21 }
  0x33   : > { %1027 = vmatprep.mubr.msk.bf16.mxu0 %vm394_vm0, %v1097_v22  ;;  %1055 = vmatprep.mubr.msk.bf16.mxu1 %vm394_vm0, %v1098_v23 }
  0x3a   : > { %1028 = vmatmul.mubr.msk.bf16.gmra.mrb[20].mxu0 %vm394_vm0, %v1099_v24  ;;  %1056 = vmatmul.mubr.msk.bf16.gmra.mrb[20].mxu1 %vm394_vm0, %v1100_v25 }
  0x3b   : > { %1031 = vmatprep.mubr.msk.bf16.mxu0 %vm394_vm0, %v1101_v26  ;;  %1059 = vmatprep.mubr.msk.bf16.mxu1 %vm394_vm0, %v1102_v27 }
  0x42   : > { %1032 = vmatmul.mubr.msk.bf16.gmra.mrb[24].mxu0 %vm394_vm0, %v1103_v28  ;;  %1060 = vmatmul.mubr.msk.bf16.gmra.mrb[24].mxu1 %vm394_vm0, %v1104_v29 }
  0xe5   : > { %v1009_v31 = vpop.f32.mrb[0].mxu0  ;;  %v1037_v33 = vpop.f32.mrb[0].mxu1 }
  0xe6   : > { %v522_v32 = vadd.f32 %v1009_v31, %v1326_v30  ;;  %v513_v34 = vpop.f32.mrb[1].mxu0  ;;  %v634_v35 = vadd.f32 %v1037_v33, %v1326_v30  ;;  %v625_v37 = vpop.f32.mrb[1].mxu1 }
  0xe7   : > { %v514_v36 = vadd.f32 %v1326_v30, %v513_v34  ;;  %v1010_v38 = vpop.f32.mrb[2].mxu0  ;;  %v626_v39 = vadd.f32 %v1326_v30, %v625_v37  ;;  %v1038_v41 = vpop.f32.mrb[2].mxu1 }
  0xe8   : > { %1105 = vtanh.f32 %v522_v32  ;;  %v525_v40 = vadd.f32 %v1010_v38, %v1326_v30  ;;  %v516_v42 = vpop.f32.mrb[3].mxu0  ;;  %v637_v43 = vadd.f32 %v1038_v41, %v1326_v30  ;;  %v628_v44 = vpop.f32.mrb[3].mxu1 }
  0xe9   : > { %1107 = vtanh.f32 %v634_v35  ;;  %v517_v45 = vadd.f32 %v1326_v30, %v516_v42  ;;  %v629_v46 = vadd.f32 %v1326_v30, %v628_v44 }
  0xea   : > { %1109 = vtanh.f32 %v514_v36 }
  0xeb   : > { %1111 = vtanh.f32 %v626_v39 }
  0xec   : > { %1113 = vtanh.f32 %v525_v40 }
  0xed   : > { %1115 = vtanh.f32 %v637_v43  ;;  %v1013_v47 = vpop.f32.mrb[4].mxu0  ;;  %v1041_v49 = vpop.f32.mrb[4].mxu1 }
  0xee   : > { %1117 = vtanh.f32 %v517_v45  ;;  %v538_v48 = vadd.f32 %v1013_v47, %v1326_v30  ;;  %v529_v50 = vpop.f32.mrb[5].mxu0  ;;  %v650_v51 = vadd.f32 %v1041_v49, %v1326_v30  ;;  %v641_v53 = vpop.f32.mrb[5].mxu1 }
  0xef   : > { %1119 = vtanh.f32 %v629_v46  ;;  %v530_v52 = vadd.f32 %v1326_v30, %v529_v50  ;;  %v1014_v54 = vpop.f32.mrb[6].mxu0  ;;  %v642_v55 = vadd.f32 %v1326_v30, %v641_v53  ;;  %v1042_v57 = vpop.f32.mrb[6].mxu1 }
  0xf0   : > { %1121 = vtanh.f32 %v538_v48  ;;  %v541_v56 = vadd.f32 %v1014_v54, %v1326_v30  ;;  %v532_v58 = vpop.f32.mrb[7].mxu0  ;;  %v653_v59 = vadd.f32 %v1042_v57, %v1326_v30  ;;  %v644_v60 = vpop.f32.mrb[7].mxu1 }
  0xf1   : > { %1123 = vtanh.f32 %v650_v51  ;;  %v533_v62 = vadd.f32 %v1326_v30, %v532_v58  ;;  %v645_v0 = vadd.f32 %v1326_v30, %v644_v60 }
  0xf2   : > { %v1106_v61 = vpop.eup %1105  ;;  %1125 = vtanh.f32 %v530_v52 }
  0xf3   : > { %v1108_v63 = vpop.eup %1107  ;;  %795 = vst.msk [vmem:[%s1343_s28 + $0x10] sm:$0xff] %vm792_vm1, %v1106_v61  ;;  %1127 = vtanh.f32 %v642_v55 }
  0xf4   : > { %v1110_v1 = vpop.eup %1109  ;;  %823 = vst.msk [vmem:[%s1343_s28 + $0xf0] sm:$0xff] %vm792_vm1, %v1108_v63  ;;  %1129 = vtanh.f32 %v541_v56 }
  0xf5   : > { %v1112_v2 = vpop.eup %1111  ;;  %793 = vst.msk [vmem:[%s1343_s28] sm:$0xff] %vm792_vm1, %v1110_v1  ;;  %1131 = vtanh.f32 %v653_v59  ;;  %v1017_v3 = vpop.f32.mrb[8].mxu0 }
  0xf6   : > { %v1114_v4 = vpop.eup %1113  ;;  %821 = vst.msk [vmem:[%s1343_s28 + $0xe0] sm:$0xff] %vm792_vm1, %v1112_v2  ;;  %1133 = vtanh.f32 %v533_v62  ;;  %v554_v5 = vadd.f32 %v1017_v3, %v1326_v30  ;;  %v1045_v6 = vpop.f32.mrb[8].mxu1 }
  0xf7   : > { %v545_v7 = vpop.f32.mrb[9].mxu0  ;;  %v1116_v8 = vpop.eup %1115  ;;  %796 = vst.msk [vmem:[%s1343_s28 + $0x18] sm:$0xff] %vm792_vm1, %v1114_v4  ;;  %1135 = vtanh.f32 %v645_v0  ;;  %v666_v9 = vadd.f32 %v1045_v6, %v1326_v30 }
  0xf8   : > { %v546_v10 = vadd.f32 %v1326_v30, %v545_v7  ;;  %v657_v11 = vpop.f32.mrb[9].mxu1  ;;  %v1018_v12 = vpop.f32.mrb[10].mxu0  ;;  %824 = vst.msk [vmem:[%s1343_s28 + $0xf8] sm:$0xff] %vm792_vm1, %v1116_v8  ;;  %1137 = vtanh.f32 %v554_v5 }
  0xf9   : > { %v1118_v13 = vpop.eup %1117  ;;  %v658_v14 = vadd.f32 %v1326_v30, %v657_v11  ;;  %v557_v15 = vadd.f32 %v1018_v12, %v1326_v30  ;;  %v1046_v16 = vpop.f32.mrb[10].mxu1  ;;  %1139 = vtanh.f32 %v666_v9 }
  0xfa   : > { %v548_v17 = vpop.f32.mrb[11].mxu0  ;;  %v1120_v18 = vpop.eup %1119  ;;  %794 = vst.msk [vmem:[%s1343_s28 + $0x8] sm:$0xff] %vm792_vm1, %v1118_v13  ;;  %v669_v19 = vadd.f32 %v1046_v16, %v1326_v30  ;;  %1141 = vtanh.f32 %v546_v10 }
  0xfb   : > { %v660_v20 = vpop.f32.mrb[11].mxu1  ;;  %v1122_v21 = vpop.eup %1121  ;;  %822 = vst.msk [vmem:[%s1343_s28 + $0xe8] sm:$0xff] %vm792_vm1, %v1120_v18  ;;  %v549_v22 = vadd.f32 %v1326_v30, %v548_v17  ;;  %1143 = vtanh.f32 %v658_v14 }
  0xfc   : > { %v1124_v23 = vpop.eup %1123  ;;  %799 = vst.msk [vmem:[%s1343_s28 + $0x30] sm:$0xff] %vm792_vm1, %v1122_v21  ;;  %v661_v24 = vadd.f32 %v1326_v30, %v660_v20  ;;  %1145 = vtanh.f32 %v557_v15 }
  0xfd   : > { %v1126_v25 = vpop.eup %1125  ;;  %827 = vst.msk [vmem:[%s1343_s28 + $0x110] sm:$0xff] %vm792_vm1, %v1124_v23  ;;  %1147 = vtanh.f32 %v669_v19  ;;  %v1021_v27 = vpop.f32.mrb[12].mxu0 }
  0xfe   : > { %v1128_v26 = vpop.eup %1127  ;;  %797 = vst.msk [vmem:[%s1343_s28 + $0x20] sm:$0xff] %vm792_vm1, %v1126_v25  ;;  %1149 = vtanh.f32 %v549_v22  ;;  %v570_v29 = vadd.f32 %v1021_v27, %v1326_v30  ;;  %v1049_v31 = vpop.f32.mrb[12].mxu1 }
  0xff   : > { %v1130_v28 = vpop.eup %1129  ;;  %825 = vst.msk [vmem:[%s1343_s28 + $0x100] sm:$0xff] %vm792_vm1, %v1128_v26  ;;  %v561_v32 = vpop.f32.mrb[13].mxu0  ;;  %1151 = vtanh.f32 %v661_v24  ;;  %v682_v34 = vadd.f32 %v1049_v31, %v1326_v30 }
 0x100   : > { %v1132_v33 = vpop.eup %1131  ;;  %800 = vst.msk [vmem:[%s1343_s28 + $0x38] sm:$0xff] %vm792_vm1, %v1130_v28  ;;  %v562_v35 = vadd.f32 %v1326_v30, %v561_v32  ;;  %v673_v36 = vpop.f32.mrb[13].mxu1  ;;  %1153 = vtanh.f32 %v570_v29 }
 0x101   : > { %v1022_v37 = vpop.f32.mrb[14].mxu0  ;;  %v1134_v38 = vpop.eup %1133  ;;  %828 = vst.msk [vmem:[%s1343_s28 + $0x118] sm:$0xff] %vm792_vm1, %v1132_v33  ;;  %v674_v39 = vadd.f32 %v1326_v30, %v673_v36  ;;  %1155 = vtanh.f32 %v682_v34 }
 0x102   : > { %v573_v40 = vadd.f32 %v1022_v37, %v1326_v30  ;;  %v1050_v41 = vpop.f32.mrb[14].mxu1  ;;  %v564_v42 = vpop.f32.mrb[15].mxu0  ;;  %798 = vst.msk [vmem:[%s1343_s28 + $0x28] sm:$0xff] %vm792_vm1, %v1134_v38  ;;  %1157 = vtanh.f32 %v562_v35 }
 0x103   : > { %v1136_v43 = vpop.eup %1135  ;;  %v685_v44 = vadd.f32 %v1050_v41, %v1326_v30  ;;  %v676_v45 = vpop.f32.mrb[15].mxu1  ;;  %v565_v47 = vadd.f32 %v1326_v30, %v564_v42  ;;  %1159 = vtanh.f32 %v674_v39 }
 0x104   : > { %v1138_v46 = vpop.eup %1137  ;;  %826 = vst.msk [vmem:[%s1343_s28 + $0x108] sm:$0xff] %vm792_vm1, %v1136_v43  ;;  %v677_v49 = vadd.f32 %v1326_v30, %v676_v45  ;;  %1161 = vtanh.f32 %v573_v40 }
 0x105   : > { %v1140_v48 = vpop.eup %1139  ;;  %803 = vst.msk [vmem:[%s1343_s28 + $0x50] sm:$0xff] %vm792_vm1, %v1138_v46  ;;  %1163 = vtanh.f32 %v685_v44  ;;  %v1025_v52 = vpop.f32.mrb[16].mxu0 }
 0x106   : > { %v1142_v50 = vpop.eup %1141  ;;  %831 = vst.msk [vmem:[%s1343_s28 + $0x130] sm:$0xff] %vm792_vm1, %v1140_v48  ;;  %1165 = vtanh.f32 %v565_v47  ;;  %v586_v54 = vadd.f32 %v1025_v52, %v1326_v30  ;;  %v1053_v55 = vpop.f32.mrb[16].mxu1 }
 0x107   : > { %v1144_v51 = vpop.eup %1143  ;;  %801 = vst.msk [vmem:[%s1343_s28 + $0x40] sm:$0xff] %vm792_vm1, %v1142_v50  ;;  %v577_v56 = vpop.f32.mrb[17].mxu0  ;;  %1167 = vtanh.f32 %v677_v49  ;;  %v698_v58 = vadd.f32 %v1053_v55, %v1326_v30 }
 0x108   : > { %v1146_v53 = vpop.eup %1145  ;;  %829 = vst.msk [vmem:[%s1343_s28 + $0x120] sm:$0xff] %vm792_vm1, %v1144_v51  ;;  %v578_v59 = vadd.f32 %v1326_v30, %v577_v56  ;;  %v689_v60 = vpop.f32.mrb[17].mxu1  ;;  %1169 = vtanh.f32 %v586_v54 }
 0x109   : > { %v1148_v57 = vpop.eup %1147  ;;  %804 = vst.msk [vmem:[%s1343_s28 + $0x58] sm:$0xff] %vm792_vm1, %v1146_v53  ;;  %v1026_v61 = vpop.f32.mrb[18].mxu0  ;;  %v690_v63 = vadd.f32 %v1326_v30, %v689_v60  ;;  %1171 = vtanh.f32 %v698_v58 }
 0x10a   : > { %v1150_v62 = vpop.eup %1149  ;;  %832 = vst.msk [vmem:[%s1343_s28 + $0x138] sm:$0xff] %vm792_vm1, %v1148_v57  ;;  %v589_v0 = vadd.f32 %v1026_v61, %v1326_v30  ;;  %v1054_v1 = vpop.f32.mrb[18].mxu1  ;;  %1173 = vtanh.f32 %v578_v59 }
 0x10b   : > { %v580_v2 = vpop.f32.mrb[19].mxu0  ;;  %v1152_v3 = vpop.eup %1151  ;;  %802 = vst.msk [vmem:[%s1343_s28 + $0x48] sm:$0xff] %vm792_vm1, %v1150_v62  ;;  %v701_v4 = vadd.f32 %v1054_v1, %v1326_v30  ;;  %1175 = vtanh.f32 %v690_v63 }
 0x10c   : > { %v692_v5 = vpop.f32.mrb[19].mxu1  ;;  %v1154_v6 = vpop.eup %1153  ;;  %830 = vst.msk [vmem:[%s1343_s28 + $0x128] sm:$0xff] %vm792_vm1, %v1152_v3  ;;  %v581_v7 = vadd.f32 %v1326_v30, %v580_v2  ;;  %1177 = vtanh.f32 %v589_v0 }
 0x10d   : > { %v1156_v8 = vpop.eup %1155  ;;  %807 = vst.msk [vmem:[%s1343_s28 + $0x70] sm:$0xff] %vm792_vm1, %v1154_v6  ;;  %v693_v9 = vadd.f32 %v1326_v30, %v692_v5  ;;  %1179 = vtanh.f32 %v701_v4  ;;  %v1029_v12 = vpop.f32.mrb[20].mxu0 }
 0x10e   : > { %v1158_v10 = vpop.eup %1157  ;;  %835 = vst.msk [vmem:[%s1343_s28 + $0x150] sm:$0xff] %vm792_vm1, %v1156_v8  ;;  %1181 = vtanh.f32 %v581_v7  ;;  %v602_v14 = vadd.f32 %v1029_v12, %v1326_v30  ;;  %v1057_v15 = vpop.f32.mrb[20].mxu1 }
 0x10f   : > { %v1160_v11 = vpop.eup %1159  ;;  %805 = vst.msk [vmem:[%s1343_s28 + $0x60] sm:$0xff] %vm792_vm1, %v1158_v10  ;;  %v593_v16 = vpop.f32.mrb[21].mxu0  ;;  %1183 = vtanh.f32 %v693_v9  ;;  %v714_v18 = vadd.f32 %v1057_v15, %v1326_v30 }
 0x110   : > { %v1162_v13 = vpop.eup %1161  ;;  %833 = vst.msk [vmem:[%s1343_s28 + $0x140] sm:$0xff] %vm792_vm1, %v1160_v11  ;;  %v594_v19 = vadd.f32 %v1326_v30, %v593_v16  ;;  %v705_v20 = vpop.f32.mrb[21].mxu1  ;;  %1185 = vtanh.f32 %v602_v14 }
 0x111   : > { %v1164_v17 = vpop.eup %1163  ;;  %808 = vst.msk [vmem:[%s1343_s28 + $0x78] sm:$0xff] %vm792_vm1, %v1162_v13  ;;  %v1030_v21 = vpop.f32.mrb[22].mxu0  ;;  %v706_v23 = vadd.f32 %v1326_v30, %v705_v20  ;;  %1187 = vtanh.f32 %v714_v18 }
 0x112   : > { %v1166_v22 = vpop.eup %1165  ;;  %836 = vst.msk [vmem:[%s1343_s28 + $0x158] sm:$0xff] %vm792_vm1, %v1164_v17  ;;  %v605_v24 = vadd.f32 %v1030_v21, %v1326_v30  ;;  %v1058_v25 = vpop.f32.mrb[22].mxu1  ;;  %1189 = vtanh.f32 %v594_v19 }
 0x113   : > { %v596_v26 = vpop.f32.mrb[23].mxu0  ;;  %v1168_v27 = vpop.eup %1167  ;;  %806 = vst.msk [vmem:[%s1343_s28 + $0x68] sm:$0xff] %vm792_vm1, %v1166_v22  ;;  %v717_v28 = vadd.f32 %v1058_v25, %v1326_v30  ;;  %1191 = vtanh.f32 %v706_v23 }
 0x114   : > { %v708_v29 = vpop.f32.mrb[23].mxu1  ;;  %v1170_v31 = vpop.eup %1169  ;;  %834 = vst.msk [vmem:[%s1343_s28 + $0x148] sm:$0xff] %vm792_vm1, %v1168_v27  ;;  %v597_v32 = vadd.f32 %v1326_v30, %v596_v26  ;;  %1193 = vtanh.f32 %v605_v24 }
 0x115   : > { %v1172_v33 = vpop.eup %1171  ;;  %811 = vst.msk [vmem:[%s1343_s28 + $0x90] sm:$0xff] %vm792_vm1, %v1170_v31  ;;  %v709_v34 = vadd.f32 %v1326_v30, %v708_v29  ;;  %1195 = vtanh.f32 %v717_v28  ;;  %v1033_v37 = vpop.f32.mrb[24].mxu0 }
 0x116   : > { %v1174_v35 = vpop.eup %1173  ;;  %839 = vst.msk [vmem:[%s1343_s28 + $0x170] sm:$0xff] %vm792_vm1, %v1172_v33  ;;  %1197 = vtanh.f32 %v597_v32  ;;  %v618_v39 = vadd.f32 %v1033_v37, %v1326_v30  ;;  %v1061_v40 = vpop.f32.mrb[24].mxu1 }
 0x117   : > { %v1176_v36 = vpop.eup %1175  ;;  %809 = vst.msk [vmem:[%s1343_s28 + $0x80] sm:$0xff] %vm792_vm1, %v1174_v35  ;;  %v609_v41 = vpop.f32.mrb[25].mxu0  ;;  %1199 = vtanh.f32 %v709_v34  ;;  %v730_v43 = vadd.f32 %v1061_v40, %v1326_v30 }
 0x118   : > { %v1178_v38 = vpop.eup %1177  ;;  %837 = vst.msk [vmem:[%s1343_s28 + $0x160] sm:$0xff] %vm792_vm1, %v1176_v36  ;;  %v610_v44 = vadd.f32 %v1326_v30, %v609_v41  ;;  %v721_v45 = vpop.f32.mrb[25].mxu1  ;;  %1201 = vtanh.f32 %v618_v39 }
 0x119   : > { %v1180_v42 = vpop.eup %1179  ;;  %812 = vst.msk [vmem:[%s1343_s28 + $0x98] sm:$0xff] %vm792_vm1, %v1178_v38  ;;  %v1034_v46 = vpop.f32.mrb[26].mxu0  ;;  %v722_v48 = vadd.f32 %v1326_v30, %v721_v45  ;;  %1203 = vtanh.f32 %v730_v43 }
 0x11a   : > { %v1182_v47 = vpop.eup %1181  ;;  %840 = vst.msk [vmem:[%s1343_s28 + $0x178] sm:$0xff] %vm792_vm1, %v1180_v42  ;;  %v621_v49 = vadd.f32 %v1034_v46, %v1326_v30  ;;  %v1062_v50 = vpop.f32.mrb[26].mxu1  ;;  %1205 = vtanh.f32 %v610_v44 }
 0x11b   : > { %v612_v51 = vpop.f32.mrb[27].mxu0  ;;  %v1184_v52 = vpop.eup %1183  ;;  %810 = vst.msk [vmem:[%s1343_s28 + $0x88] sm:$0xff] %vm792_vm1, %v1182_v47  ;;  %v733_v53 = vadd.f32 %v1062_v50, %v1326_v30  ;;  %1207 = vtanh.f32 %v722_v48 }
 0x11c   : > { %v724_v54 = vpop.f32.mrb[27].mxu1  ;;  %v1186_v55 = vpop.eup %1185  ;;  %838 = vst.msk [vmem:[%s1343_s28 + $0x168] sm:$0xff] %vm792_vm1, %v1184_v52  ;;  %v613_v56 = vadd.f32 %v1326_v30, %v612_v51  ;;  %1209 = vtanh.f32 %v621_v49 }
 0x11d   : > { %v1188_v57 = vpop.eup %1187  ;;  %815 = vst.msk [vmem:[%s1343_s28 + $0xb0] sm:$0xff] %vm792_vm1, %v1186_v55  ;;  %v725_v58 = vadd.f32 %v1326_v30, %v724_v54  ;;  %1211 = vtanh.f32 %v733_v53 }
 0x11e   : > { %v1190_v59 = vpop.eup %1189  ;;  %843 = vst.msk [vmem:[%s1343_s28 + $0x190] sm:$0xff] %vm792_vm1, %v1188_v57  ;;  %1213 = vtanh.f32 %v613_v56 }
 0x11f   : > { %v1192_v60 = vpop.eup %1191  ;;  %813 = vst.msk [vmem:[%s1343_s28 + $0xa0] sm:$0xff] %vm792_vm1, %v1190_v59  ;;  %1215 = vtanh.f32 %v725_v58 }
 0x120   : > { %v1194_v61 = vpop.eup %1193  ;;  %841 = vst.msk [vmem:[%s1343_s28 + $0x180] sm:$0xff] %vm792_vm1, %v1192_v60 }
 0x121   : > { %v1196_v62 = vpop.eup %1195  ;;  %816 = vst.msk [vmem:[%s1343_s28 + $0xb8] sm:$0xff] %vm792_vm1, %v1194_v61 }
 0x122   : > { %v1198_v30 = vpop.eup %1197  ;;  %844 = vst.msk [vmem:[%s1343_s28 + $0x198] sm:$0xff] %vm792_vm1, %v1196_v62 }
 0x123   : > { %v1200_v63 = vpop.eup %1199  ;;  %814 = vst.msk [vmem:[%s1343_s28 + $0xa8] sm:$0xff] %vm792_vm1, %v1198_v30 }
 0x124   : > { %v1202_v0 = vpop.eup %1201  ;;  %842 = vst.msk [vmem:[%s1343_s28 + $0x188] sm:$0xff] %vm792_vm1, %v1200_v63 }
 0x125   : > { %v1204_v1 = vpop.eup %1203  ;;  %819 = vst.msk [vmem:[%s1343_s28 + $0xd0] sm:$0xff] %vm792_vm1, %v1202_v0 }
 0x126   : > { %v1206_v2 = vpop.eup %1205  ;;  %847 = vst.msk [vmem:[%s1343_s28 + $0x1b0] sm:$0xff] %vm792_vm1, %v1204_v1 }
 0x127   : > { %v1208_v3 = vpop.eup %1207  ;;  %817 = vst.msk [vmem:[%s1343_s28 + $0xc0] sm:$0xff] %vm792_vm1, %v1206_v2 }
 0x128   : > { %v1210_v4 = vpop.eup %1209  ;;  %845 = vst.msk [vmem:[%s1343_s28 + $0x1a0] sm:$0xff] %vm792_vm1, %v1208_v3 }
 0x129   : > { %v1212_v5 = vpop.eup %1211  ;;  %820 = vst.msk [vmem:[%s1343_s28 + $0xd8] sm:$0xff] %vm792_vm1, %v1210_v4 }
 0x12a   : > { %v1214_v6 = vpop.eup %1213  ;;  %848 = vst.msk [vmem:[%s1343_s28 + $0x1b8] sm:$0xff] %vm792_vm1, %v1212_v5 }
 0x12b   : > { %v1216_v7 = vpop.eup %1215  ;;  %818 = vst.msk [vmem:[%s1343_s28 + $0xc8] sm:$0xff] %vm792_vm1, %v1214_v6 }
 0x12c   : > { %846 = vst.msk [vmem:[%s1343_s28 + $0x1a8] sm:$0xff] %vm792_vm1, %v1216_v7 }
 0x12d PF: > { %s13_s12 = sadd.s32 1, %s1223_s12  }
 0x12e   : > { %p10_p4 = scmp.ge.s32.totalorder %s13_s12, 7  }
 0x130   :  { %12 = sbr.rel (!%p10_p4) target bundleno = 1 (0x1), region = 62 }

</bundles_post_ra>
